<compile_context>
chip_gen: v7x
topology: tpu7x:2x2x1
jax: 0.10.0
libtpu: 0.0.40
codegen_flags: <defaults>
</compile_context>

<pallas_src>
import functools

import jax
import jax.numpy as jnp
from jax.experimental import pallas as pl
from jax.experimental.pallas import tpu as pltpu


def _round_up(x, m):
    return ((x + m - 1) // m) * m


def _pad_gate_blocks(w, h, hp, axis):
    """`w` has 4*h along `axis` in PyTorch gate order [i,f,g,o]; zero-pad each gate h->hp."""
    if h == hp:
        return w
    parts = jnp.split(w, 4, axis=axis)
    pad = [(0, 0)] * w.ndim
    pad[axis] = (0, hp - h)
    return jnp.concatenate([jnp.pad(p, pad) for p in parts], axis=axis)


def _sigmoid(x):
    # sigmoid(x) == 0.5*(tanh(x/2)+1): a single EUP (tanh) push per gate instead of
    # exp + reciprocal; the serial recurrence is EUP-slot bound once the recurrent
    # matmul is small, so this trims the per-timestep critical path.
    return 0.5 * (jnp.tanh(0.5 * x) + 1.0)


def _vmem_capacity_bytes():
    try:
        return int(pltpu.get_tpu_info().vmem_capacity_bytes)
    except Exception:
        return 64 * 1024 * 1024  # conservative fallback: v7x per-TC VMEM


def _vmem_footprint(tb, bblk, e, hp, cp, weight_bufs):
    bf16, f32 = 2, 4
    x_blocks = 2 * tb * bblk * e * bf16                                   # double-buffered x chunk
    weights = (e * 4 * hp + hp * 4 * hp + hp * cp) * bf16 * weight_bufs   # W_ih^T, W_hh^T, W_fc^T
    biases = (4 * hp + cp) * f32 * weight_bufs
    xg = 2 * tb * bblk * 4 * hp * f32                                     # two pipeline slots
    state = 2 * bblk * hp * f32                                           # h, c
    outs = 2 * (bblk * cp + bblk * hp) * f32
    return x_blocks + weights + biases + xg + state + outs


def lstm_kernel(x_ref, wih_ref, whh_ref, b_ref, wfc_ref, bfc_ref,
                logits_ref, hlast_ref,
                h_sc, c_sc, xg_sc,
                *, seq_len, n_chunks, time_block, unroll, needs_mask):
    t = pl.program_id(1)               # time-pipeline step: 0 .. n_chunks (inclusive)
    TB = time_block
    Bblk, Hp = h_sc.shape
    E = x_ref.shape[-1]

    @pl.when(t == 0)
    def _init():                       # fresh h/c per batch block
        h_sc[...] = jnp.zeros_like(h_sc)
        c_sc[...] = jnp.zeros_like(c_sc)

    # Stage A: input projection for chunk t (one tall MXU matmul + fused bias),
    # computed one chunk AHEAD of the recurrence, into slot t % 2.
    @pl.when(t < n_chunks)
    def _project():
        x_flat = x_ref[...].reshape(TB * Bblk, E)                          # bf16
        xg = jnp.dot(x_flat, wih_ref[...],
                     preferred_element_type=jnp.float32) + b_ref[...]      # (TB*Bblk, 4Hp) f32
        xg_sc[t % 2] = xg.reshape(TB, Bblk, 4 * Hp)

    # Stage B: serial recurrence for chunk t-1 from the other slot.
    @pl.when(t > 0)
    def _recur():
        j = t - 1
        xg_chunk = xg_sc.at[j % 2]                                         # (TB, Bblk, 4Hp) view
        base = j * TB
        whh = whh_ref[...]                                                 # hoisted out of the loop

        def step(s, carry):
            h, c = carry                                                   # f32 (Bblk, Hp)
            gates = xg_chunk[s] + jnp.dot(h.astype(jnp.bfloat16), whh,
                                          preferred_element_type=jnp.float32)
            i_g = _sigmoid(gates[:, 0 * Hp:1 * Hp])
            f_g = _sigmoid(gates[:, 1 * Hp:2 * Hp])
            g_g = jnp.tanh(gates[:, 2 * Hp:3 * Hp])
            o_g = _sigmoid(gates[:, 3 * Hp:4 * Hp])
            c_new = f_g * c + i_g * g_g
            h_new = o_g * jnp.tanh(c_new)
            if needs_mask:
                # Padded timesteps only exist in the final chunk; freezing h/c keeps them inert.
                valid = (base + s) < seq_len
                h_new = jnp.where(valid, h_new, h)
                c_new = jnp.where(valid, c_new, c)
            return h_new, c_new

        h_fin, c_fin = jax.lax.fori_loop(0, TB, step, (h_sc[...], c_sc[...]),
                                         unroll=unroll)
        h_sc[...] = h_fin
        c_sc[...] = c_fin

    @pl.when(t == n_chunks)
    def _finalize():
        h_fin = h_sc[...]
        hlast_ref[...] = h_fin.astype(hlast_ref.dtype)
        logits = jnp.dot(h_fin.astype(jnp.bfloat16), wfc_ref[...],
                         preferred_element_type=jnp.float32) + bfc_ref[...]
        logits_ref[...] = logits.astype(logits_ref.dtype)


def lstm_classifier_forward(token_ids, params, *, last=False,
                            time_block=32, batch_block=256):
    """token_ids: int32 (B, T). Returns logits (B, C) [and h_last (B, H) if last=True]."""
    emb = params["embedding"]           # (V, E)
    w_ih = params["w_ih"]               # (4H, E)  PyTorch layout, gate order [i,f,g,o]
    w_hh = params["w_hh"]               # (4H, H)
    b_ih = params["b_ih"]               # (4H,)
    b_hh = params["b_hh"]               # (4H,)
    w_fc = params["w_fc"]               # (C, H)
    b_fc = params["b_fc"]               # (C,)
    # TODO(synk): only num_layers=1 (the module default) is implemented here.

    B, T = token_ids.shape
    E = emb.shape[1]
    H = w_hh.shape[1]
    C = w_fc.shape[0]

    Hp = _round_up(H, 128)                                    # lane-dense hidden
    Cp = _round_up(C, 128)                                    # lane-dense logits
    Bblk = min(_round_up(B, 8), _round_up(batch_block, 8))    # per-core batch slice (keep >= MXU rows when B allows)
    Bp = _round_up(B, Bblk)
    nB = Bp // Bblk

    # --- time-chunk size: as large as the per-generation VMEM budget allows.
    cap = _vmem_capacity_bytes()
    budget = int(cap * 0.6)
    TB = max(8, min(_round_up(time_block, 8), _round_up(T, 8)))
    while TB > 8 and _vmem_footprint(TB, Bblk, E, Hp, Cp, weight_bufs=1) > budget:
        TB = max(8, (TB // 2) // 8 * 8)
    Tp = _round_up(T, TB)
    nT = Tp // TB
    footprint = _vmem_footprint(TB, Bblk, E, Hp, Cp, weight_bufs=2)   # worst case (fallback path)
    vmem_limit = int(min(max(int(footprint * 1.3) + (2 << 20), 16 << 20), int(cap * 0.9)))

    # --- embedding lookup (gather) in plain JAX; transpose the *token ids* (tiny) so the
    #     big activation tensor is produced time-major directly (no HBM round trip).
    # TODO(synk): pretrained GloVe weights are loaded from disk in the original module;
    #             here the embedding table comes from `params` (synthetic in the demo).
    tok = jnp.zeros((Bp, Tp), jnp.int32).at[:B, :T].set(token_ids)
    x_tm = jnp.take(emb, tok.T, axis=0).astype(jnp.bfloat16)           # (Tp, Bp, E)

    # --- weights: pre-transposed, per-gate zero-padded H->Hp, bf16 for the MXU.
    wih_t = _pad_gate_blocks(jnp.transpose(w_ih), H, Hp, axis=1).astype(jnp.bfloat16)      # (E, 4Hp)
    whh_t = jnp.pad(jnp.transpose(w_hh), ((0, Hp - H), (0, 0)))
    whh_t = _pad_gate_blocks(whh_t, H, Hp, axis=1).astype(jnp.bfloat16)                    # (Hp, 4Hp)
    bias = _pad_gate_blocks((b_ih + b_hh)[None, :], H, Hp, axis=1).astype(jnp.float32)     # (1, 4Hp)
    wfc_t = jnp.pad(jnp.transpose(w_fc), ((0, Hp - H), (0, Cp - C))).astype(jnp.bfloat16)  # (Hp, Cp)
    bfc = jnp.pad(b_fc, (0, Cp - C)).reshape(1, Cp).astype(jnp.float32)                    # (1, Cp)

    kernel = functools.partial(
        lstm_kernel, seq_len=T, n_chunks=nT, time_block=TB,
        unroll=min(8, TB), needs_mask=(Tp != T))

    def _call(single_buffer_weights):
        # Constant operands never re-DMA; request single buffering to halve their VMEM cost.
        wkw = dict(pipeline_mode=pl.Buffered(1)) if single_buffer_weights else {}
        grid_spec = pltpu.PrefetchScalarGridSpec(
            num_scalar_prefetch=0,
            grid=(nB, nT + 1),     # +1 step: projection runs one chunk ahead of the recurrence
            in_specs=[
                pl.BlockSpec((TB, Bblk, E), lambda b, t: (jnp.minimum(t, nT - 1), b, 0)),
                pl.BlockSpec((E, 4 * Hp), lambda b, t: (0, 0), **wkw),      # W_ih^T
                pl.BlockSpec((Hp, 4 * Hp), lambda b, t: (0, 0), **wkw),     # W_hh^T
                pl.BlockSpec((1, 4 * Hp), lambda b, t: (0, 0), **wkw),      # b_ih + b_hh
                pl.BlockSpec((Hp, Cp), lambda b, t: (0, 0), **wkw),         # W_fc^T
                pl.BlockSpec((1, Cp), lambda b, t: (0, 0), **wkw),          # b_fc
            ],
            out_specs=[
                pl.BlockSpec((Bblk, Cp), lambda b, t: (b, 0)),              # logits (resident)
                pl.BlockSpec((Bblk, Hp), lambda b, t: (b, 0)),              # h_last (resident)
            ],
            scratch_shapes=[
                pltpu.VMEM((Bblk, Hp), jnp.float32),                        # h state
                pltpu.VMEM((Bblk, Hp), jnp.float32),                        # c state
                # Two-slot pipeline buffer for per-chunk input-gate pre-activations.
                # TODO(synk): optionally bf16 on v7x to halve this (validate precision first).
                pltpu.VMEM((2, TB, Bblk, 4 * Hp), jnp.float32),
            ],
        )
        return pl.pallas_call(
            kernel,
            out_shape=(jax.ShapeDtypeStruct((Bp, Cp), jnp.float32),
                       jax.ShapeDtypeStruct((Bp, Hp), jnp.float32)),
            grid_spec=grid_spec,
            compiler_params=pltpu.CompilerParams(
                dimension_semantics=("parallel", "arbitrary"),
                vmem_limit_bytes=vmem_limit),
        )(x_tm, wih_t, whh_t, bias, wfc_t, bfc)

    try:
        logits_p, hlast_p = _call(True)
    except Exception:
        # pipeline_mode=pl.Buffered(1) rejected by this JAX build -> default double-buffering.
        logits_p, hlast_p = _call(False)

    logits = logits_p[:B, :C]
    h_last = hlast_p[:B, :H]
    if last:
        return logits, h_last
    return logits


def _reference_forward(token_ids, params):
    """Pure-JAX f32 reference mirroring torch.nn.LSTM(batch_first=True) + Linear."""
    x = params["embedding"][token_ids]                       # (B, T, E)
    H = params["w_hh"].shape[1]
    B, T = token_ids.shape
    wih_t = params["w_ih"].T
    whh_t = params["w_hh"].T
    b = params["b_ih"] + params["b_hh"]
    h = jnp.zeros((B, H), jnp.float32)
    c = jnp.zeros((B, H), jnp.float32)
    for s in range(T):
        g = x[:, s, :] @ wih_t + h @ whh_t + b
        i = jax.nn.sigmoid(g[:, 0 * H:1 * H])
        f = jax.nn.sigmoid(g[:, 1 * H:2 * H])
        gg = jnp.tanh(g[:, 2 * H:3 * H])
        o = jax.nn.sigmoid(g[:, 3 * H:4 * H])
        c = f * c + i * gg
        h = o * jnp.tanh(c)
    logits = h @ params["w_fc"].T + params["b_fc"]
    return logits, h


def _init_params(key, vocab_size, wordvec_dim, hidden_size, num_classes):
    ks = jax.random.split(key, 7)
    scale = 0.1
    return {
        # TODO(synk): pretrained GloVe weights are loaded from disk in the original
        # module; here the embedding table is synthetic/deterministic instead.
        "embedding": scale * jax.random.normal(ks[0], (vocab_size, wordvec_dim), jnp.float32),
        "w_ih": scale * jax.random.normal(ks[1], (4 * hidden_size, wordvec_dim), jnp.float32),
        "w_hh": scale * jax.random.normal(ks[2], (4 * hidden_size, hidden_size), jnp.float32),
        "b_ih": scale * jax.random.normal(ks[3], (4 * hidden_size,), jnp.float32),
        "b_hh": scale * jax.random.normal(ks[4], (4 * hidden_size,), jnp.float32),
        "w_fc": scale * jax.random.normal(ks[5], (num_classes, hidden_size), jnp.float32),
        "b_fc": scale * jax.random.normal(ks[6], (num_classes,), jnp.float32),
    }


if __name__ == "__main__":
    B, T = 2, 8                 # batch, sequence length
    VOCAB = 50
    E = 32                      # wordvec_dim
    H = 32                      # hidden_size
    C = 4                       # num_classes

    key = jax.random.PRNGKey(0)
    pkey, dkey = jax.random.split(key)
    params = _init_params(pkey, VOCAB, E, H, C)
    token_ids = jax.random.randint(dkey, (B, T), 0, VOCAB, dtype=jnp.int32)

    logits, h_last = lstm_classifier_forward(token_ids, params, last=True)
    jax.block_until_ready((logits, h_last))

    assert logits.shape == (B, C) and h_last.shape == (B, H)
    assert bool(jnp.all(jnp.isfinite(logits))) and bool(jnp.all(jnp.isfinite(h_last)))

    # Validate against an f32 pure-JAX reference (kernel matmuls are bf16 -> loose tol).
    ref_logits, ref_h = _reference_forward(token_ids, params)
    assert float(jnp.max(jnp.abs(logits - ref_logits))) < 2e-2, "logits mismatch vs reference"
    assert float(jnp.max(jnp.abs(h_last - ref_h))) < 2e-2, "h_last mismatch vs reference"

    print("KERNEL_OK")
</pallas_src>

<mosaic_0001>
module attributes {stable_mosaic.version = 11 : i64} {
  func.func @lstm_kernel(%arg0: i32, %arg1: i32, %arg2: memref<8x8x32xbf16, #tpu.memory_space<vmem>>, %arg3: memref<32x512xbf16, #tpu.memory_space<vmem>>, %arg4: memref<128x512xbf16, #tpu.memory_space<vmem>>, %arg5: memref<1x512xf32, #tpu.memory_space<vmem>>, %arg6: memref<128x128xbf16, #tpu.memory_space<vmem>>, %arg7: memref<1x128xf32, #tpu.memory_space<vmem>>, %arg8: memref<8x128xf32, #tpu.memory_space<vmem>>, %arg9: memref<8x128xf32, #tpu.memory_space<vmem>>, %arg10: memref<8x128xf32, #tpu.memory_space<vmem>>, %arg11: memref<8x128xf32, #tpu.memory_space<vmem>>, %arg12: memref<2x8x8x512xf32, #tpu.memory_space<vmem>>) attributes {dimension_semantics = [#tpu.dimension_semantics<parallel>, #tpu.dimension_semantics<arbitrary>], iteration_bounds = array<i64: 1, 2>, scalar_prefetch = 0 : i64, scratch_operands = 3 : i64, tpu.core_type = #tpu.core_type<tc>, window_params = [{transform_indices = @transform_0, window_bounds = array<i64: 8, 8, 32>}, {pipeline_mode = #tpu.pipeline_mode<synchronous>, transform_indices = @transform_1, window_bounds = array<i64: 32, 512>}, {pipeline_mode = #tpu.pipeline_mode<synchronous>, transform_indices = @transform_2, window_bounds = array<i64: 128, 512>}, {pipeline_mode = #tpu.pipeline_mode<synchronous>, transform_indices = @transform_3, window_bounds = array<i64: 1, 512>}, {pipeline_mode = #tpu.pipeline_mode<synchronous>, transform_indices = @transform_4, window_bounds = array<i64: 128, 128>}, {pipeline_mode = #tpu.pipeline_mode<synchronous>, transform_indices = @transform_5, window_bounds = array<i64: 1, 128>}, {transform_indices = @transform_6, window_bounds = array<i64: 8, 128>}, {transform_indices = @transform_7, window_bounds = array<i64: 8, 128>}]} {
    %c0_i32 = arith.constant 0 : i32
    %0 = arith.cmpi eq, %arg1, %c0_i32 : i32
    %1 = arith.extui %0 : i1 to i32
    %c0_i32_0 = arith.constant 0 : i32
    %2 = arith.cmpi ne, %1, %c0_i32_0 : i32
    scf.if %2 {
      %cst = arith.constant 0.000000e+00 : f32
      %12 = vector.broadcast %cst : f32 to vector<8x128xf32>
      %c0 = arith.constant 0 : index
      %c0_6 = arith.constant 0 : index
      %13 = vector.load %arg10[%c0, %c0_6] : memref<8x128xf32, #tpu.memory_space<vmem>>, vector<8x128xf32>
      tpu.vector_store %arg10[%c0, %c0_6], %12 {strides = array<i32>} : memref<8x128xf32, #tpu.memory_space<vmem>>, vector<8x128xf32>,
      %cst_7 = arith.constant 0.000000e+00 : f32
      %14 = vector.broadcast %cst_7 : f32 to vector<8x128xf32>
      %c0_8 = arith.constant 0 : index
      %c0_9 = arith.constant 0 : index
      %15 = vector.load %arg11[%c0_8, %c0_9] : memref<8x128xf32, #tpu.memory_space<vmem>>, vector<8x128xf32>
      tpu.vector_store %arg11[%c0_8, %c0_9], %14 {strides = array<i32>} : memref<8x128xf32, #tpu.memory_space<vmem>>, vector<8x128xf32>,
    } else {
    }
    %c1_i32 = arith.constant 1 : i32
    %3 = arith.cmpi slt, %arg1, %c1_i32 : i32
    %4 = arith.extui %3 : i1 to i32
    %c0_i32_1 = arith.constant 0 : i32
    %5 = arith.cmpi ne, %4, %c0_i32_1 : i32
    scf.if %5 {
      %c0 = arith.constant 0 : index
      %c0_6 = arith.constant 0 : index
      %c0_7 = arith.constant 0 : index
      %12 = vector.load %arg2[%c0, %c0_6, %c0_7] : memref<8x8x32xbf16, #tpu.memory_space<vmem>>, vector<8x8x32xbf16>
      %13 = vector.shape_cast %12 : vector<8x8x32xbf16> to vector<64x32xbf16>
      %c0_8 = arith.constant 0 : index
      %c0_9 = arith.constant 0 : index
      %14 = vector.load %arg3[%c0_8, %c0_9] : memref<32x512xbf16, #tpu.memory_space<vmem>>, vector<32x512xbf16>
      %cst = arith.constant dense<0.000000e+00> : vector<64x512xf32>
      %15 = tpu.matmul %13, %14, %cst {dimension_numbers = #tpu.dot_dimension_numbers<[1], [0], [0], [1], [0, 0, 1, 1], [], []>} : vector<64x32xbf16>, vector<32x512xbf16>, vector<64x512xf32> -> vector<64x512xf32>
      %c0_10 = arith.constant 0 : index
      %c0_11 = arith.constant 0 : index
      %16 = vector.load %arg5[%c0_10, %c0_11] : memref<1x512xf32, #tpu.memory_space<vmem>>, vector<1x512xf32>
      %17 = vector.broadcast %16 : vector<1x512xf32> to vector<64x512xf32>
      %18 = arith.addf %15, %17 : vector<64x512xf32>
      %19 = vector.shape_cast %18 : vector<64x512xf32> to vector<8x8x512xf32>
      %c2_i32 = arith.constant 2 : i32
      %c0_i32_12 = arith.constant 0 : i32
      %20 = arith.cmpi eq, %c2_i32, %c0_i32_12 : i32
      %c1_i32_13 = arith.constant 1 : i32
      %21 = arith.select %20, %c1_i32_13, %c2_i32 : i32
      %22 = arith.remsi %arg1, %21 : i32
      %c0_i32_14 = arith.constant 0 : i32
      %23 = arith.cmpi ne, %22, %c0_i32_14 : i32
      %c0_i32_15 = arith.constant 0 : i32
      %24 = arith.cmpi slt, %22, %c0_i32_15 : i32
      %c0_i32_16 = arith.constant 0 : i32
      %25 = arith.cmpi slt, %21, %c0_i32_16 : i32
      %26 = arith.xori %24, %25 : i1
      %27 = arith.andi %26, %23 : i1
      %28 = arith.addi %22, %21 : i32
      %29 = arith.select %27, %28, %22 : i32
      %30 = arith.index_cast %29 : i32 to index
      %c0_17 = arith.constant 0 : index
      %c0_18 = arith.constant 0 : index
      %c0_19 = arith.constant 0 : index
      %31 = vector.load %arg12[%30, %c0_17, %c0_18, %c0_19] : memref<2x8x8x512xf32, #tpu.memory_space<vmem>>, vector<1x8x8x512xf32>
      %32 = vector.shape_cast %31 : vector<1x8x8x512xf32> to vector<8x8x512xf32>
      %33 = vector.shape_cast %19 : vector<8x8x512xf32> to vector<1x8x8x512xf32>
      tpu.vector_store %arg12[%30, %c0_17, %c0_18, %c0_19], %33 {strides = array<i32>} : memref<2x8x8x512xf32, #tpu.memory_space<vmem>>, vector<1x8x8x512xf32>,
    } else {
    }
    %c0_i32_2 = arith.constant 0 : i32
    %6 = arith.cmpi sgt, %arg1, %c0_i32_2 : i32
    %7 = arith.extui %6 : i1 to i32
    %c0_i32_3 = arith.constant 0 : i32
    %8 = arith.cmpi ne, %7, %c0_i32_3 : i32
    scf.if %8 {
      %c1_i32_6 = arith.constant 1 : i32
      %12 = arith.subi %arg1, %c1_i32_6 : i32
      %c2_i32 = arith.constant 2 : i32
      %c0_i32_7 = arith.constant 0 : i32
      %13 = arith.cmpi eq, %c2_i32, %c0_i32_7 : i32
      %c1_i32_8 = arith.constant 1 : i32
      %14 = arith.select %13, %c1_i32_8, %c2_i32 : i32
      %15 = arith.remsi %12, %14 : i32
      %c0_i32_9 = arith.constant 0 : i32
      %16 = arith.cmpi ne, %15, %c0_i32_9 : i32
      %c0_i32_10 = arith.constant 0 : i32
      %17 = arith.cmpi slt, %15, %c0_i32_10 : i32
      %c0_i32_11 = arith.constant 0 : i32
      %18 = arith.cmpi slt, %14, %c0_i32_11 : i32
      %19 = arith.xori %17, %18 : i1
      %20 = arith.andi %19, %16 : i1
      %21 = arith.addi %15, %14 : i32
      %22 = arith.select %20, %21, %15 : i32
      %c0 = arith.constant 0 : index
      %c0_12 = arith.constant 0 : index
      %23 = vector.load %arg4[%c0, %c0_12] : memref<128x512xbf16, #tpu.memory_space<vmem>>, vector<128x512xbf16>
      %c0_13 = arith.constant 0 : index
      %c0_14 = arith.constant 0 : index
      %24 = vector.load %arg10[%c0_13, %c0_14] : memref<8x128xf32, #tpu.memory_space<vmem>>, vector<8x128xf32>
      %c0_15 = arith.constant 0 : index
      %c0_16 = arith.constant 0 : index
      %25 = vector.load %arg11[%c0_15, %c0_16] : memref<8x128xf32, #tpu.memory_space<vmem>>, vector<8x128xf32>
      %c0_i32_17 = arith.constant 0 : i32
      %c0_i32_18 = arith.constant 0 : i32
      %c0_i32_19 = arith.constant 0 : i32
      %c0_i32_20 = arith.constant 0 : i32
      %26 = tpu.memref_slice %arg12[%22, %c0_i32_18, %c0_i32_19, %c0_i32_20] : memref<2x8x8x512xf32, #tpu.memory_space<vmem>> -> memref<1x8x8x512xf32, #tpu.memory_space<vmem>>
      %27 = tpu.memref_squeeze %26 : memref<1x8x8x512xf32, #tpu.memory_space<vmem>> -> memref<8x8x512xf32, #tpu.memory_space<vmem>>
      %28 = arith.index_cast %c0_i32_17 : i32 to index
      %c0_21 = arith.constant 0 : index
      %c0_22 = arith.constant 0 : index
      %29 = vector.load %27[%28, %c0_21, %c0_22] : memref<8x8x512xf32, #tpu.memory_space<vmem>>, vector<1x8x512xf32>
      %30 = vector.shape_cast %29 : vector<1x8x512xf32> to vector<8x512xf32>
      %31 = arith.truncf %24 : vector<8x128xf32> to vector<8x128xbf16>
      %cst = arith.constant dense<0.000000e+00> : vector<8x512xf32>
      %32 = tpu.matmul %31, %23, %cst {dimension_numbers = #tpu.dot_dimension_numbers<[1], [0], [0], [1], [0, 0, 1, 1], [], []>} : vector<8x128xbf16>, vector<128x512xbf16>, vector<8x512xf32> -> vector<8x512xf32>
      %33 = arith.addf %30, %32 : vector<8x512xf32>
      %34 = vector.extract_strided_slice %33 {offsets = [0, 0], sizes = [8, 128], strides = [1, 1]} : vector<8x512xf32> to vector<8x128xf32>
      %cst_23 = arith.constant 5.000000e-01 : f32
      %35 = vector.broadcast %cst_23 : f32 to vector<8x128xf32>
      %36 = arith.mulf %35, %34 : vector<8x128xf32>
      %37 = math.tanh %36 : vector<8x128xf32>
      %cst_24 = arith.constant 1.000000e+00 : f32
      %38 = vector.broadcast %cst_24 : f32 to vector<8x128xf32>
      %39 = arith.addf %37, %38 : vector<8x128xf32>
      %cst_25 = arith.constant 5.000000e-01 : f32
      %40 = vector.broadcast %cst_25 : f32 to vector<8x128xf32>
      %41 = arith.mulf %40, %39 : vector<8x128xf32>
      %42 = vector.extract_strided_slice %33 {offsets = [0, 128], sizes = [8, 128], strides = [1, 1]} : vector<8x512xf32> to vector<8x128xf32>
      %cst_26 = arith.constant 5.000000e-01 : f32
      %43 = vector.broadcast %cst_26 : f32 to vector<8x128xf32>
      %44 = arith.mulf %43, %42 : vector<8x128xf32>
      %45 = math.tanh %44 : vector<8x128xf32>
      %cst_27 = arith.constant 1.000000e+00 : f32
      %46 = vector.broadcast %cst_27 : f32 to vector<8x128xf32>
      %47 = arith.addf %45, %46 : vector<8x128xf32>
      %cst_28 = arith.constant 5.000000e-01 : f32
      %48 = vector.broadcast %cst_28 : f32 to vector<8x128xf32>
      %49 = arith.mulf %48, %47 : vector<8x128xf32>
      %50 = vector.extract_strided_slice %33 {offsets = [0, 256], sizes = [8, 128], strides = [1, 1]} : vector<8x512xf32> to vector<8x128xf32>
      %51 = math.tanh %50 : vector<8x128xf32>
      %52 = vector.extract_strided_slice %33 {offsets = [0, 384], sizes = [8, 128], strides = [1, 1]} : vector<8x512xf32> to vector<8x128xf32>
      %cst_29 = arith.constant 5.000000e-01 : f32
      %53 = vector.broadcast %cst_29 : f32 to vector<8x128xf32>
      %54 = arith.mulf %53, %52 : vector<8x128xf32>
      %55 = math.tanh %54 : vector<8x128xf32>
      %cst_30 = arith.constant 1.000000e+00 : f32
      %56 = vector.broadcast %cst_30 : f32 to vector<8x128xf32>
      %57 = arith.addf %55, %56 : vector<8x128xf32>
      %cst_31 = arith.constant 5.000000e-01 : f32
      %58 = vector.broadcast %cst_31 : f32 to vector<8x128xf32>
      %59 = arith.mulf %58, %57 : vector<8x128xf32>
      %60 = arith.mulf %49, %25 : vector<8x128xf32>
      %61 = arith.mulf %41, %51 : vector<8x128xf32>
      %62 = arith.addf %60, %61 : vector<8x128xf32>
      %63 = math.tanh %62 : vector<8x128xf32>
      %64 = arith.mulf %59, %63 : vector<8x128xf32>
      %c1_i32_32 = arith.constant 1 : i32
      %c0_i32_33 = arith.constant 0 : i32
      %c0_i32_34 = arith.constant 0 : i32
      %c0_i32_35 = arith.constant 0 : i32
      %65 = tpu.memref_slice %arg12[%22, %c0_i32_33, %c0_i32_34, %c0_i32_35] : memref<2x8x8x512xf32, #tpu.memory_space<vmem>> -> memref<1x8x8x512xf32, #tpu.memory_space<vmem>>
      %66 = tpu.memref_squeeze %65 : memref<1x8x8x512xf32, #tpu.memory_space<vmem>> -> memref<8x8x512xf32, #tpu.memory_space<vmem>>
      %67 = arith.index_cast %c1_i32_32 : i32 to index
      %c0_36 = arith.constant 0 : index
      %c0_37 = arith.constant 0 : index
      %68 = vector.load %66[%67, %c0_36, %c0_37] : memref<8x8x512xf32, #tpu.memory_space<vmem>>, vector<1x8x512xf32>
      %69 = vector.shape_cast %68 : vector<1x8x512xf32> to vector<8x512xf32>
      %70 = arith.truncf %64 : vector<8x128xf32> to vector<8x128xbf16>
      %cst_38 = arith.constant dense<0.000000e+00> : vector<8x512xf32>
      %71 = tpu.matmul %70, %23, %cst_38 {dimension_numbers = #tpu.dot_dimension_numbers<[1], [0], [0], [1], [0, 0, 1, 1], [], []>} : vector<8x128xbf16>, vector<128x512xbf16>, vector<8x512xf32> -> vector<8x512xf32>
      %72 = arith.addf %69, %71 : vector<8x512xf32>
      %73 = vector.extract_strided_slice %72 {offsets = [0, 0], sizes = [8, 128], strides = [1, 1]} : vector<8x512xf32> to vector<8x128xf32>
      %cst_39 = arith.constant 5.000000e-01 : f32
      %74 = vector.broadcast %cst_39 : f32 to vector<8x128xf32>
      %75 = arith.mulf %74, %73 : vector<8x128xf32>
      %76 = math.tanh %75 : vector<8x128xf32>
      %cst_40 = arith.constant 1.000000e+00 : f32
      %77 = vector.broadcast %cst_40 : f32 to vector<8x128xf32>
      %78 = arith.addf %76, %77 : vector<8x128xf32>
      %cst_41 = arith.constant 5.000000e-01 : f32
      %79 = vector.broadcast %cst_41 : f32 to vector<8x128xf32>
      %80 = arith.mulf %79, %78 : vector<8x128xf32>
      %81 = vector.extract_strided_slice %72 {offsets = [0, 128], sizes = [8, 128], strides = [1, 1]} : vector<8x512xf32> to vector<8x128xf32>
      %cst_42 = arith.constant 5.000000e-01 : f32
      %82 = vector.broadcast %cst_42 : f32 to vector<8x128xf32>
      %83 = arith.mulf %82, %81 : vector<8x128xf32>
      %84 = math.tanh %83 : vector<8x128xf32>
      %cst_43 = arith.constant 1.000000e+00 : f32
      %85 = vector.broadcast %cst_43 : f32 to vector<8x128xf32>
      %86 = arith.addf %84, %85 : vector<8x128xf32>
      %cst_44 = arith.constant 5.000000e-01 : f32
      %87 = vector.broadcast %cst_44 : f32 to vector<8x128xf32>
      %88 = arith.mulf %87, %86 : vector<8x128xf32>
      %89 = vector.extract_strided_slice %72 {offsets = [0, 256], sizes = [8, 128], strides = [1, 1]} : vector<8x512xf32> to vector<8x128xf32>
      %90 = math.tanh %89 : vector<8x128xf32>
      %91 = vector.extract_strided_slice %72 {offsets = [0, 384], sizes = [8, 128], strides = [1, 1]} : vector<8x512xf32> to vector<8x128xf32>
      %cst_45 = arith.constant 5.000000e-01 : f32
      %92 = vector.broadcast %cst_45 : f32 to vector<8x128xf32>
      %93 = arith.mulf %92, %91 : vector<8x128xf32>
      %94 = math.tanh %93 : vector<8x128xf32>
      %cst_46 = arith.constant 1.000000e+00 : f32
      %95 = vector.broadcast %cst_46 : f32 to vector<8x128xf32>
      %96 = arith.addf %94, %95 : vector<8x128xf32>
      %cst_47 = arith.constant 5.000000e-01 : f32
      %97 = vector.broadcast %cst_47 : f32 to vector<8x128xf32>
      %98 = arith.mulf %97, %96 : vector<8x128xf32>
      %99 = arith.mulf %88, %62 : vector<8x128xf32>
      %100 = arith.mulf %80, %90 : vector<8x128xf32>
      %101 = arith.addf %99, %100 : vector<8x128xf32>
      %102 = math.tanh %101 : vector<8x128xf32>
      %103 = arith.mulf %98, %102 : vector<8x128xf32>
      %c2_i32_48 = arith.constant 2 : i32
      %c0_i32_49 = arith.constant 0 : i32
      %c0_i32_50 = arith.constant 0 : i32
      %c0_i32_51 = arith.constant 0 : i32
      %104 = tpu.memref_slice %arg12[%22, %c0_i32_49, %c0_i32_50, %c0_i32_51] : memref<2x8x8x512xf32, #tpu.memory_space<vmem>> -> memref<1x8x8x512xf32, #tpu.memory_space<vmem>>
      %105 = tpu.memref_squeeze %104 : memref<1x8x8x512xf32, #tpu.memory_space<vmem>> -> memref<8x8x512xf32, #tpu.memory_space<vmem>>
      %106 = arith.index_cast %c2_i32_48 : i32 to index
      %c0_52 = arith.constant 0 : index
      %c0_53 = arith.constant 0 : index
      %107 = vector.load %105[%106, %c0_52, %c0_53] : memref<8x8x512xf32, #tpu.memory_space<vmem>>, vector<1x8x512xf32>
      %108 = vector.shape_cast %107 : vector<1x8x512xf32> to vector<8x512xf32>
      %109 = arith.truncf %103 : vector<8x128xf32> to vector<8x128xbf16>
      %cst_54 = arith.constant dense<0.000000e+00> : vector<8x512xf32>
      %110 = tpu.matmul %109, %23, %cst_54 {dimension_numbers = #tpu.dot_dimension_numbers<[1], [0], [0], [1], [0, 0, 1, 1], [], []>} : vector<8x128xbf16>, vector<128x512xbf16>, vector<8x512xf32> -> vector<8x512xf32>
      %111 = arith.addf %108, %110 : vector<8x512xf32>
      %112 = vector.extract_strided_slice %111 {offsets = [0, 0], sizes = [8, 128], strides = [1, 1]} : vector<8x512xf32> to vector<8x128xf32>
      %cst_55 = arith.constant 5.000000e-01 : f32
      %113 = vector.broadcast %cst_55 : f32 to vector<8x128xf32>
      %114 = arith.mulf %113, %112 : vector<8x128xf32>
      %115 = math.tanh %114 : vector<8x128xf32>
      %cst_56 = arith.constant 1.000000e+00 : f32
      %116 = vector.broadcast %cst_56 : f32 to vector<8x128xf32>
      %117 = arith.addf %115, %116 : vector<8x128xf32>
      %cst_57 = arith.constant 5.000000e-01 : f32
      %118 = vector.broadcast %cst_57 : f32 to vector<8x128xf32>
      %119 = arith.mulf %118, %117 : vector<8x128xf32>
      %120 = vector.extract_strided_slice %111 {offsets = [0, 128], sizes = [8, 128], strides = [1, 1]} : vector<8x512xf32> to vector<8x128xf32>
      %cst_58 = arith.constant 5.000000e-01 : f32
      %121 = vector.broadcast %cst_58 : f32 to vector<8x128xf32>
      %122 = arith.mulf %121, %120 : vector<8x128xf32>
      %123 = math.tanh %122 : vector<8x128xf32>
      %cst_59 = arith.constant 1.000000e+00 : f32
      %124 = vector.broadcast %cst_59 : f32 to vector<8x128xf32>
      %125 = arith.addf %123, %124 : vector<8x128xf32>
      %cst_60 = arith.constant 5.000000e-01 : f32
      %126 = vector.broadcast %cst_60 : f32 to vector<8x128xf32>
      %127 = arith.mulf %126, %125 : vector<8x128xf32>
      %128 = vector.extract_strided_slice %111 {offsets = [0, 256], sizes = [8, 128], strides = [1, 1]} : vector<8x512xf32> to vector<8x128xf32>
      %129 = math.tanh %128 : vector<8x128xf32>
      %130 = vector.extract_strided_slice %111 {offsets = [0, 384], sizes = [8, 128], strides = [1, 1]} : vector<8x512xf32> to vector<8x128xf32>
      %cst_61 = arith.constant 5.000000e-01 : f32
      %131 = vector.broadcast %cst_61 : f32 to vector<8x128xf32>
      %132 = arith.mulf %131, %130 : vector<8x128xf32>
      %133 = math.tanh %132 : vector<8x128xf32>
      %cst_62 = arith.constant 1.000000e+00 : f32
      %134 = vector.broadcast %cst_62 : f32 to vector<8x128xf32>
      %135 = arith.addf %133, %134 : vector<8x128xf32>
      %cst_63 = arith.constant 5.000000e-01 : f32
      %136 = vector.broadcast %cst_63 : f32 to vector<8x128xf32>
      %137 = arith.mulf %136, %135 : vector<8x128xf32>
      %138 = arith.mulf %127, %101 : vector<8x128xf32>
      %139 = arith.mulf %119, %129 : vector<8x128xf32>
      %140 = arith.addf %138, %139 : vector<8x128xf32>
      %141 = math.tanh %140 : vector<8x128xf32>
      %142 = arith.mulf %137, %141 : vector<8x128xf32>
      %c3_i32 = arith.constant 3 : i32
      %c0_i32_64 = arith.constant 0 : i32
      %c0_i32_65 = arith.constant 0 : i32
      %c0_i32_66 = arith.constant 0 : i32
      %143 = tpu.memref_slice %arg12[%22, %c0_i32_64, %c0_i32_65, %c0_i32_66] : memref<2x8x8x512xf32, #tpu.memory_space<vmem>> -> memref<1x8x8x512xf32, #tpu.memory_space<vmem>>
      %144 = tpu.memref_squeeze %143 : memref<1x8x8x512xf32, #tpu.memory_space<vmem>> -> memref<8x8x512xf32, #tpu.memory_space<vmem>>
      %145 = arith.index_cast %c3_i32 : i32 to index
      %c0_67 = arith.constant 0 : index
      %c0_68 = arith.constant 0 : index
      %146 = vector.load %144[%145, %c0_67, %c0_68] : memref<8x8x512xf32, #tpu.memory_space<vmem>>, vector<1x8x512xf32>
      %147 = vector.shape_cast %146 : vector<1x8x512xf32> to vector<8x512xf32>
      %148 = arith.truncf %142 : vector<8x128xf32> to vector<8x128xbf16>
      %cst_69 = arith.constant dense<0.000000e+00> : vector<8x512xf32>
      %149 = tpu.matmul %148, %23, %cst_69 {dimension_numbers = #tpu.dot_dimension_numbers<[1], [0], [0], [1], [0, 0, 1, 1], [], []>} : vector<8x128xbf16>, vector<128x512xbf16>, vector<8x512xf32> -> vector<8x512xf32>
      %150 = arith.addf %147, %149 : vector<8x512xf32>
      %151 = vector.extract_strided_slice %150 {offsets = [0, 0], sizes = [8, 128], strides = [1, 1]} : vector<8x512xf32> to vector<8x128xf32>
      %cst_70 = arith.constant 5.000000e-01 : f32
      %152 = vector.broadcast %cst_70 : f32 to vector<8x128xf32>
      %153 = arith.mulf %152, %151 : vector<8x128xf32>
      %154 = math.tanh %153 : vector<8x128xf32>
      %cst_71 = arith.constant 1.000000e+00 : f32
      %155 = vector.broadcast %cst_71 : f32 to vector<8x128xf32>
      %156 = arith.addf %154, %155 : vector<8x128xf32>
      %cst_72 = arith.constant 5.000000e-01 : f32
      %157 = vector.broadcast %cst_72 : f32 to vector<8x128xf32>
      %158 = arith.mulf %157, %156 : vector<8x128xf32>
      %159 = vector.extract_strided_slice %150 {offsets = [0, 128], sizes = [8, 128], strides = [1, 1]} : vector<8x512xf32> to vector<8x128xf32>
      %cst_73 = arith.constant 5.000000e-01 : f32
      %160 = vector.broadcast %cst_73 : f32 to vector<8x128xf32>
      %161 = arith.mulf %160, %159 : vector<8x128xf32>
      %162 = math.tanh %161 : vector<8x128xf32>
      %cst_74 = arith.constant 1.000000e+00 : f32
      %163 = vector.broadcast %cst_74 : f32 to vector<8x128xf32>
      %164 = arith.addf %162, %163 : vector<8x128xf32>
      %cst_75 = arith.constant 5.000000e-01 : f32
      %165 = vector.broadcast %cst_75 : f32 to vector<8x128xf32>
      %166 = arith.mulf %165, %164 : vector<8x128xf32>
      %167 = vector.extract_strided_slice %150 {offsets = [0, 256], sizes = [8, 128], strides = [1, 1]} : vector<8x512xf32> to vector<8x128xf32>
      %168 = math.tanh %167 : vector<8x128xf32>
      %169 = vector.extract_strided_slice %150 {offsets = [0, 384], sizes = [8, 128], strides = [1, 1]} : vector<8x512xf32> to vector<8x128xf32>
      %cst_76 = arith.constant 5.000000e-01 : f32
      %170 = vector.broadcast %cst_76 : f32 to vector<8x128xf32>
      %171 = arith.mulf %170, %169 : vector<8x128xf32>
      %172 = math.tanh %171 : vector<8x128xf32>
      %cst_77 = arith.constant 1.000000e+00 : f32
      %173 = vector.broadcast %cst_77 : f32 to vector<8x128xf32>
      %174 = arith.addf %172, %173 : vector<8x128xf32>
      %cst_78 = arith.constant 5.000000e-01 : f32
      %175 = vector.broadcast %cst_78 : f32 to vector<8x128xf32>
      %176 = arith.mulf %175, %174 : vector<8x128xf32>
      %177 = arith.mulf %166, %140 : vector<8x128xf32>
      %178 = arith.mulf %158, %168 : vector<8x128xf32>
      %179 = arith.addf %177, %178 : vector<8x128xf32>
      %180 = math.tanh %179 : vector<8x128xf32>
      %181 = arith.mulf %176, %180 : vector<8x128xf32>
      %c4_i32 = arith.constant 4 : i32
      %c0_i32_79 = arith.constant 0 : i32
      %c0_i32_80 = arith.constant 0 : i32
      %c0_i32_81 = arith.constant 0 : i32
      %182 = tpu.memref_slice %arg12[%22, %c0_i32_79, %c0_i32_80, %c0_i32_81] : memref<2x8x8x512xf32, #tpu.memory_space<vmem>> -> memref<1x8x8x512xf32, #tpu.memory_space<vmem>>
      %183 = tpu.memref_squeeze %182 : memref<1x8x8x512xf32, #tpu.memory_space<vmem>> -> memref<8x8x512xf32, #tpu.memory_space<vmem>>
      %184 = arith.index_cast %c4_i32 : i32 to index
      %c0_82 = arith.constant 0 : index
      %c0_83 = arith.constant 0 : index
      %185 = vector.load %183[%184, %c0_82, %c0_83] : memref<8x8x512xf32, #tpu.memory_space<vmem>>, vector<1x8x512xf32>
      %186 = vector.shape_cast %185 : vector<1x8x512xf32> to vector<8x512xf32>
      %187 = arith.truncf %181 : vector<8x128xf32> to vector<8x128xbf16>
      %cst_84 = arith.constant dense<0.000000e+00> : vector<8x512xf32>
      %188 = tpu.matmul %187, %23, %cst_84 {dimension_numbers = #tpu.dot_dimension_numbers<[1], [0], [0], [1], [0, 0, 1, 1], [], []>} : vector<8x128xbf16>, vector<128x512xbf16>, vector<8x512xf32> -> vector<8x512xf32>
      %189 = arith.addf %186, %188 : vector<8x512xf32>
      %190 = vector.extract_strided_slice %189 {offsets = [0, 0], sizes = [8, 128], strides = [1, 1]} : vector<8x512xf32> to vector<8x128xf32>
      %cst_85 = arith.constant 5.000000e-01 : f32
      %191 = vector.broadcast %cst_85 : f32 to vector<8x128xf32>
      %192 = arith.mulf %191, %190 : vector<8x128xf32>
      %193 = math.tanh %192 : vector<8x128xf32>
      %cst_86 = arith.constant 1.000000e+00 : f32
      %194 = vector.broadcast %cst_86 : f32 to vector<8x128xf32>
      %195 = arith.addf %193, %194 : vector<8x128xf32>
      %cst_87 = arith.constant 5.000000e-01 : f32
      %196 = vector.broadcast %cst_87 : f32 to vector<8x128xf32>
      %197 = arith.mulf %196, %195 : vector<8x128xf32>
      %198 = vector.extract_strided_slice %189 {offsets = [0, 128], sizes = [8, 128], strides = [1, 1]} : vector<8x512xf32> to vector<8x128xf32>
      %cst_88 = arith.constant 5.000000e-01 : f32
      %199 = vector.broadcast %cst_88 : f32 to vector<8x128xf32>
      %200 = arith.mulf %199, %198 : vector<8x128xf32>
      %201 = math.tanh %200 : vector<8x128xf32>
      %cst_89 = arith.constant 1.000000e+00 : f32
      %202 = vector.broadcast %cst_89 : f32 to vector<8x128xf32>
      %203 = arith.addf %201, %202 : vector<8x128xf32>
      %cst_90 = arith.constant 5.000000e-01 : f32
      %204 = vector.broadcast %cst_90 : f32 to vector<8x128xf32>
      %205 = arith.mulf %204, %203 : vector<8x128xf32>
      %206 = vector.extract_strided_slice %189 {offsets = [0, 256], sizes = [8, 128], strides = [1, 1]} : vector<8x512xf32> to vector<8x128xf32>
      %207 = math.tanh %206 : vector<8x128xf32>
      %208 = vector.extract_strided_slice %189 {offsets = [0, 384], sizes = [8, 128], strides = [1, 1]} : vector<8x512xf32> to vector<8x128xf32>
      %cst_91 = arith.constant 5.000000e-01 : f32
      %209 = vector.broadcast %cst_91 : f32 to vector<8x128xf32>
      %210 = arith.mulf %209, %208 : vector<8x128xf32>
      %211 = math.tanh %210 : vector<8x128xf32>
      %cst_92 = arith.constant 1.000000e+00 : f32
      %212 = vector.broadcast %cst_92 : f32 to vector<8x128xf32>
      %213 = arith.addf %211, %212 : vector<8x128xf32>
      %cst_93 = arith.constant 5.000000e-01 : f32
      %214 = vector.broadcast %cst_93 : f32 to vector<8x128xf32>
      %215 = arith.mulf %214, %213 : vector<8x128xf32>
      %216 = arith.mulf %205, %179 : vector<8x128xf32>
      %217 = arith.mulf %197, %207 : vector<8x128xf32>
      %218 = arith.addf %216, %217 : vector<8x128xf32>
      %219 = math.tanh %218 : vector<8x128xf32>
      %220 = arith.mulf %215, %219 : vector<8x128xf32>
      %c5_i32 = arith.constant 5 : i32
      %c0_i32_94 = arith.constant 0 : i32
      %c0_i32_95 = arith.constant 0 : i32
      %c0_i32_96 = arith.constant 0 : i32
      %221 = tpu.memref_slice %arg12[%22, %c0_i32_94, %c0_i32_95, %c0_i32_96] : memref<2x8x8x512xf32, #tpu.memory_space<vmem>> -> memref<1x8x8x512xf32, #tpu.memory_space<vmem>>
      %222 = tpu.memref_squeeze %221 : memref<1x8x8x512xf32, #tpu.memory_space<vmem>> -> memref<8x8x512xf32, #tpu.memory_space<vmem>>
      %223 = arith.index_cast %c5_i32 : i32 to index
      %c0_97 = arith.constant 0 : index
      %c0_98 = arith.constant 0 : index
      %224 = vector.load %222[%223, %c0_97, %c0_98] : memref<8x8x512xf32, #tpu.memory_space<vmem>>, vector<1x8x512xf32>
      %225 = vector.shape_cast %224 : vector<1x8x512xf32> to vector<8x512xf32>
      %226 = arith.truncf %220 : vector<8x128xf32> to vector<8x128xbf16>
      %cst_99 = arith.constant dense<0.000000e+00> : vector<8x512xf32>
      %227 = tpu.matmul %226, %23, %cst_99 {dimension_numbers = #tpu.dot_dimension_numbers<[1], [0], [0], [1], [0, 0, 1, 1], [], []>} : vector<8x128xbf16>, vector<128x512xbf16>, vector<8x512xf32> -> vector<8x512xf32>
      %228 = arith.addf %225, %227 : vector<8x512xf32>
      %229 = vector.extract_strided_slice %228 {offsets = [0, 0], sizes = [8, 128], strides = [1, 1]} : vector<8x512xf32> to vector<8x128xf32>
      %cst_100 = arith.constant 5.000000e-01 : f32
      %230 = vector.broadcast %cst_100 : f32 to vector<8x128xf32>
      %231 = arith.mulf %230, %229 : vector<8x128xf32>
      %232 = math.tanh %231 : vector<8x128xf32>
      %cst_101 = arith.constant 1.000000e+00 : f32
      %233 = vector.broadcast %cst_101 : f32 to vector<8x128xf32>
      %234 = arith.addf %232, %233 : vector<8x128xf32>
      %cst_102 = arith.constant 5.000000e-01 : f32
      %235 = vector.broadcast %cst_102 : f32 to vector<8x128xf32>
      %236 = arith.mulf %235, %234 : vector<8x128xf32>
      %237 = vector.extract_strided_slice %228 {offsets = [0, 128], sizes = [8, 128], strides = [1, 1]} : vector<8x512xf32> to vector<8x128xf32>
      %cst_103 = arith.constant 5.000000e-01 : f32
      %238 = vector.broadcast %cst_103 : f32 to vector<8x128xf32>
      %239 = arith.mulf %238, %237 : vector<8x128xf32>
      %240 = math.tanh %239 : vector<8x128xf32>
      %cst_104 = arith.constant 1.000000e+00 : f32
      %241 = vector.broadcast %cst_104 : f32 to vector<8x128xf32>
      %242 = arith.addf %240, %241 : vector<8x128xf32>
      %cst_105 = arith.constant 5.000000e-01 : f32
      %243 = vector.broadcast %cst_105 : f32 to vector<8x128xf32>
      %244 = arith.mulf %243, %242 : vector<8x128xf32>
      %245 = vector.extract_strided_slice %228 {offsets = [0, 256], sizes = [8, 128], strides = [1, 1]} : vector<8x512xf32> to vector<8x128xf32>
      %246 = math.tanh %245 : vector<8x128xf32>
      %247 = vector.extract_strided_slice %228 {offsets = [0, 384], sizes = [8, 128], strides = [1, 1]} : vector<8x512xf32> to vector<8x128xf32>
      %cst_106 = arith.constant 5.000000e-01 : f32
      %248 = vector.broadcast %cst_106 : f32 to vector<8x128xf32>
      %249 = arith.mulf %248, %247 : vector<8x128xf32>
      %250 = math.tanh %249 : vector<8x128xf32>
      %cst_107 = arith.constant 1.000000e+00 : f32
      %251 = vector.broadcast %cst_107 : f32 to vector<8x128xf32>
      %252 = arith.addf %250, %251 : vector<8x128xf32>
      %cst_108 = arith.constant 5.000000e-01 : f32
      %253 = vector.broadcast %cst_108 : f32 to vector<8x128xf32>
      %254 = arith.mulf %253, %252 : vector<8x128xf32>
      %255 = arith.mulf %244, %218 : vector<8x128xf32>
      %256 = arith.mulf %236, %246 : vector<8x128xf32>
      %257 = arith.addf %255, %256 : vector<8x128xf32>
      %258 = math.tanh %257 : vector<8x128xf32>
      %259 = arith.mulf %254, %258 : vector<8x128xf32>
      %c6_i32 = arith.constant 6 : i32
      %c0_i32_109 = arith.constant 0 : i32
      %c0_i32_110 = arith.constant 0 : i32
      %c0_i32_111 = arith.constant 0 : i32
      %260 = tpu.memref_slice %arg12[%22, %c0_i32_109, %c0_i32_110, %c0_i32_111] : memref<2x8x8x512xf32, #tpu.memory_space<vmem>> -> memref<1x8x8x512xf32, #tpu.memory_space<vmem>>
      %261 = tpu.memref_squeeze %260 : memref<1x8x8x512xf32, #tpu.memory_space<vmem>> -> memref<8x8x512xf32, #tpu.memory_space<vmem>>
      %262 = arith.index_cast %c6_i32 : i32 to index
      %c0_112 = arith.constant 0 : index
      %c0_113 = arith.constant 0 : index
      %263 = vector.load %261[%262, %c0_112, %c0_113] : memref<8x8x512xf32, #tpu.memory_space<vmem>>, vector<1x8x512xf32>
      %264 = vector.shape_cast %263 : vector<1x8x512xf32> to vector<8x512xf32>
      %265 = arith.truncf %259 : vector<8x128xf32> to vector<8x128xbf16>
      %cst_114 = arith.constant dense<0.000000e+00> : vector<8x512xf32>
      %266 = tpu.matmul %265, %23, %cst_114 {dimension_numbers = #tpu.dot_dimension_numbers<[1], [0], [0], [1], [0, 0, 1, 1], [], []>} : vector<8x128xbf16>, vector<128x512xbf16>, vector<8x512xf32> -> vector<8x512xf32>
      %267 = arith.addf %264, %266 : vector<8x512xf32>
      %268 = vector.extract_strided_slice %267 {offsets = [0, 0], sizes = [8, 128], strides = [1, 1]} : vector<8x512xf32> to vector<8x128xf32>
      %cst_115 = arith.constant 5.000000e-01 : f32
      %269 = vector.broadcast %cst_115 : f32 to vector<8x128xf32>
      %270 = arith.mulf %269, %268 : vector<8x128xf32>
      %271 = math.tanh %270 : vector<8x128xf32>
      %cst_116 = arith.constant 1.000000e+00 : f32
      %272 = vector.broadcast %cst_116 : f32 to vector<8x128xf32>
      %273 = arith.addf %271, %272 : vector<8x128xf32>
      %cst_117 = arith.constant 5.000000e-01 : f32
      %274 = vector.broadcast %cst_117 : f32 to vector<8x128xf32>
      %275 = arith.mulf %274, %273 : vector<8x128xf32>
      %276 = vector.extract_strided_slice %267 {offsets = [0, 128], sizes = [8, 128], strides = [1, 1]} : vector<8x512xf32> to vector<8x128xf32>
      %cst_118 = arith.constant 5.000000e-01 : f32
      %277 = vector.broadcast %cst_118 : f32 to vector<8x128xf32>
      %278 = arith.mulf %277, %276 : vector<8x128xf32>
      %279 = math.tanh %278 : vector<8x128xf32>
      %cst_119 = arith.constant 1.000000e+00 : f32
      %280 = vector.broadcast %cst_119 : f32 to vector<8x128xf32>
      %281 = arith.addf %279, %280 : vector<8x128xf32>
      %cst_120 = arith.constant 5.000000e-01 : f32
      %282 = vector.broadcast %cst_120 : f32 to vector<8x128xf32>
      %283 = arith.mulf %282, %281 : vector<8x128xf32>
      %284 = vector.extract_strided_slice %267 {offsets = [0, 256], sizes = [8, 128], strides = [1, 1]} : vector<8x512xf32> to vector<8x128xf32>
      %285 = math.tanh %284 : vector<8x128xf32>
      %286 = vector.extract_strided_slice %267 {offsets = [0, 384], sizes = [8, 128], strides = [1, 1]} : vector<8x512xf32> to vector<8x128xf32>
      %cst_121 = arith.constant 5.000000e-01 : f32
      %287 = vector.broadcast %cst_121 : f32 to vector<8x128xf32>
      %288 = arith.mulf %287, %286 : vector<8x128xf32>
      %289 = math.tanh %288 : vector<8x128xf32>
      %cst_122 = arith.constant 1.000000e+00 : f32
      %290 = vector.broadcast %cst_122 : f32 to vector<8x128xf32>
      %291 = arith.addf %289, %290 : vector<8x128xf32>
      %cst_123 = arith.constant 5.000000e-01 : f32
      %292 = vector.broadcast %cst_123 : f32 to vector<8x128xf32>
      %293 = arith.mulf %292, %291 : vector<8x128xf32>
      %294 = arith.mulf %283, %257 : vector<8x128xf32>
      %295 = arith.mulf %275, %285 : vector<8x128xf32>
      %296 = arith.addf %294, %295 : vector<8x128xf32>
      %297 = math.tanh %296 : vector<8x128xf32>
      %298 = arith.mulf %293, %297 : vector<8x128xf32>
      %c7_i32 = arith.constant 7 : i32
      %c0_i32_124 = arith.constant 0 : i32
      %c0_i32_125 = arith.constant 0 : i32
      %c0_i32_126 = arith.constant 0 : i32
      %299 = tpu.memref_slice %arg12[%22, %c0_i32_124, %c0_i32_125, %c0_i32_126] : memref<2x8x8x512xf32, #tpu.memory_space<vmem>> -> memref<1x8x8x512xf32, #tpu.memory_space<vmem>>
      %300 = tpu.memref_squeeze %299 : memref<1x8x8x512xf32, #tpu.memory_space<vmem>> -> memref<8x8x512xf32, #tpu.memory_space<vmem>>
      %301 = arith.index_cast %c7_i32 : i32 to index
      %c0_127 = arith.constant 0 : index
      %c0_128 = arith.constant 0 : index
      %302 = vector.load %300[%301, %c0_127, %c0_128] : memref<8x8x512xf32, #tpu.memory_space<vmem>>, vector<1x8x512xf32>
      %303 = vector.shape_cast %302 : vector<1x8x512xf32> to vector<8x512xf32>
      %304 = arith.truncf %298 : vector<8x128xf32> to vector<8x128xbf16>
      %cst_129 = arith.constant dense<0.000000e+00> : vector<8x512xf32>
      %305 = tpu.matmul %304, %23, %cst_129 {dimension_numbers = #tpu.dot_dimension_numbers<[1], [0], [0], [1], [0, 0, 1, 1], [], []>} : vector<8x128xbf16>, vector<128x512xbf16>, vector<8x512xf32> -> vector<8x512xf32>
      %306 = arith.addf %303, %305 : vector<8x512xf32>
      %307 = vector.extract_strided_slice %306 {offsets = [0, 0], sizes = [8, 128], strides = [1, 1]} : vector<8x512xf32> to vector<8x128xf32>
      %cst_130 = arith.constant 5.000000e-01 : f32
      %308 = vector.broadcast %cst_130 : f32 to vector<8x128xf32>
      %309 = arith.mulf %308, %307 : vector<8x128xf32>
      %310 = math.tanh %309 : vector<8x128xf32>
      %cst_131 = arith.constant 1.000000e+00 : f32
      %311 = vector.broadcast %cst_131 : f32 to vector<8x128xf32>
      %312 = arith.addf %310, %311 : vector<8x128xf32>
      %cst_132 = arith.constant 5.000000e-01 : f32
      %313 = vector.broadcast %cst_132 : f32 to vector<8x128xf32>
      %314 = arith.mulf %313, %312 : vector<8x128xf32>
      %315 = vector.extract_strided_slice %306 {offsets = [0, 128], sizes = [8, 128], strides = [1, 1]} : vector<8x512xf32> to vector<8x128xf32>
      %cst_133 = arith.constant 5.000000e-01 : f32
      %316 = vector.broadcast %cst_133 : f32 to vector<8x128xf32>
      %317 = arith.mulf %316, %315 : vector<8x128xf32>
      %318 = math.tanh %317 : vector<8x128xf32>
      %cst_134 = arith.constant 1.000000e+00 : f32
      %319 = vector.broadcast %cst_134 : f32 to vector<8x128xf32>
      %320 = arith.addf %318, %319 : vector<8x128xf32>
      %cst_135 = arith.constant 5.000000e-01 : f32
      %321 = vector.broadcast %cst_135 : f32 to vector<8x128xf32>
      %322 = arith.mulf %321, %320 : vector<8x128xf32>
      %323 = vector.extract_strided_slice %306 {offsets = [0, 256], sizes = [8, 128], strides = [1, 1]} : vector<8x512xf32> to vector<8x128xf32>
      %324 = math.tanh %323 : vector<8x128xf32>
      %325 = vector.extract_strided_slice %306 {offsets = [0, 384], sizes = [8, 128], strides = [1, 1]} : vector<8x512xf32> to vector<8x128xf32>
      %cst_136 = arith.constant 5.000000e-01 : f32
      %326 = vector.broadcast %cst_136 : f32 to vector<8x128xf32>
      %327 = arith.mulf %326, %325 : vector<8x128xf32>
      %328 = math.tanh %327 : vector<8x128xf32>
      %cst_137 = arith.constant 1.000000e+00 : f32
      %329 = vector.broadcast %cst_137 : f32 to vector<8x128xf32>
      %330 = arith.addf %328, %329 : vector<8x128xf32>
      %cst_138 = arith.constant 5.000000e-01 : f32
      %331 = vector.broadcast %cst_138 : f32 to vector<8x128xf32>
      %332 = arith.mulf %331, %330 : vector<8x128xf32>
      %333 = arith.mulf %322, %296 : vector<8x128xf32>
      %334 = arith.mulf %314, %324 : vector<8x128xf32>
      %335 = arith.addf %333, %334 : vector<8x128xf32>
      %336 = math.tanh %335 : vector<8x128xf32>
      %337 = arith.mulf %332, %336 : vector<8x128xf32>
      %c8_i32 = arith.constant 8 : i32
      %c0_139 = arith.constant 0 : index
      %c0_140 = arith.constant 0 : index
      %338 = vector.load %arg10[%c0_139, %c0_140] : memref<8x128xf32, #tpu.memory_space<vmem>>, vector<8x128xf32>
      tpu.vector_store %arg10[%c0_139, %c0_140], %337 {strides = array<i32>} : memref<8x128xf32, #tpu.memory_space<vmem>>, vector<8x128xf32>,
      %c0_141 = arith.constant 0 : index
      %c0_142 = arith.constant 0 : index
      %339 = vector.load %arg11[%c0_141, %c0_142] : memref<8x128xf32, #tpu.memory_space<vmem>>, vector<8x128xf32>
      tpu.vector_store %arg11[%c0_141, %c0_142], %335 {strides = array<i32>} : memref<8x128xf32, #tpu.memory_space<vmem>>, vector<8x128xf32>,
    } else {
    }
    %c1_i32_4 = arith.constant 1 : i32
    %9 = arith.cmpi eq, %arg1, %c1_i32_4 : i32
    %10 = arith.extui %9 : i1 to i32
    %c0_i32_5 = arith.constant 0 : i32
    %11 = arith.cmpi ne, %10, %c0_i32_5 : i32
    scf.if %11 {
      %c0 = arith.constant 0 : index
      %c0_6 = arith.constant 0 : index
      %12 = vector.load %arg10[%c0, %c0_6] : memref<8x128xf32, #tpu.memory_space<vmem>>, vector<8x128xf32>
      %c0_7 = arith.constant 0 : index
      %c0_8 = arith.constant 0 : index
      %13 = vector.load %arg9[%c0_7, %c0_8] : memref<8x128xf32, #tpu.memory_space<vmem>>, vector<8x128xf32>
      tpu.vector_store %arg9[%c0_7, %c0_8], %12 {strides = array<i32>} : memref<8x128xf32, #tpu.memory_space<vmem>>, vector<8x128xf32>,
      %14 = arith.truncf %12 : vector<8x128xf32> to vector<8x128xbf16>
      %c0_9 = arith.constant 0 : index
      %c0_10 = arith.constant 0 : index
      %15 = vector.load %arg6[%c0_9, %c0_10] : memref<128x128xbf16, #tpu.memory_space<vmem>>, vector<128x128xbf16>
      %cst = arith.constant dense<0.000000e+00> : vector<8x128xf32>
      %16 = tpu.matmul %14, %15, %cst {dimension_numbers = #tpu.dot_dimension_numbers<[1], [0], [0], [1], [0, 0, 1, 1], [], []>} : vector<8x128xbf16>, vector<128x128xbf16>, vector<8x128xf32> -> vector<8x128xf32>
      %c0_11 = arith.constant 0 : index
      %c0_12 = arith.constant 0 : index
      %17 = vector.load %arg7[%c0_11, %c0_12] : memref<1x128xf32, #tpu.memory_space<vmem>>, vector<1x128xf32>
      %18 = vector.broadcast %17 : vector<1x128xf32> to vector<8x128xf32>
      %19 = arith.addf %16, %18 : vector<8x128xf32>
      %c0_13 = arith.constant 0 : index
      %c0_14 = arith.constant 0 : index
      %20 = vector.load %arg8[%c0_13, %c0_14] : memref<8x128xf32, #tpu.memory_space<vmem>>, vector<8x128xf32>
      tpu.vector_store %arg8[%c0_13, %c0_14], %19 {strides = array<i32>} : memref<8x128xf32, #tpu.memory_space<vmem>>, vector<8x128xf32>,
    } else {
    }
    return
  }
  func.func @transform_0(%arg0: i32, %arg1: i32) -> (i32, i32, i32) {
    %c0_i32 = arith.constant 0 : i32
    %0 = arith.minsi %arg1, %c0_i32 : i32
    %c0_i32_0 = arith.constant 0 : i32
    %c0_i32_1 = arith.constant 0 : i32
    return %0, %arg0, %c0_i32_0 : i32, i32, i32
  }
  func.func @transform_1(%arg0: i32, %arg1: i32) -> (i32, i32) {
    %c0_i32 = arith.constant 0 : i32
    %c0_i32_0 = arith.constant 0 : i32
    %c0_i32_1 = arith.constant 0 : i32
    return %c0_i32, %c0_i32_0 : i32, i32
  }
  func.func @transform_2(%arg0: i32, %arg1: i32) -> (i32, i32) {
    %c0_i32 = arith.constant 0 : i32
    %c0_i32_0 = arith.constant 0 : i32
    %c0_i32_1 = arith.constant 0 : i32
    return %c0_i32, %c0_i32_0 : i32, i32
  }
  func.func @transform_3(%arg0: i32, %arg1: i32) -> (i32, i32) {
    %c0_i32 = arith.constant 0 : i32
    %c0_i32_0 = arith.constant 0 : i32
    %c0_i32_1 = arith.constant 0 : i32
    return %c0_i32, %c0_i32_0 : i32, i32
  }
  func.func @transform_4(%arg0: i32, %arg1: i32) -> (i32, i32) {
    %c0_i32 = arith.constant 0 : i32
    %c0_i32_0 = arith.constant 0 : i32
    %c0_i32_1 = arith.constant 0 : i32
    return %c0_i32, %c0_i32_0 : i32, i32
  }
  func.func @transform_5(%arg0: i32, %arg1: i32) -> (i32, i32) {
    %c0_i32 = arith.constant 0 : i32
    %c0_i32_0 = arith.constant 0 : i32
    %c0_i32_1 = arith.constant 0 : i32
    return %c0_i32, %c0_i32_0 : i32, i32
  }
  func.func @transform_6(%arg0: i32, %arg1: i32) -> (i32, i32) {
    %c0_i32 = arith.constant 0 : i32
    %c0_i32_0 = arith.constant 0 : i32
    return %arg0, %c0_i32 : i32, i32
  }
  func.func @transform_7(%arg0: i32, %arg1: i32) -> (i32, i32) {
    %c0_i32 = arith.constant 0 : i32
    %c0_i32_0 = arith.constant 0 : i32
    return %arg0, %c0_i32 : i32, i32
  }
}

module attributes {stable_mosaic.version = 11 : i64} {
  func.func @lstm_kernel(%arg0: i32, %arg1: i32, %arg2: memref<8x8x32xbf16, #tpu.memory_space<vmem>>, %arg3: memref<32x512xbf16, #tpu.memory_space<vmem>>, %arg4: memref<128x512xbf16, #tpu.memory_space<vmem>>, %arg5: memref<1x512xf32, #tpu.memory_space<vmem>>, %arg6: memref<128x128xbf16, #tpu.memory_space<vmem>>, %arg7: memref<1x128xf32, #tpu.memory_space<vmem>>, %arg8: memref<8x128xf32, #tpu.memory_space<vmem>>, %arg9: memref<8x128xf32, #tpu.memory_space<vmem>>, %arg10: memref<8x128xf32, #tpu.memory_space<vmem>>, %arg11: memref<8x128xf32, #tpu.memory_space<vmem>>, %arg12: memref<2x8x8x512xf32, #tpu.memory_space<vmem>>) attributes {dimension_semantics = [#tpu.dimension_semantics<parallel>, #tpu.dimension_semantics<arbitrary>], iteration_bounds = array<i64: 1, 2>, scalar_prefetch = 0 : i64, scratch_operands = 3 : i64, tpu.core_type = #tpu.core_type<tc>, window_params = [{transform_indices = @transform_0, window_bounds = array<i64: 8, 8, 32>}, {pipeline_mode = #tpu.pipeline_mode<synchronous>, transform_indices = @transform_1, window_bounds = array<i64: 32, 512>}, {pipeline_mode = #tpu.pipeline_mode<synchronous>, transform_indices = @transform_2, window_bounds = array<i64: 128, 512>}, {pipeline_mode = #tpu.pipeline_mode<synchronous>, transform_indices = @transform_3, window_bounds = array<i64: 1, 512>}, {pipeline_mode = #tpu.pipeline_mode<synchronous>, transform_indices = @transform_4, window_bounds = array<i64: 128, 128>}, {pipeline_mode = #tpu.pipeline_mode<synchronous>, transform_indices = @transform_5, window_bounds = array<i64: 1, 128>}, {transform_indices = @transform_6, window_bounds = array<i64: 8, 128>}, {transform_indices = @transform_7, window_bounds = array<i64: 8, 128>}]} {
    %c0_i32 = arith.constant 0 : i32
    %0 = arith.cmpi eq, %arg1, %c0_i32 : i32
    %1 = arith.extui %0 : i1 to i32
    %c0_i32_0 = arith.constant 0 : i32
    %2 = arith.cmpi ne, %1, %c0_i32_0 : i32
    scf.if %2 {
      %cst = arith.constant 0.000000e+00 : f32
      %12 = vector.broadcast %cst : f32 to vector<8x128xf32>
      %c0 = arith.constant 0 : index
      %c0_6 = arith.constant 0 : index
      %13 = vector.load %arg10[%c0, %c0_6] : memref<8x128xf32, #tpu.memory_space<vmem>>, vector<8x128xf32>
      tpu.vector_store %arg10[%c0, %c0_6], %12 {strides = array<i32>} : memref<8x128xf32, #tpu.memory_space<vmem>>, vector<8x128xf32>,
      %cst_7 = arith.constant 0.000000e+00 : f32
      %14 = vector.broadcast %cst_7 : f32 to vector<8x128xf32>
      %c0_8 = arith.constant 0 : index
      %c0_9 = arith.constant 0 : index
      %15 = vector.load %arg11[%c0_8, %c0_9] : memref<8x128xf32, #tpu.memory_space<vmem>>, vector<8x128xf32>
      tpu.vector_store %arg11[%c0_8, %c0_9], %14 {strides = array<i32>} : memref<8x128xf32, #tpu.memory_space<vmem>>, vector<8x128xf32>,
    } else {
    }
    %c1_i32 = arith.constant 1 : i32
    %3 = arith.cmpi slt, %arg1, %c1_i32 : i32
    %4 = arith.extui %3 : i1 to i32
    %c0_i32_1 = arith.constant 0 : i32
    %5 = arith.cmpi ne, %4, %c0_i32_1 : i32
    scf.if %5 {
      %c0 = arith.constant 0 : index
      %c0_6 = arith.constant 0 : index
      %c0_7 = arith.constant 0 : index
      %12 = vector.load %arg2[%c0, %c0_6, %c0_7] : memref<8x8x32xbf16, #tpu.memory_space<vmem>>, vector<8x8x32xbf16>
      %13 = vector.shape_cast %12 : vector<8x8x32xbf16> to vector<64x32xbf16>
      %c0_8 = arith.constant 0 : index
      %c0_9 = arith.constant 0 : index
      %14 = vector.load %arg3[%c0_8, %c0_9] : memref<32x512xbf16, #tpu.memory_space<vmem>>, vector<32x512xbf16>
      %cst = arith.constant dense<0.000000e+00> : vector<64x512xf32>
      %15 = tpu.matmul %13, %14, %cst {dimension_numbers = #tpu.dot_dimension_numbers<[1], [0], [0], [1], [0, 0, 1, 1], [], []>} : vector<64x32xbf16>, vector<32x512xbf16>, vector<64x512xf32> -> vector<64x512xf32>
      %c0_10 = arith.constant 0 : index
      %c0_11 = arith.constant 0 : index
      %16 = vector.load %arg5[%c0_10, %c0_11] : memref<1x512xf32, #tpu.memory_space<vmem>>, vector<1x512xf32>
      %17 = vector.broadcast %16 : vector<1x512xf32> to vector<64x512xf32>
      %18 = arith.addf %15, %17 : vector<64x512xf32>
      %19 = vector.shape_cast %18 : vector<64x512xf32> to vector<8x8x512xf32>
      %c2_i32 = arith.constant 2 : i32
      %c0_i32_12 = arith.constant 0 : i32
      %20 = arith.cmpi eq, %c2_i32, %c0_i32_12 : i32
      %c1_i32_13 = arith.constant 1 : i32
      %21 = arith.select %20, %c1_i32_13, %c2_i32 : i32
      %22 = arith.remsi %arg1, %21 : i32
      %c0_i32_14 = arith.constant 0 : i32
      %23 = arith.cmpi ne, %22, %c0_i32_14 : i32
      %c0_i32_15 = arith.constant 0 : i32
      %24 = arith.cmpi slt, %22, %c0_i32_15 : i32
      %c0_i32_16 = arith.constant 0 : i32
      %25 = arith.cmpi slt, %21, %c0_i32_16 : i32
      %26 = arith.xori %24, %25 : i1
      %27 = arith.andi %26, %23 : i1
      %28 = arith.addi %22, %21 : i32
      %29 = arith.select %27, %28, %22 : i32
      %30 = arith.index_cast %29 : i32 to index
      %c0_17 = arith.constant 0 : index
      %c0_18 = arith.constant 0 : index
      %c0_19 = arith.constant 0 : index
      %31 = vector.load %arg12[%30, %c0_17, %c0_18, %c0_19] : memref<2x8x8x512xf32, #tpu.memory_space<vmem>>, vector<1x8x8x512xf32>
      %32 = vector.shape_cast %31 : vector<1x8x8x512xf32> to vector<8x8x512xf32>
      %33 = vector.shape_cast %19 : vector<8x8x512xf32> to vector<1x8x8x512xf32>
      tpu.vector_store %arg12[%30, %c0_17, %c0_18, %c0_19], %33 {strides = array<i32>} : memref<2x8x8x512xf32, #tpu.memory_space<vmem>>, vector<1x8x8x512xf32>,
    } else {
    }
    %c0_i32_2 = arith.constant 0 : i32
    %6 = arith.cmpi sgt, %arg1, %c0_i32_2 : i32
    %7 = arith.extui %6 : i1 to i32
    %c0_i32_3 = arith.constant 0 : i32
    %8 = arith.cmpi ne, %7, %c0_i32_3 : i32
    scf.if %8 {
      %c1_i32_6 = arith.constant 1 : i32
      %12 = arith.subi %arg1, %c1_i32_6 : i32
      %c2_i32 = arith.constant 2 : i32
      %c0_i32_7 = arith.constant 0 : i32
      %13 = arith.cmpi eq, %c2_i32, %c0_i32_7 : i32
      %c1_i32_8 = arith.constant 1 : i32
      %14 = arith.select %13, %c1_i32_8, %c2_i32 : i32
      %15 = arith.remsi %12, %14 : i32
      %c0_i32_9 = arith.constant 0 : i32
      %16 = arith.cmpi ne, %15, %c0_i32_9 : i32
      %c0_i32_10 = arith.constant 0 : i32
      %17 = arith.cmpi slt, %15, %c0_i32_10 : i32
      %c0_i32_11 = arith.constant 0 : i32
      %18 = arith.cmpi slt, %14, %c0_i32_11 : i32
      %19 = arith.xori %17, %18 : i1
      %20 = arith.andi %19, %16 : i1
      %21 = arith.addi %15, %14 : i32
      %22 = arith.select %20, %21, %15 : i32
      %c0 = arith.constant 0 : index
      %c0_12 = arith.constant 0 : index
      %23 = vector.load %arg4[%c0, %c0_12] : memref<128x512xbf16, #tpu.memory_space<vmem>>, vector<128x512xbf16>
      %c0_13 = arith.constant 0 : index
      %c0_14 = arith.constant 0 : index
      %24 = vector.load %arg10[%c0_13, %c0_14] : memref<8x128xf32, #tpu.memory_space<vmem>>, vector<8x128xf32>
      %c0_15 = arith.constant 0 : index
      %c0_16 = arith.constant 0 : index
      %25 = vector.load %arg11[%c0_15, %c0_16] : memref<8x128xf32, #tpu.memory_space<vmem>>, vector<8x128xf32>
      %c0_i32_17 = arith.constant 0 : i32
      %c0_i32_18 = arith.constant 0 : i32
      %c0_i32_19 = arith.constant 0 : i32
      %c0_i32_20 = arith.constant 0 : i32
      %26 = tpu.memref_slice %arg12[%22, %c0_i32_18, %c0_i32_19, %c0_i32_20] : memref<2x8x8x512xf32, #tpu.memory_space<vmem>> -> memref<1x8x8x512xf32, #tpu.memory_space<vmem>>
      %27 = tpu.memref_squeeze %26 : memref<1x8x8x512xf32, #tpu.memory_space<vmem>> -> memref<8x8x512xf32, #tpu.memory_space<vmem>>
      %28 = arith.index_cast %c0_i32_17 : i32 to index
      %c0_21 = arith.constant 0 : index
      %c0_22 = arith.constant 0 : index
      %29 = vector.load %27[%28, %c0_21, %c0_22] : memref<8x8x512xf32, #tpu.memory_space<vmem>>, vector<1x8x512xf32>
      %30 = vector.shape_cast %29 : vector<1x8x512xf32> to vector<8x512xf32>
      %31 = arith.truncf %24 : vector<8x128xf32> to vector<8x128xbf16>
      %cst = arith.constant dense<0.000000e+00> : vector<8x512xf32>
      %32 = tpu.matmul %31, %23, %cst {dimension_numbers = #tpu.dot_dimension_numbers<[1], [0], [0], [1], [0, 0, 1, 1], [], []>} : vector<8x128xbf16>, vector<128x512xbf16>, vector<8x512xf32> -> vector<8x512xf32>
      %33 = arith.addf %30, %32 : vector<8x512xf32>
      %34 = vector.extract_strided_slice %33 {offsets = [0, 0], sizes = [8, 128], strides = [1, 1]} : vector<8x512xf32> to vector<8x128xf32>
      %cst_23 = arith.constant 5.000000e-01 : f32
      %35 = vector.broadcast %cst_23 : f32 to vector<8x128xf32>
      %36 = arith.mulf %35, %34 : vector<8x128xf32>
      %37 = math.tanh %36 : vector<8x128xf32>
      %cst_24 = arith.constant 1.000000e+00 : f32
      %38 = vector.broadcast %cst_24 : f32 to vector<8x128xf32>
      %39 = arith.addf %37, %38 : vector<8x128xf32>
      %cst_25 = arith.constant 5.000000e-01 : f32
      %40 = vector.broadcast %cst_25 : f32 to vector<8x128xf32>
      %41 = arith.mulf %40, %39 : vector<8x128xf32>
      %42 = vector.extract_strided_slice %33 {offsets = [0, 128], sizes = [8, 128], strides = [1, 1]} : vector<8x512xf32> to vector<8x128xf32>
      %cst_26 = arith.constant 5.000000e-01 : f32
      %43 = vector.broadcast %cst_26 : f32 to vector<8x128xf32>
      %44 = arith.mulf %43, %42 : vector<8x128xf32>
      %45 = math.tanh %44 : vector<8x128xf32>
      %cst_27 = arith.constant 1.000000e+00 : f32
      %46 = vector.broadcast %cst_27 : f32 to vector<8x128xf32>
      %47 = arith.addf %45, %46 : vector<8x128xf32>
      %cst_28 = arith.constant 5.000000e-01 : f32
      %48 = vector.broadcast %cst_28 : f32 to vector<8x128xf32>
      %49 = arith.mulf %48, %47 : vector<8x128xf32>
      %50 = vector.extract_strided_slice %33 {offsets = [0, 256], sizes = [8, 128], strides = [1, 1]} : vector<8x512xf32> to vector<8x128xf32>
      %51 = math.tanh %50 : vector<8x128xf32>
      %52 = vector.extract_strided_slice %33 {offsets = [0, 384], sizes = [8, 128], strides = [1, 1]} : vector<8x512xf32> to vector<8x128xf32>
      %cst_29 = arith.constant 5.000000e-01 : f32
      %53 = vector.broadcast %cst_29 : f32 to vector<8x128xf32>
      %54 = arith.mulf %53, %52 : vector<8x128xf32>
      %55 = math.tanh %54 : vector<8x128xf32>
      %cst_30 = arith.constant 1.000000e+00 : f32
      %56 = vector.broadcast %cst_30 : f32 to vector<8x128xf32>
      %57 = arith.addf %55, %56 : vector<8x128xf32>
      %cst_31 = arith.constant 5.000000e-01 : f32
      %58 = vector.broadcast %cst_31 : f32 to vector<8x128xf32>
      %59 = arith.mulf %58, %57 : vector<8x128xf32>
      %60 = arith.mulf %49, %25 : vector<8x128xf32>
      %61 = arith.mulf %41, %51 : vector<8x128xf32>
      %62 = arith.addf %60, %61 : vector<8x128xf32>
      %63 = math.tanh %62 : vector<8x128xf32>
      %64 = arith.mulf %59, %63 : vector<8x128xf32>
      %c1_i32_32 = arith.constant 1 : i32
      %c0_i32_33 = arith.constant 0 : i32
      %c0_i32_34 = arith.constant 0 : i32
      %c0_i32_35 = arith.constant 0 : i32
      %65 = tpu.memref_slice %arg12[%22, %c0_i32_33, %c0_i32_34, %c0_i32_35] : memref<2x8x8x512xf32, #tpu.memory_space<vmem>> -> memref<1x8x8x512xf32, #tpu.memory_space<vmem>>
      %66 = tpu.memref_squeeze %65 : memref<1x8x8x512xf32, #tpu.memory_space<vmem>> -> memref<8x8x512xf32, #tpu.memory_space<vmem>>
      %67 = arith.index_cast %c1_i32_32 : i32 to index
      %c0_36 = arith.constant 0 : index
      %c0_37 = arith.constant 0 : index
      %68 = vector.load %66[%67, %c0_36, %c0_37] : memref<8x8x512xf32, #tpu.memory_space<vmem>>, vector<1x8x512xf32>
      %69 = vector.shape_cast %68 : vector<1x8x512xf32> to vector<8x512xf32>
      %70 = arith.truncf %64 : vector<8x128xf32> to vector<8x128xbf16>
      %cst_38 = arith.constant dense<0.000000e+00> : vector<8x512xf32>
      %71 = tpu.matmul %70, %23, %cst_38 {dimension_numbers = #tpu.dot_dimension_numbers<[1], [0], [0], [1], [0, 0, 1, 1], [], []>} : vector<8x128xbf16>, vector<128x512xbf16>, vector<8x512xf32> -> vector<8x512xf32>
      %72 = arith.addf %69, %71 : vector<8x512xf32>
      %73 = vector.extract_strided_slice %72 {offsets = [0, 0], sizes = [8, 128], strides = [1, 1]} : vector<8x512xf32> to vector<8x128xf32>
      %cst_39 = arith.constant 5.000000e-01 : f32
      %74 = vector.broadcast %cst_39 : f32 to vector<8x128xf32>
      %75 = arith.mulf %74, %73 : vector<8x128xf32>
      %76 = math.tanh %75 : vector<8x128xf32>
      %cst_40 = arith.constant 1.000000e+00 : f32
      %77 = vector.broadcast %cst_40 : f32 to vector<8x128xf32>
      %78 = arith.addf %76, %77 : vector<8x128xf32>
      %cst_41 = arith.constant 5.000000e-01 : f32
      %79 = vector.broadcast %cst_41 : f32 to vector<8x128xf32>
      %80 = arith.mulf %79, %78 : vector<8x128xf32>
      %81 = vector.extract_strided_slice %72 {offsets = [0, 128], sizes = [8, 128], strides = [1, 1]} : vector<8x512xf32> to vector<8x128xf32>
      %cst_42 = arith.constant 5.000000e-01 : f32
      %82 = vector.broadcast %cst_42 : f32 to vector<8x128xf32>
      %83 = arith.mulf %82, %81 : vector<8x128xf32>
      %84 = math.tanh %83 : vector<8x128xf32>
      %cst_43 = arith.constant 1.000000e+00 : f32
      %85 = vector.broadcast %cst_43 : f32 to vector<8x128xf32>
      %86 = arith.addf %84, %85 : vector<8x128xf32>
      %cst_44 = arith.constant 5.000000e-01 : f32
      %87 = vector.broadcast %cst_44 : f32 to vector<8x128xf32>
      %88 = arith.mulf %87, %86 : vector<8x128xf32>
      %89 = vector.extract_strided_slice %72 {offsets = [0, 256], sizes = [8, 128], strides = [1, 1]} : vector<8x512xf32> to vector<8x128xf32>
      %90 = math.tanh %89 : vector<8x128xf32>
      %91 = vector.extract_strided_slice %72 {offsets = [0, 384], sizes = [8, 128], strides = [1, 1]} : vector<8x512xf32> to vector<8x128xf32>
      %cst_45 = arith.constant 5.000000e-01 : f32
      %92 = vector.broadcast %cst_45 : f32 to vector<8x128xf32>
      %93 = arith.mulf %92, %91 : vector<8x128xf32>
      %94 = math.tanh %93 : vector<8x128xf32>
      %cst_46 = arith.constant 1.000000e+00 : f32
      %95 = vector.broadcast %cst_46 : f32 to vector<8x128xf32>
      %96 = arith.addf %94, %95 : vector<8x128xf32>
      %cst_47 = arith.constant 5.000000e-01 : f32
      %97 = vector.broadcast %cst_47 : f32 to vector<8x128xf32>
      %98 = arith.mulf %97, %96 : vector<8x128xf32>
      %99 = arith.mulf %88, %62 : vector<8x128xf32>
      %100 = arith.mulf %80, %90 : vector<8x128xf32>
      %101 = arith.addf %99, %100 : vector<8x128xf32>
      %102 = math.tanh %101 : vector<8x128xf32>
      %103 = arith.mulf %98, %102 : vector<8x128xf32>
      %c2_i32_48 = arith.constant 2 : i32
      %c0_i32_49 = arith.constant 0 : i32
      %c0_i32_50 = arith.constant 0 : i32
      %c0_i32_51 = arith.constant 0 : i32
      %104 = tpu.memref_slice %arg12[%22, %c0_i32_49, %c0_i32_50, %c0_i32_51] : memref<2x8x8x512xf32, #tpu.memory_space<vmem>> -> memref<1x8x8x512xf32, #tpu.memory_space<vmem>>
      %105 = tpu.memref_squeeze %104 : memref<1x8x8x512xf32, #tpu.memory_space<vmem>> -> memref<8x8x512xf32, #tpu.memory_space<vmem>>
      %106 = arith.index_cast %c2_i32_48 : i32 to index
      %c0_52 = arith.constant 0 : index
      %c0_53 = arith.constant 0 : index
      %107 = vector.load %105[%106, %c0_52, %c0_53] : memref<8x8x512xf32, #tpu.memory_space<vmem>>, vector<1x8x512xf32>
      %108 = vector.shape_cast %107 : vector<1x8x512xf32> to vector<8x512xf32>
      %109 = arith.truncf %103 : vector<8x128xf32> to vector<8x128xbf16>
      %cst_54 = arith.constant dense<0.000000e+00> : vector<8x512xf32>
      %110 = tpu.matmul %109, %23, %cst_54 {dimension_numbers = #tpu.dot_dimension_numbers<[1], [0], [0], [1], [0, 0, 1, 1], [], []>} : vector<8x128xbf16>, vector<128x512xbf16>, vector<8x512xf32> -> vector<8x512xf32>
      %111 = arith.addf %108, %110 : vector<8x512xf32>
      %112 = vector.extract_strided_slice %111 {offsets = [0, 0], sizes = [8, 128], strides = [1, 1]} : vector<8x512xf32> to vector<8x128xf32>
      %cst_55 = arith.constant 5.000000e-01 : f32
      %113 = vector.broadcast %cst_55 : f32 to vector<8x128xf32>
      %114 = arith.mulf %113, %112 : vector<8x128xf32>
      %115 = math.tanh %114 : vector<8x128xf32>
      %cst_56 = arith.constant 1.000000e+00 : f32
      %116 = vector.broadcast %cst_56 : f32 to vector<8x128xf32>
      %117 = arith.addf %115, %116 : vector<8x128xf32>
      %cst_57 = arith.constant 5.000000e-01 : f32
      %118 = vector.broadcast %cst_57 : f32 to vector<8x128xf32>
      %119 = arith.mulf %118, %117 : vector<8x128xf32>
      %120 = vector.extract_strided_slice %111 {offsets = [0, 128], sizes = [8, 128], strides = [1, 1]} : vector<8x512xf32> to vector<8x128xf32>
      %cst_58 = arith.constant 5.000000e-01 : f32
      %121 = vector.broadcast %cst_58 : f32 to vector<8x128xf32>
      %122 = arith.mulf %121, %120 : vector<8x128xf32>
      %123 = math.tanh %122 : vector<8x128xf32>
      %cst_59 = arith.constant 1.000000e+00 : f32
      %124 = vector.broadcast %cst_59 : f32 to vector<8x128xf32>
      %125 = arith.addf %123, %124 : vector<8x128xf32>
      %cst_60 = arith.constant 5.000000e-01 : f32
      %126 = vector.broadcast %cst_60 : f32 to vector<8x128xf32>
      %127 = arith.mulf %126, %125 : vector<8x128xf32>
      %128 = vector.extract_strided_slice %111 {offsets = [0, 256], sizes = [8, 128], strides = [1, 1]} : vector<8x512xf32> to vector<8x128xf32>
      %129 = math.tanh %128 : vector<8x128xf32>
      %130 = vector.extract_strided_slice %111 {offsets = [0, 384], sizes = [8, 128], strides = [1, 1]} : vector<8x512xf32> to vector<8x128xf32>
      %cst_61 = arith.constant 5.000000e-01 : f32
      %131 = vector.broadcast %cst_61 : f32 to vector<8x128xf32>
      %132 = arith.mulf %131, %130 : vector<8x128xf32>
      %133 = math.tanh %132 : vector<8x128xf32>
      %cst_62 = arith.constant 1.000000e+00 : f32
      %134 = vector.broadcast %cst_62 : f32 to vector<8x128xf32>
      %135 = arith.addf %133, %134 : vector<8x128xf32>
      %cst_63 = arith.constant 5.000000e-01 : f32
      %136 = vector.broadcast %cst_63 : f32 to vector<8x128xf32>
      %137 = arith.mulf %136, %135 : vector<8x128xf32>
      %138 = arith.mulf %127, %101 : vector<8x128xf32>
      %139 = arith.mulf %119, %129 : vector<8x128xf32>
      %140 = arith.addf %138, %139 : vector<8x128xf32>
      %141 = math.tanh %140 : vector<8x128xf32>
      %142 = arith.mulf %137, %141 : vector<8x128xf32>
      %c3_i32 = arith.constant 3 : i32
      %c0_i32_64 = arith.constant 0 : i32
      %c0_i32_65 = arith.constant 0 : i32
      %c0_i32_66 = arith.constant 0 : i32
      %143 = tpu.memref_slice %arg12[%22, %c0_i32_64, %c0_i32_65, %c0_i32_66] : memref<2x8x8x512xf32, #tpu.memory_space<vmem>> -> memref<1x8x8x512xf32, #tpu.memory_space<vmem>>
      %144 = tpu.memref_squeeze %143 : memref<1x8x8x512xf32, #tpu.memory_space<vmem>> -> memref<8x8x512xf32, #tpu.memory_space<vmem>>
      %145 = arith.index_cast %c3_i32 : i32 to index
      %c0_67 = arith.constant 0 : index
      %c0_68 = arith.constant 0 : index
      %146 = vector.load %144[%145, %c0_67, %c0_68] : memref<8x8x512xf32, #tpu.memory_space<vmem>>, vector<1x8x512xf32>
      %147 = vector.shape_cast %146 : vector<1x8x512xf32> to vector<8x512xf32>
      %148 = arith.truncf %142 : vector<8x128xf32> to vector<8x128xbf16>
      %cst_69 = arith.constant dense<0.000000e+00> : vector<8x512xf32>
      %149 = tpu.matmul %148, %23, %cst_69 {dimension_numbers = #tpu.dot_dimension_numbers<[1], [0], [0], [1], [0, 0, 1, 1], [], []>} : vector<8x128xbf16>, vector<128x512xbf16>, vector<8x512xf32> -> vector<8x512xf32>
      %150 = arith.addf %147, %149 : vector<8x512xf32>
      %151 = vector.extract_strided_slice %150 {offsets = [0, 0], sizes = [8, 128], strides = [1, 1]} : vector<8x512xf32> to vector<8x128xf32>
      %cst_70 = arith.constant 5.000000e-01 : f32
      %152 = vector.broadcast %cst_70 : f32 to vector<8x128xf32>
      %153 = arith.mulf %152, %151 : vector<8x128xf32>
      %154 = math.tanh %153 : vector<8x128xf32>
      %cst_71 = arith.constant 1.000000e+00 : f32
      %155 = vector.broadcast %cst_71 : f32 to vector<8x128xf32>
      %156 = arith.addf %154, %155 : vector<8x128xf32>
      %cst_72 = arith.constant 5.000000e-01 : f32
      %157 = vector.broadcast %cst_72 : f32 to vector<8x128xf32>
      %158 = arith.mulf %157, %156 : vector<8x128xf32>
      %159 = vector.extract_strided_slice %150 {offsets = [0, 128], sizes = [8, 128], strides = [1, 1]} : vector<8x512xf32> to vector<8x128xf32>
      %cst_73 = arith.constant 5.000000e-01 : f32
      %160 = vector.broadcast %cst_73 : f32 to vector<8x128xf32>
      %161 = arith.mulf %160, %159 : vector<8x128xf32>
      %162 = math.tanh %161 : vector<8x128xf32>
      %cst_74 = arith.constant 1.000000e+00 : f32
      %163 = vector.broadcast %cst_74 : f32 to vector<8x128xf32>
      %164 = arith.addf %162, %163 : vector<8x128xf32>
      %cst_75 = arith.constant 5.000000e-01 : f32
      %165 = vector.broadcast %cst_75 : f32 to vector<8x128xf32>
      %166 = arith.mulf %165, %164 : vector<8x128xf32>
      %167 = vector.extract_strided_slice %150 {offsets = [0, 256], sizes = [8, 128], strides = [1, 1]} : vector<8x512xf32> to vector<8x128xf32>
      %168 = math.tanh %167 : vector<8x128xf32>
      %169 = vector.extract_strided_slice %150 {offsets = [0, 384], sizes = [8, 128], strides = [1, 1]} : vector<8x512xf32> to vector<8x128xf32>
      %cst_76 = arith.constant 5.000000e-01 : f32
      %170 = vector.broadcast %cst_76 : f32 to vector<8x128xf32>
      %171 = arith.mulf %170, %169 : vector<8x128xf32>
      %172 = math.tanh %171 : vector<8x128xf32>
      %cst_77 = arith.constant 1.000000e+00 : f32
      %173 = vector.broadcast %cst_77 : f32 to vector<8x128xf32>
      %174 = arith.addf %172, %173 : vector<8x128xf32>
      %cst_78 = arith.constant 5.000000e-01 : f32
      %175 = vector.broadcast %cst_78 : f32 to vector<8x128xf32>
      %176 = arith.mulf %175, %174 : vector<8x128xf32>
      %177 = arith.mulf %166, %140 : vector<8x128xf32>
      %178 = arith.mulf %158, %168 : vector<8x128xf32>
      %179 = arith.addf %177, %178 : vector<8x128xf32>
      %180 = math.tanh %179 : vector<8x128xf32>
      %181 = arith.mulf %176, %180 : vector<8x128xf32>
      %c4_i32 = arith.constant 4 : i32
      %c0_i32_79 = arith.constant 0 : i32
      %c0_i32_80 = arith.constant 0 : i32
      %c0_i32_81 = arith.constant 0 : i32
      %182 = tpu.memref_slice %arg12[%22, %c0_i32_79, %c0_i32_80, %c0_i32_81] : memref<2x8x8x512xf32, #tpu.memory_space<vmem>> -> memref<1x8x8x512xf32, #tpu.memory_space<vmem>>
      %183 = tpu.memref_squeeze %182 : memref<1x8x8x512xf32, #tpu.memory_space<vmem>> -> memref<8x8x512xf32, #tpu.memory_space<vmem>>
      %184 = arith.index_cast %c4_i32 : i32 to index
      %c0_82 = arith.constant 0 : index
      %c0_83 = arith.constant 0 : index
      %185 = vector.load %183[%184, %c0_82, %c0_83] : memref<8x8x512xf32, #tpu.memory_space<vmem>>, vector<1x8x512xf32>
      %186 = vector.shape_cast %185 : vector<1x8x512xf32> to vector<8x512xf32>
      %187 = arith.truncf %181 : vector<8x128xf32> to vector<8x128xbf16>
      %cst_84 = arith.constant dense<0.000000e+00> : vector<8x512xf32>
      %188 = tpu.matmul %187, %23, %cst_84 {dimension_numbers = #tpu.dot_dimension_numbers<[1], [0], [0], [1], [0, 0, 1, 1], [], []>} : vector<8x128xbf16>, vector<128x512xbf16>, vector<8x512xf32> -> vector<8x512xf32>
      %189 = arith.addf %186, %188 : vector<8x512xf32>
      %190 = vector.extract_strided_slice %189 {offsets = [0, 0], sizes = [8, 128], strides = [1, 1]} : vector<8x512xf32> to vector<8x128xf32>
      %cst_85 = arith.constant 5.000000e-01 : f32
      %191 = vector.broadcast %cst_85 : f32 to vector<8x128xf32>
      %192 = arith.mulf %191, %190 : vector<8x128xf32>
      %193 = math.tanh %192 : vector<8x128xf32>
      %cst_86 = arith.constant 1.000000e+00 : f32
      %194 = vector.broadcast %cst_86 : f32 to vector<8x128xf32>
      %195 = arith.addf %193, %194 : vector<8x128xf32>
      %cst_87 = arith.constant 5.000000e-01 : f32
      %196 = vector.broadcast %cst_87 : f32 to vector<8x128xf32>
      %197 = arith.mulf %196, %195 : vector<8x128xf32>
      %198 = vector.extract_strided_slice %189 {offsets = [0, 128], sizes = [8, 128], strides = [1, 1]} : vector<8x512xf32> to vector<8x128xf32>
      %cst_88 = arith.constant 5.000000e-01 : f32
      %199 = vector.broadcast %cst_88 : f32 to vector<8x128xf32>
      %200 = arith.mulf %199, %198 : vector<8x128xf32>
      %201 = math.tanh %200 : vector<8x128xf32>
      %cst_89 = arith.constant 1.000000e+00 : f32
      %202 = vector.broadcast %cst_89 : f32 to vector<8x128xf32>
      %203 = arith.addf %201, %202 : vector<8x128xf32>
      %cst_90 = arith.constant 5.000000e-01 : f32
      %204 = vector.broadcast %cst_90 : f32 to vector<8x128xf32>
      %205 = arith.mulf %204, %203 : vector<8x128xf32>
      %206 = vector.extract_strided_slice %189 {offsets = [0, 256], sizes = [8, 128], strides = [1, 1]} : vector<8x512xf32> to vector<8x128xf32>
      %207 = math.tanh %206 : vector<8x128xf32>
      %208 = vector.extract_strided_slice %189 {offsets = [0, 384], sizes = [8, 128], strides = [1, 1]} : vector<8x512xf32> to vector<8x128xf32>
      %cst_91 = arith.constant 5.000000e-01 : f32
      %209 = vector.broadcast %cst_91 : f32 to vector<8x128xf32>
      %210 = arith.mulf %209, %208 : vector<8x128xf32>
      %211 = math.tanh %210 : vector<8x128xf32>
      %cst_92 = arith.constant 1.000000e+00 : f32
      %212 = vector.broadcast %cst_92 : f32 to vector<8x128xf32>
      %213 = arith.addf %211, %212 : vector<8x128xf32>
      %cst_93 = arith.constant 5.000000e-01 : f32
      %214 = vector.broadcast %cst_93 : f32 to vector<8x128xf32>
      %215 = arith.mulf %214, %213 : vector<8x128xf32>
      %216 = arith.mulf %205, %179 : vector<8x128xf32>
      %217 = arith.mulf %197, %207 : vector<8x128xf32>
      %218 = arith.addf %216, %217 : vector<8x128xf32>
      %219 = math.tanh %218 : vector<8x128xf32>
      %220 = arith.mulf %215, %219 : vector<8x128xf32>
      %c5_i32 = arith.constant 5 : i32
      %c0_i32_94 = arith.constant 0 : i32
      %c0_i32_95 = arith.constant 0 : i32
      %c0_i32_96 = arith.constant 0 : i32
      %221 = tpu.memref_slice %arg12[%22, %c0_i32_94, %c0_i32_95, %c0_i32_96] : memref<2x8x8x512xf32, #tpu.memory_space<vmem>> -> memref<1x8x8x512xf32, #tpu.memory_space<vmem>>
      %222 = tpu.memref_squeeze %221 : memref<1x8x8x512xf32, #tpu.memory_space<vmem>> -> memref<8x8x512xf32, #tpu.memory_space<vmem>>
      %223 = arith.index_cast %c5_i32 : i32 to index
      %c0_97 = arith.constant 0 : index
      %c0_98 = arith.constant 0 : index
      %224 = vector.load %222[%223, %c0_97, %c0_98] : memref<8x8x512xf32, #tpu.memory_space<vmem>>, vector<1x8x512xf32>
      %225 = vector.shape_cast %224 : vector<1x8x512xf32> to vector<8x512xf32>
      %226 = arith.truncf %220 : vector<8x128xf32> to vector<8x128xbf16>
      %cst_99 = arith.constant dense<0.000000e+00> : vector<8x512xf32>
      %227 = tpu.matmul %226, %23, %cst_99 {dimension_numbers = #tpu.dot_dimension_numbers<[1], [0], [0], [1], [0, 0, 1, 1], [], []>} : vector<8x128xbf16>, vector<128x512xbf16>, vector<8x512xf32> -> vector<8x512xf32>
      %228 = arith.addf %225, %227 : vector<8x512xf32>
      %229 = vector.extract_strided_slice %228 {offsets = [0, 0], sizes = [8, 128], strides = [1, 1]} : vector<8x512xf32> to vector<8x128xf32>
      %cst_100 = arith.constant 5.000000e-01 : f32
      %230 = vector.broadcast %cst_100 : f32 to vector<8x128xf32>
      %231 = arith.mulf %230, %229 : vector<8x128xf32>
      %232 = math.tanh %231 : vector<8x128xf32>
      %cst_101 = arith.constant 1.000000e+00 : f32
      %233 = vector.broadcast %cst_101 : f32 to vector<8x128xf32>
      %234 = arith.addf %232, %233 : vector<8x128xf32>
      %cst_102 = arith.constant 5.000000e-01 : f32
      %235 = vector.broadcast %cst_102 : f32 to vector<8x128xf32>
      %236 = arith.mulf %235, %234 : vector<8x128xf32>
      %237 = vector.extract_strided_slice %228 {offsets = [0, 128], sizes = [8, 128], strides = [1, 1]} : vector<8x512xf32> to vector<8x128xf32>
      %cst_103 = arith.constant 5.000000e-01 : f32
      %238 = vector.broadcast %cst_103 : f32 to vector<8x128xf32>
      %239 = arith.mulf %238, %237 : vector<8x128xf32>
      %240 = math.tanh %239 : vector<8x128xf32>
      %cst_104 = arith.constant 1.000000e+00 : f32
      %241 = vector.broadcast %cst_104 : f32 to vector<8x128xf32>
      %242 = arith.addf %240, %241 : vector<8x128xf32>
      %cst_105 = arith.constant 5.000000e-01 : f32
      %243 = vector.broadcast %cst_105 : f32 to vector<8x128xf32>
      %244 = arith.mulf %243, %242 : vector<8x128xf32>
      %245 = vector.extract_strided_slice %228 {offsets = [0, 256], sizes = [8, 128], strides = [1, 1]} : vector<8x512xf32> to vector<8x128xf32>
      %246 = math.tanh %245 : vector<8x128xf32>
      %247 = vector.extract_strided_slice %228 {offsets = [0, 384], sizes = [8, 128], strides = [1, 1]} : vector<8x512xf32> to vector<8x128xf32>
      %cst_106 = arith.constant 5.000000e-01 : f32
      %248 = vector.broadcast %cst_106 : f32 to vector<8x128xf32>
      %249 = arith.mulf %248, %247 : vector<8x128xf32>
      %250 = math.tanh %249 : vector<8x128xf32>
      %cst_107 = arith.constant 1.000000e+00 : f32
      %251 = vector.broadcast %cst_107 : f32 to vector<8x128xf32>
      %252 = arith.addf %250, %251 : vector<8x128xf32>
      %cst_108 = arith.constant 5.000000e-01 : f32
      %253 = vector.broadcast %cst_108 : f32 to vector<8x128xf32>
      %254 = arith.mulf %253, %252 : vector<8x128xf32>
      %255 = arith.mulf %244, %218 : vector<8x128xf32>
      %256 = arith.mulf %236, %246 : vector<8x128xf32>
      %257 = arith.addf %255, %256 : vector<8x128xf32>
      %258 = math.tanh %257 : vector<8x128xf32>
      %259 = arith.mulf %254, %258 : vector<8x128xf32>
      %c6_i32 = arith.constant 6 : i32
      %c0_i32_109 = arith.constant 0 : i32
      %c0_i32_110 = arith.constant 0 : i32
      %c0_i32_111 = arith.constant 0 : i32
      %260 = tpu.memref_slice %arg12[%22, %c0_i32_109, %c0_i32_110, %c0_i32_111] : memref<2x8x8x512xf32, #tpu.memory_space<vmem>> -> memref<1x8x8x512xf32, #tpu.memory_space<vmem>>
      %261 = tpu.memref_squeeze %260 : memref<1x8x8x512xf32, #tpu.memory_space<vmem>> -> memref<8x8x512xf32, #tpu.memory_space<vmem>>
      %262 = arith.index_cast %c6_i32 : i32 to index
      %c0_112 = arith.constant 0 : index
      %c0_113 = arith.constant 0 : index
      %263 = vector.load %261[%262, %c0_112, %c0_113] : memref<8x8x512xf32, #tpu.memory_space<vmem>>, vector<1x8x512xf32>
      %264 = vector.shape_cast %263 : vector<1x8x512xf32> to vector<8x512xf32>
      %265 = arith.truncf %259 : vector<8x128xf32> to vector<8x128xbf16>
      %cst_114 = arith.constant dense<0.000000e+00> : vector<8x512xf32>
      %266 = tpu.matmul %265, %23, %cst_114 {dimension_numbers = #tpu.dot_dimension_numbers<[1], [0], [0], [1], [0, 0, 1, 1], [], []>} : vector<8x128xbf16>, vector<128x512xbf16>, vector<8x512xf32> -> vector<8x512xf32>
      %267 = arith.addf %264, %266 : vector<8x512xf32>
      %268 = vector.extract_strided_slice %267 {offsets = [0, 0], sizes = [8, 128], strides = [1, 1]} : vector<8x512xf32> to vector<8x128xf32>
      %cst_115 = arith.constant 5.000000e-01 : f32
      %269 = vector.broadcast %cst_115 : f32 to vector<8x128xf32>
      %270 = arith.mulf %269, %268 : vector<8x128xf32>
      %271 = math.tanh %270 : vector<8x128xf32>
      %cst_116 = arith.constant 1.000000e+00 : f32
      %272 = vector.broadcast %cst_116 : f32 to vector<8x128xf32>
      %273 = arith.addf %271, %272 : vector<8x128xf32>
      %cst_117 = arith.constant 5.000000e-01 : f32
      %274 = vector.broadcast %cst_117 : f32 to vector<8x128xf32>
      %275 = arith.mulf %274, %273 : vector<8x128xf32>
      %276 = vector.extract_strided_slice %267 {offsets = [0, 128], sizes = [8, 128], strides = [1, 1]} : vector<8x512xf32> to vector<8x128xf32>
      %cst_118 = arith.constant 5.000000e-01 : f32
      %277 = vector.broadcast %cst_118 : f32 to vector<8x128xf32>
      %278 = arith.mulf %277, %276 : vector<8x128xf32>
      %279 = math.tanh %278 : vector<8x128xf32>
      %cst_119 = arith.constant 1.000000e+00 : f32
      %280 = vector.broadcast %cst_119 : f32 to vector<8x128xf32>
      %281 = arith.addf %279, %280 : vector<8x128xf32>
      %cst_120 = arith.constant 5.000000e-01 : f32
      %282 = vector.broadcast %cst_120 : f32 to vector<8x128xf32>
      %283 = arith.mulf %282, %281 : vector<8x128xf32>
      %284 = vector.extract_strided_slice %267 {offsets = [0, 256], sizes = [8, 128], strides = [1, 1]} : vector<8x512xf32> to vector<8x128xf32>
      %285 = math.tanh %284 : vector<8x128xf32>
      %286 = vector.extract_strided_slice %267 {offsets = [0, 384], sizes = [8, 128], strides = [1, 1]} : vector<8x512xf32> to vector<8x128xf32>
      %cst_121 = arith.constant 5.000000e-01 : f32
      %287 = vector.broadcast %cst_121 : f32 to vector<8x128xf32>
      %288 = arith.mulf %287, %286 : vector<8x128xf32>
      %289 = math.tanh %288 : vector<8x128xf32>
      %cst_122 = arith.constant 1.000000e+00 : f32
      %290 = vector.broadcast %cst_122 : f32 to vector<8x128xf32>
      %291 = arith.addf %289, %290 : vector<8x128xf32>
      %cst_123 = arith.constant 5.000000e-01 : f32
      %292 = vector.broadcast %cst_123 : f32 to vector<8x128xf32>
      %293 = arith.mulf %292, %291 : vector<8x128xf32>
      %294 = arith.mulf %283, %257 : vector<8x128xf32>
      %295 = arith.mulf %275, %285 : vector<8x128xf32>
      %296 = arith.addf %294, %295 : vector<8x128xf32>
      %297 = math.tanh %296 : vector<8x128xf32>
      %298 = arith.mulf %293, %297 : vector<8x128xf32>
      %c7_i32 = arith.constant 7 : i32
      %c0_i32_124 = arith.constant 0 : i32
      %c0_i32_125 = arith.constant 0 : i32
      %c0_i32_126 = arith.constant 0 : i32
      %299 = tpu.memref_slice %arg12[%22, %c0_i32_124, %c0_i32_125, %c0_i32_126] : memref<2x8x8x512xf32, #tpu.memory_space<vmem>> -> memref<1x8x8x512xf32, #tpu.memory_space<vmem>>
      %300 = tpu.memref_squeeze %299 : memref<1x8x8x512xf32, #tpu.memory_space<vmem>> -> memref<8x8x512xf32, #tpu.memory_space<vmem>>
      %301 = arith.index_cast %c7_i32 : i32 to index
      %c0_127 = arith.constant 0 : index
      %c0_128 = arith.constant 0 : index
      %302 = vector.load %300[%301, %c0_127, %c0_128] : memref<8x8x512xf32, #tpu.memory_space<vmem>>, vector<1x8x512xf32>
      %303 = vector.shape_cast %302 : vector<1x8x512xf32> to vector<8x512xf32>
      %304 = arith.truncf %298 : vector<8x128xf32> to vector<8x128xbf16>
      %cst_129 = arith.constant dense<0.000000e+00> : vector<8x512xf32>
      %305 = tpu.matmul %304, %23, %cst_129 {dimension_numbers = #tpu.dot_dimension_numbers<[1], [0], [0], [1], [0, 0, 1, 1], [], []>} : vector<8x128xbf16>, vector<128x512xbf16>, vector<8x512xf32> -> vector<8x512xf32>
      %306 = arith.addf %303, %305 : vector<8x512xf32>
      %307 = vector.extract_strided_slice %306 {offsets = [0, 0], sizes = [8, 128], strides = [1, 1]} : vector<8x512xf32> to vector<8x128xf32>
      %cst_130 = arith.constant 5.000000e-01 : f32
      %308 = vector.broadcast %cst_130 : f32 to vector<8x128xf32>
      %309 = arith.mulf %308, %307 : vector<8x128xf32>
      %310 = math.tanh %309 : vector<8x128xf32>
      %cst_131 = arith.constant 1.000000e+00 : f32
      %311 = vector.broadcast %cst_131 : f32 to vector<8x128xf32>
      %312 = arith.addf %310, %311 : vector<8x128xf32>
      %cst_132 = arith.constant 5.000000e-01 : f32
      %313 = vector.broadcast %cst_132 : f32 to vector<8x128xf32>
      %314 = arith.mulf %313, %312 : vector<8x128xf32>
      %315 = vector.extract_strided_slice %306 {offsets = [0, 128], sizes = [8, 128], strides = [1, 1]} : vector<8x512xf32> to vector<8x128xf32>
      %cst_133 = arith.constant 5.000000e-01 : f32
      %316 = vector.broadcast %cst_133 : f32 to vector<8x128xf32>
      %317 = arith.mulf %316, %315 : vector<8x128xf32>
      %318 = math.tanh %317 : vector<8x128xf32>
      %cst_134 = arith.constant 1.000000e+00 : f32
      %319 = vector.broadcast %cst_134 : f32 to vector<8x128xf32>
      %320 = arith.addf %318, %319 : vector<8x128xf32>
      %cst_135 = arith.constant 5.000000e-01 : f32
      %321 = vector.broadcast %cst_135 : f32 to vector<8x128xf32>
      %322 = arith.mulf %321, %320 : vector<8x128xf32>
      %323 = vector.extract_strided_slice %306 {offsets = [0, 256], sizes = [8, 128], strides = [1, 1]} : vector<8x512xf32> to vector<8x128xf32>
      %324 = math.tanh %323 : vector<8x128xf32>
      %325 = vector.extract_strided_slice %306 {offsets = [0, 384], sizes = [8, 128], strides = [1, 1]} : vector<8x512xf32> to vector<8x128xf32>
      %cst_136 = arith.constant 5.000000e-01 : f32
      %326 = vector.broadcast %cst_136 : f32 to vector<8x128xf32>
      %327 = arith.mulf %326, %325 : vector<8x128xf32>
      %328 = math.tanh %327 : vector<8x128xf32>
      %cst_137 = arith.constant 1.000000e+00 : f32
      %329 = vector.broadcast %cst_137 : f32 to vector<8x128xf32>
      %330 = arith.addf %328, %329 : vector<8x128xf32>
      %cst_138 = arith.constant 5.000000e-01 : f32
      %331 = vector.broadcast %cst_138 : f32 to vector<8x128xf32>
      %332 = arith.mulf %331, %330 : vector<8x128xf32>
      %333 = arith.mulf %322, %296 : vector<8x128xf32>
      %334 = arith.mulf %314, %324 : vector<8x128xf32>
      %335 = arith.addf %333, %334 : vector<8x128xf32>
      %336 = math.tanh %335 : vector<8x128xf32>
      %337 = arith.mulf %332, %336 : vector<8x128xf32>
      %c8_i32 = arith.constant 8 : i32
      %c0_139 = arith.constant 0 : index
      %c0_140 = arith.constant 0 : index
      %338 = vector.load %arg10[%c0_139, %c0_140] : memref<8x128xf32, #tpu.memory_space<vmem>>, vector<8x128xf32>
      tpu.vector_store %arg10[%c0_139, %c0_140], %337 {strides = array<i32>} : memref<8x128xf32, #tpu.memory_space<vmem>>, vector<8x128xf32>,
      %c0_141 = arith.constant 0 : index
      %c0_142 = arith.constant 0 : index
      %339 = vector.load %arg11[%c0_141, %c0_142] : memref<8x128xf32, #tpu.memory_space<vmem>>, vector<8x128xf32>
      tpu.vector_store %arg11[%c0_141, %c0_142], %335 {strides = array<i32>} : memref<8x128xf32, #tpu.memory_space<vmem>>, vector<8x128xf32>,
    } else {
    }
    %c1_i32_4 = arith.constant 1 : i32
    %9 = arith.cmpi eq, %arg1, %c1_i32_4 : i32
    %10 = arith.extui %9 : i1 to i32
    %c0_i32_5 = arith.constant 0 : i32
    %11 = arith.cmpi ne, %10, %c0_i32_5 : i32
    scf.if %11 {
      %c0 = arith.constant 0 : index
      %c0_6 = arith.constant 0 : index
      %12 = vector.load %arg10[%c0, %c0_6] : memref<8x128xf32, #tpu.memory_space<vmem>>, vector<8x128xf32>
      %c0_7 = arith.constant 0 : index
      %c0_8 = arith.constant 0 : index
      %13 = vector.load %arg9[%c0_7, %c0_8] : memref<8x128xf32, #tpu.memory_space<vmem>>, vector<8x128xf32>
      tpu.vector_store %arg9[%c0_7, %c0_8], %12 {strides = array<i32>} : memref<8x128xf32, #tpu.memory_space<vmem>>, vector<8x128xf32>,
      %14 = arith.truncf %12 : vector<8x128xf32> to vector<8x128xbf16>
      %c0_9 = arith.constant 0 : index
      %c0_10 = arith.constant 0 : index
      %15 = vector.load %arg6[%c0_9, %c0_10] : memref<128x128xbf16, #tpu.memory_space<vmem>>, vector<128x128xbf16>
      %cst = arith.constant dense<0.000000e+00> : vector<8x128xf32>
      %16 = tpu.matmul %14, %15, %cst {dimension_numbers = #tpu.dot_dimension_numbers<[1], [0], [0], [1], [0, 0, 1, 1], [], []>} : vector<8x128xbf16>, vector<128x128xbf16>, vector<8x128xf32> -> vector<8x128xf32>
      %c0_11 = arith.constant 0 : index
      %c0_12 = arith.constant 0 : index
      %17 = vector.load %arg7[%c0_11, %c0_12] : memref<1x128xf32, #tpu.memory_space<vmem>>, vector<1x128xf32>
      %18 = vector.broadcast %17 : vector<1x128xf32> to vector<8x128xf32>
      %19 = arith.addf %16, %18 : vector<8x128xf32>
      %c0_13 = arith.constant 0 : index
      %c0_14 = arith.constant 0 : index
      %20 = vector.load %arg8[%c0_13, %c0_14] : memref<8x128xf32, #tpu.memory_space<vmem>>, vector<8x128xf32>
      tpu.vector_store %arg8[%c0_13, %c0_14], %19 {strides = array<i32>} : memref<8x128xf32, #tpu.memory_space<vmem>>, vector<8x128xf32>,
    } else {
    }
    return
  }
  func.func @transform_0(%arg0: i32, %arg1: i32) -> (i32, i32, i32) {
    %c0_i32 = arith.constant 0 : i32
    %0 = arith.minsi %arg1, %c0_i32 : i32
    %c0_i32_0 = arith.constant 0 : i32
    %c0_i32_1 = arith.constant 0 : i32
    return %0, %arg0, %c0_i32_0 : i32, i32, i32
  }
  func.func @transform_1(%arg0: i32, %arg1: i32) -> (i32, i32) {
    %c0_i32 = arith.constant 0 : i32
    %c0_i32_0 = arith.constant 0 : i32
    %c0_i32_1 = arith.constant 0 : i32
    return %c0_i32, %c0_i32_0 : i32, i32
  }
  func.func @transform_2(%arg0: i32, %arg1: i32) -> (i32, i32) {
    %c0_i32 = arith.constant 0 : i32
    %c0_i32_0 = arith.constant 0 : i32
    %c0_i32_1 = arith.constant 0 : i32
    return %c0_i32, %c0_i32_0 : i32, i32
  }
  func.func @transform_3(%arg0: i32, %arg1: i32) -> (i32, i32) {
    %c0_i32 = arith.constant 0 : i32
    %c0_i32_0 = arith.constant 0 : i32
    %c0_i32_1 = arith.constant 0 : i32
    return %c0_i32, %c0_i32_0 : i32, i32
  }
  func.func @transform_4(%arg0: i32, %arg1: i32) -> (i32, i32) {
    %c0_i32 = arith.constant 0 : i32
    %c0_i32_0 = arith.constant 0 : i32
    %c0_i32_1 = arith.constant 0 : i32
    return %c0_i32, %c0_i32_0 : i32, i32
  }
  func.func @transform_5(%arg0: i32, %arg1: i32) -> (i32, i32) {
    %c0_i32 = arith.constant 0 : i32
    %c0_i32_0 = arith.constant 0 : i32
    %c0_i32_1 = arith.constant 0 : i32
    return %c0_i32, %c0_i32_0 : i32, i32
  }
  func.func @transform_6(%arg0: i32, %arg1: i32) -> (i32, i32) {
    %c0_i32 = arith.constant 0 : i32
    %c0_i32_0 = arith.constant 0 : i32
    return %arg0, %c0_i32 : i32, i32
  }
  func.func @transform_7(%arg0: i32, %arg1: i32) -> (i32, i32) {
    %c0_i32 = arith.constant 0 : i32
    %c0_i32_0 = arith.constant 0 : i32
    return %arg0, %c0_i32 : i32, i32
  }
}

</mosaic_0001>

<bundles_post_ra>
// kernel: tpu_custom_call.1
= control target key start
LH: loop header
LB: loop body
LE: loop exit
PB: predicated region body
PF: predicated region fallthrough
CT: control target
= control target key end

     0   :  { %13 = vsyncpa [#allocation6], 0  ;;  %s3467_s0 = inlined_call_operand.hbm [shape: bf16[8,8,32], index: 0, kind: input, shape index: {}]   ;;  %s3468_s1 = inlined_call_operand.hbm [shape: bf16[32,512], index: 1, kind: input, shape index: {}]   ;;  %s3469_s2 = inlined_call_operand.hbm [shape: bf16[128,512], index: 2, kind: input, shape index: {}]   ;;  %s3470_s3 = inlined_call_operand.vmem [shape: f32[1,512], index: 3, kind: input, shape index: {}]   ;;  %s3471_s4 = inlined_call_operand.hbm [shape: bf16[128,128], index: 4, kind: input, shape index: {}]   ;;  %s3472_s5 = inlined_call_operand.vmem [shape: f32[1,128], index: 5, kind: input, shape index: {}]   ;;  %s3473_s6 = inlined_call_operand.hbm [shape: f32[8,128], index: 6, kind: output, shape index: {0}]   ;;  %s3474_s7 = inlined_call_operand.hbm [shape: f32[8,128], index: 7, kind: output, shape index: {1}]  }
   0x1   :  { %15 = vsyncpa [#allocation6 + $0x1], 0 }
   0x2   :  { %16 = vsyncpa [#allocation9], 0 }
   0x3   :  { %17 = vsyncpa [#allocation12], 0 }
   0x4   :  { %18 = vsyncpa [#allocation7], 0 }
   0x5   :  { %19 = vsyncpa [#allocation15], 0  ;;  %s2755_s24 = smov 0   ;;  %s2757_s25 = smov 0  }
   0x6   :  { %s2759_s26 = smov 0   ;;  %s2761_s27 = smov 0  }
   0x7   :  { %s2763_s28 = smov 0  }
   0x8 LB: > { %s3477_s29 = sadd.s32 4294967295, %s2698_s28   ;;  %p63_p0 = scmp.ne.s32.totalorder %s2686_s25, %s2682_s24  ;;  %s2698_s28 = sphi %s2763_s28, %s25_s28   ;;  %s2694_s27 = sphi %s2761_s27, %s3495_s27   ;;  %s2690_s26 = sphi %s2759_s26, %s3494_s26   ;;  %s2686_s25 = sphi %s2757_s25, %s3457_s25   ;;  %s2682_s24 = sphi %s2755_s24, %s3493_s24  }
   0x9   : > { %p2782_p1 = scmp.eq.s32.totalorder %s3477_s29, 0  ;;  %p2023_p2 = scmp.ge.s32.totalorder %s2698_s28, 1 }
   0xa   : > { %p231_p3 = scmp.lt.s32.totalorder %s2698_s28, 3  ;;  %s2700_s10 = smov [#allocation8]  }
   0xb   : > { %s3481_s30 = scalar_select %p2782_p1, 1, 0 }
   0xc   : > { %p2790_p4 = por %p2782_p1, %p63_p0  ;;  %p2794_p5 = pnand %p2023_p2, %p231_p3 }
   0xd   : > { %s243_s11 = sshll.u32 %s2700_s10, 4  ;;  %s2701_s13 = smov [#allocation10]   ;;  %s2798_s11 = int_to_ptr.vmem [resolvable:$true] %s243_s11 }
   0xe   : > { %s3482_s8 = scalar_select %p2790_p4, 1, 0 }
   0xf   : > { %s3483_s9 = scalar_select %p2794_p5, 1, 0 }
  0x10   : > { %p2200_p6 = pneg %p2794_p5  ;;  %s256_s14 = sshll.u32 %s2701_s13, 4  ;;  %s2808_s14 = int_to_ptr.vmem [resolvable:$true] %s256_s14 }
  0x11   : > { %s2702_s15 = smov [#allocation11]   ;;  %s2469_s19 = scalar_lea.hbm %s3468_s1, 1024 }
  0x12   : > { %p2804_p7 = pnand %p2200_p6, %p2782_p1  ;;  %s2810_s16 = sshll.u32 %s2702_s15, 4  ;;  %s273_s16 = int_to_ptr.vmem [resolvable:$true] %s2810_s16 }
  0x13   : > { %p2470_p8 = scmp.ne.s32.totalorder %s3468_s1, %s2469_s19  ;;  %p2476_p12 = scmp.lt.u32.totalorder %s2469_s19, %s3468_s1 }
  0x14   : > { %p2820_p9 = pneg %p2804_p7 }
  0x16   : > { %p2472_p10 = pnand %p2820_p9, %p2470_p8 }
  0x18   : > { %p2473_p11 = pneg %p2472_p10 }
  0x1a   : > { %p2478_p13 = pnand %p2476_p12, %p2473_p11 }
  0x1c   : > { %2481 = shalt.err (!%p2478_p13)
}
  0x1d   : > { %s2482_s10 = scalar_lea.vmem %s2798_s11, 1024  ;;  %p2490_p6 = scmp.lt.s32.totalorder %s2798_s11, %s2798_s11 }
  0x1e   : > { %p2483_p0 = scmp.ne.s32.totalorder %s2798_s11, %s2482_s10  ;;  %p2491_p1 = scmp.lt.s32.totalorder %s2482_s10, %s2482_s10 }
  0x20   : > { %p2485_p2 = pnand %p2483_p0, %p2820_p9  ;;  %p2492_p8 = por %p2491_p1, %p2490_p6 }
  0x22   : > { %p2486_p3 = pneg %p2485_p2 }
  0x24   : > { %p2493_p10 = pnand %p2492_p8, %p2486_p3 }
  0x26   : > { %2496 = shalt.err (!%p2493_p10)
}
  0x27   : > { %s2703_s13 = smov 256   ;;  %s2704_s15 = smov 16  }
  0x28   : > { %2203 = dma.hbm_to_vmem [thread:$0]  (!%p2804_p7), %s3468_s1, 1024, %s2798_s11, [#allocation9], %s2703_s13, %s2703_s13, %s2704_s15  }
  0x29   : > { %s2497_s21 = scalar_lea.hbm %s3469_s2, 4096 }
  0x2a   : > { %p2498_p1 = scmp.ne.s32.totalorder %s3469_s2, %s2497_s21  ;;  %p2504_p13 = scmp.lt.u32.totalorder %s2497_s21, %s3469_s2 }
  0x2c   : > { %p2500_p11 = pnand %p2498_p1, %p2820_p9 }
  0x2e   : > { %p2501_p12 = pneg %p2500_p11 }
  0x30   : > { %p2506_p0 = pnand %p2504_p13, %p2501_p12 }
  0x32   : > { %2509 = shalt.err (!%p2506_p0)
}
  0x33   : > { %s2510_s11 = scalar_lea.vmem %s2808_s14, 4096  ;;  %p2518_p8 = scmp.lt.s32.totalorder %s2808_s14, %s2808_s14 }
  0x34   : > { %p2511_p2 = scmp.ne.s32.totalorder %s2808_s14, %s2510_s11  ;;  %p2519_p10 = scmp.lt.s32.totalorder %s2510_s11, %s2510_s11 }
  0x36   : > { %p2513_p3 = pnand %p2511_p2, %p2820_p9  ;;  %p2520_p1 = por %p2519_p10, %p2518_p8 }
  0x38   : > { %p2514_p6 = pneg %p2513_p3 }
  0x3a   : > { %p2521_p11 = pnand %p2520_p1, %p2514_p6 }
  0x3c   : > { %2524 = shalt.err (!%p2521_p11)
}
  0x3d   : > { %2206 = dma.hbm_to_vmem [thread:$0]  (!%p2804_p7), %s3469_s2, 4096, %s2808_s14, [#allocation9], %s2703_s13, %s2703_s13, %s2704_s15  }
  0x3e   : > { %s2525_s20 = scalar_lea.hbm %s3471_s4, 1024 }
  0x3f   : > { %p2526_p12 = scmp.ne.s32.totalorder %s3471_s4, %s2525_s20  ;;  %p2532_p2 = scmp.lt.u32.totalorder %s2525_s20, %s3471_s4 }
  0x41   : > { %p2528_p13 = pnand %p2526_p12, %p2820_p9 }
  0x43   : > { %p2529_p0 = pneg %p2528_p13 }
  0x45   : > { %p2534_p3 = pnand %p2532_p2, %p2529_p0 }
  0x47   : > { %2537 = shalt.err (!%p2534_p3)
}
  0x48   : > { %s2538_s11 = scalar_lea.vmem %s273_s16, 1024  ;;  %p2546_p1 = scmp.lt.s32.totalorder %s273_s16, %s273_s16 }
  0x49   : > { %p2539_p6 = scmp.ne.s32.totalorder %s273_s16, %s2538_s11  ;;  %p2547_p11 = scmp.lt.s32.totalorder %s2538_s11, %s2538_s11 }
  0x4b   : > { %p2541_p8 = pnand %p2539_p6, %p2820_p9  ;;  %p2548_p4 = por %p2547_p11, %p2546_p1 }
  0x4d   : > { %p2542_p10 = pneg %p2541_p8 }
  0x4f   : > { %p2549_p5 = pnand %p2548_p4, %p2542_p10 }
  0x51   : > { %2552 = shalt.err (!%p2549_p5)
}
  0x52   : > { %s2705_s14 = smov 64   ;;  %s2706_s13 = smov 4  }
  0x53   : > { %2209 = dma.hbm_to_vmem [thread:$0]  (!%p2804_p7), %s3471_s4, 1024, %s273_s16, [#allocation12], %s2705_s14, %s2705_s14, %s2706_s13  }
  0x54   : > { %s34_s29 = sadd.s32 1, %s2694_s27  ;;  %p2679_p12 = scmp.ne.s32.totalorder %s2686_s25, 0 }
  0x55   : > { %p35_p9 = scmp.ge.s32.totalorder %s34_s29, 2  ;;  %p58_p4 = scmp.eq.s32.totalorder %s2698_s28, 0 }
  0x56   : > { %p2217_p5 = scmp.lt.s32.totalorder %s2698_s28, 2  ;;  %s2707_s17 = smov [#allocation5]  }
  0x57   : > { %s3497_s29 = smov (%p35_p9, %s34_s29), 0  ;;  %p59_p13 = por %p2679_p12, %p58_p4 }
  0x58   : > { %s303_s18 = sshll.u32 %s2707_s17, 4  ;;  %s2553_s16 = scalar_lea.hbm %s3467_s0, 512  ;;  %s304_s18 = int_to_ptr.vmem [resolvable:$true] %s303_s18 }
  0x59   : > { %p2892_p0 = pnand %p2217_p5, %p59_p13  ;;  %p2554_p7 = scmp.ne.s32.totalorder %s3467_s0, %s2553_s16 }
  0x5a   : > { %p2560_p8 = scmp.lt.u32.totalorder %s2553_s16, %s2553_s16  ;;  %p2562_p10 = scmp.lt.u32.totalorder %s2553_s16, %s3467_s0 }
  0x5b   : > { %s3486_s19 = scalar_select %p2892_p0, 1, 0 }
  0x5c   : > { %p2555_p2 = pneg %p2892_p0  ;;  %p2563_p1 = por %p2562_p10, %p2560_p8 }
  0x5e   : > { %p2556_p3 = pnand %p2555_p2, %p2554_p7 }
  0x60   : > { %p2557_p6 = pneg %p2556_p3 }
  0x62   : > { %p2564_p11 = pnand %p2563_p1, %p2557_p6 }
  0x64   : > { %2567 = shalt.err (!%p2564_p11)
}
  0x65   : > { %s2568_s11 = scalar_lea.vmem %s304_s18, 512  ;;  %s2575_s15 = scalar_lea.vmem %s304_s18, 1024 }
  0x66   : > { %p2569_p9 = scmp.ne.s32.totalorder %s304_s18, %s2568_s11  ;;  %p2576_p5 = scmp.lt.s32.totalorder %s304_s18, %s304_s18 }
  0x67   : > { %p2577_p13 = scmp.lt.s32.totalorder %s2575_s15, %s2568_s11 }
  0x68   : > { %p2571_p12 = pnand %p2569_p9, %p2555_p2 }
  0x69   : > { %p2578_p0 = por %p2577_p13, %p2576_p5 }
  0x6a   : > { %p2572_p4 = pneg %p2571_p12 }
  0x6c   : > { %p2579_p7 = pnand %p2578_p0, %p2572_p4 }
  0x6e   : > { %2582 = shalt.err (!%p2579_p7)
}
  0x6f   : > { %p3487_p3 = scmp.ne.s32.totalorder %s3486_s19, 0  ;;  %p3488_p6 = scmp.ne.s32.totalorder %s3483_s9, 0 }
  0x70   : > { %s317_s12 = sand.u32 (!%p3488_p6), 1, %s2686_s25   ;;  %p3489_p0 = scmp.ne.s32.totalorder (!%p3488_p6), %s3482_s8, 0 }
  0x71   : > { %2213 = dma.hbm_to_vmem [thread:$0]  (!%p3487_p3), %s3467_s0, 512, %s304_s18, [#allocation6], %s2705_s14, %s2705_s14, %s2706_s13  }
  0x72   : > { %315 = sbr.rel (%p3488_p6) target bundleno = 2728 (0xaa8), region = 44  ;;  %s2032_s20 = sshll.u32 (!%p3488_p6), %s317_s12, 5 }
  0x73   : > { %s318_s16 = scalar_lea.sflag (!%p3488_p6), [#allocation6], %s317_s12  ;;  %s2918_s21 = scalar_lea.vmem (!%p3488_p6), [#allocation5], %s2032_s20 }
  0x79   : > { %2660 = dma.done.wait (%p3489_p0), %s318_s16, 512  }
  0x7a   : > { %2662 = vsyncadd (%p3489_p0), %s318_s16, 4294966784  ;;  %p3490_p2 = scmp.ne.s32.totalorder %s3481_s30, 0 }
  0x7c   : > { %2664 = dma.done.wait (%p3490_p2), [#allocation9], 5120  }
  0x7d   : > { %2666 = vsyncadd (%p3490_p2), [#allocation9], 4294962176 }
  0x7e   : > { %2668 = dma.done.wait (%p3490_p2), [#allocation12], 1024  }
  0x7f   : > { %2670 = vsyncadd (%p3490_p2), [#allocation12], 4294966272  ;;  %p2036_p8 = scmp.ne.s32.totalorder %s2690_s26, 0 }
  0x80   : > { %v2708_v0 = vmov (!%p2036_p8), 0.0  }
  0x81   : > { %366 = sbr.rel (%p2036_p8) target bundleno = 136 (0x88), region = 64  ;;  %367 = vst [vmem:[#allocation2] sm:$0xff] (!%p2036_p8), %v2708_v0  ;;  %368 = vst [vmem:[#allocation3] sm:$0xff] (!%p2036_p8), %v2708_v0 }
  0x88 PF: > { %p2037_p10 = scmp.ge.s32.totalorder %s2690_s26, 1 }
  0x89   : > { %v2287_v1 = vld [vmem:[#allocation8 + $0x4] ss:$16 sps:$4 sm:$0xff] (!%p2037_p10)   ;;  %v2289_v2 = vld [vmem:[#allocation8 + $0xc] ss:$16 sps:$4 sm:$0xff] (!%p2037_p10)   ;;  %v2709_v3 = vmov (!%p2037_p10), 0   ;;  %vm471_vm0 = vcmask (!%p2037_p10), 261120   ;;  %v391_v14 = vlaneseq (!%p2037_p10) }
  0x8a   : > { %372 = sbr.rel (%p2037_p10) target bundleno = 389 (0x185), region = 68  ;;  %516 = vmatprep.mubr.bf16.mxu0 (!%p2037_p10), %v2709_v3  ;;  %589 = vmatprep.mubr.bf16.mxu1 (!%p2037_p10), %v2709_v3  ;;  %v2291_v4 = vld [vmem:[#allocation8] ss:$16 sps:$4 sm:$0xff] (!%p2037_p10)   ;;  %v2292_v5 = vld [vmem:[#allocation8 + $0x8] ss:$16 sps:$4 sm:$0xff] (!%p2037_p10)   ;;  %s631_s30 = ssub.s32 (!%p2037_p10), 0, %s2690_s26 }
  0x8b   : > { %484 = vmatprep.subr.bf16.mxu0 (!%p2037_p10), %v2287_v1  ;;  %557 = vmatprep.subr.bf16.mxu1 (!%p2037_p10), %v2289_v2  ;;  %v2293_v6 = vld [vmem:[#allocation8 + $0x24] ss:$16 sps:$4 sm:$0xff] (!%p2037_p10)   ;;  %v2295_v7 = vld [vmem:[#allocation8 + $0x2c] ss:$16 sps:$4 sm:$0xff] (!%p2037_p10)   ;;  %v2297_v8 = vld [vmem:[#allocation8 + $0x20] ss:$16 sps:$4 sm:$0xff] (!%p2037_p10)   ;;  %s2058_s8 = smin.u32 (!%p2037_p10), %s2690_s26, %s631_s30 }
  0x8c   : > { %485 = vmatpush1.bf16.msra.mxu0 (!%p2037_p10), %v2291_v4  ;;  %558 = vmatpush1.bf16.msra.mxu1 (!%p2037_p10), %v2292_v5  ;;  %v2298_v9 = vld [vmem:[#allocation8 + $0x28] ss:$16 sps:$4 sm:$0xff] (!%p2037_p10)   ;;  %v2299_v10 = vld [vmem:[%s2918_s21] sm:$0xff] (!%p2037_p10)   ;;  %v2301_v12 = vld [vmem:[%s2918_s21 + $0x10] sm:$0xff] (!%p2037_p10)   ;;  %s633_s9 = sand.u32 (!%p2037_p10), 1, %s2058_s8   ;;  %p630_p1 = scmp.lt.s32.totalorder (!%p2037_p10), %s2690_s26, 0 }
  0x8d   : > { %486 = vmatprep.subr.bf16.mxu0 (!%p2037_p10), %v2293_v6  ;;  %559 = vmatprep.subr.bf16.mxu1 (!%p2037_p10), %v2295_v7  ;;  %v2300_v11 = vld [vmem:[%s2918_s21 + $0x8] sm:$0xff] (!%p2037_p10)   ;;  %v2302_v13 = vld [vmem:[%s2918_s21 + $0x18] sm:$0xff] (!%p2037_p10)   ;;  %s634_s14 = ssub.s32 (!%p2037_p10), 0, %s633_s9  ;;  %v392_v15 = vshrl.u32 (!%p2037_p10), %v391_v14, 7  ;;  %v389_v18 = vld [vmem:[%s3470_s3] sm:$0xf] (!%p2037_p10) }
  0x8f   : > { %v393_v16 = vsub.s32 (!%p2037_p10), 0, %v392_v15  ;;  %v401_v17 = vsub.s32 (!%p2037_p10), 2, %v392_v15  ;;  %v397_v19 = vsub.s32 (!%p2037_p10), 1, %v392_v15  ;;  %v405_v20 = vsub.s32 (!%p2037_p10), 3, %v392_v15 }
  0x90   : > { %487 = vmatpush1.bf16.msra.mxu0 (!%p2037_p10), %v2297_v8  ;;  %560 = vmatpush1.bf16.msra.mxu1 (!%p2037_p10), %v2298_v9 }
  0x91   : > { %s3499_s14 = smov (!%p630_p1, %s634_s14), %s633_s9  ;;  %v2952_v21 = vrot.slane %v389_v18, %v393_v16  ;;  %v2954_v22 = vrot.slane %v389_v18, %v401_v17  ;;  %v2956_v23 = vrot.slane %v389_v18, %v397_v19  ;;  %v2958_v24 = vrot.slane %v389_v18, %v405_v20 }
  0x92   : > { %p2060_p11 = scmp.lt.s32.totalorder %s3499_s14, 0  ;;  %s640_s13 = sadd.s32 2, %s3499_s14 }
  0x93   : > { %2050 = vmatmul.mubr.msk.bf16.vlgmr.msra.gmra.mrb[0].mxu0 %vm471_vm0, %v2299_v10  ;;  %2054 = vmatmul.mubr.msk.bf16.vlgmr.msra.gmra.mrb[0].mxu1 %vm471_vm0, %v2299_v10 }
  0x94   : > { %526 = vmatprep.mubr.bf16.mxu0 %v2709_v3  ;;  %599 = vmatprep.mubr.bf16.mxu1 %v2709_v3  ;;  %s3501_s13 = smov (!%p2060_p11, %s640_s13), %s3499_s14 }
  0x95   : > { %s2147_s23 = sshll.u32 %s3501_s13, 8 }
  0x96   : > { %s2964_s24 = scalar_lea.vmem [#allocation4], %s2147_s23 }
  0x9b   : > { %2051 = vmatmul.mubr.msk.bf16.gmra.mrb[4].mxu0 %vm471_vm0, %v2300_v11  ;;  %2055 = vmatmul.mubr.msk.bf16.gmra.mrb[4].mxu1 %vm471_vm0, %v2300_v11 }
  0x9c   : > { %536 = vmatprep.mubr.bf16.mxu0 %v2709_v3  ;;  %609 = vmatprep.mubr.bf16.mxu1 %v2709_v3 }
  0xa3   : > { %2052 = vmatmul.mubr.msk.bf16.gmra.mrb[8].mxu0 %vm471_vm0, %v2301_v12  ;;  %2056 = vmatmul.mubr.msk.bf16.gmra.mrb[8].mxu1 %vm471_vm0, %v2301_v12 }
  0xa4   : > { %546 = vmatprep.mubr.bf16.mxu0 %v2709_v3  ;;  %619 = vmatprep.mubr.bf16.mxu1 %v2709_v3 }
  0xab   : > { %2053 = vmatmul.mubr.msk.bf16.gmra.mrb[12].mxu0 %vm471_vm0, %v2302_v13  ;;  %2057 = vmatmul.mubr.msk.bf16.gmra.mrb[12].mxu1 %vm471_vm0, %v2302_v13 }
 0x166   : > { %v518_v25 = vpop.f32.mrb[0].mxu0  ;;  %v591_v26 = vpop.f32.mrb[0].mxu1 }
 0x167   : > { %v519_v27 = vadd.f32 %v518_v25, %v2952_v21  ;;  %v592_v28 = vadd.f32 %v591_v26, %v2954_v22  ;;  %v520_v29 = vpop.f32.mrb[1].mxu0  ;;  %v593_v30 = vpop.f32.mrb[1].mxu1 }
 0x168   : > { %v521_v31 = vadd.f32 %v520_v29, %v2956_v23  ;;  %v594_v32 = vadd.f32 %v593_v30, %v2958_v24  ;;  %v522_v33 = vpop.f32.mrb[2].mxu0  ;;  %v595_v34 = vpop.f32.mrb[2].mxu1 }
 0x169   : > { %645 = vst [vmem:[%s2964_s24] sm:$0xff] %v519_v27  ;;  %647 = vst [vmem:[%s2964_s24 + $0x10] sm:$0xff] %v592_v28  ;;  %v523_v35 = vadd.f32 %v522_v33, %v2952_v21  ;;  %v596_v36 = vadd.f32 %v595_v34, %v2954_v22  ;;  %v524_v37 = vpop.f32.mrb[3].mxu0  ;;  %v597_v38 = vpop.f32.mrb[3].mxu1 }
 0x16a   : > { %646 = vst [vmem:[%s2964_s24 + $0x8] sm:$0xff] %v521_v31  ;;  %648 = vst [vmem:[%s2964_s24 + $0x18] sm:$0xff] %v594_v32  ;;  %v525_v39 = vadd.f32 %v524_v37, %v2956_v23  ;;  %v598_v40 = vadd.f32 %v597_v38, %v2958_v24 }
 0x16b   : > { %649 = vst [vmem:[%s2964_s24 + $0x20] sm:$0xff] %v523_v35  ;;  %651 = vst [vmem:[%s2964_s24 + $0x30] sm:$0xff] %v596_v36 }
 0x16c   : > { %650 = vst [vmem:[%s2964_s24 + $0x28] sm:$0xff] %v525_v39  ;;  %652 = vst [vmem:[%s2964_s24 + $0x38] sm:$0xff] %v598_v40 }
 0x16e   : > { %v528_v41 = vpop.f32.mrb[4].mxu0  ;;  %v601_v42 = vpop.f32.mrb[4].mxu1 }
 0x16f   : > { %v529_v43 = vadd.f32 %v528_v41, %v2952_v21  ;;  %v602_v44 = vadd.f32 %v601_v42, %v2954_v22  ;;  %v530_v45 = vpop.f32.mrb[5].mxu0  ;;  %v603_v46 = vpop.f32.mrb[5].mxu1 }
 0x170   : > { %v531_v47 = vadd.f32 %v530_v45, %v2956_v23  ;;  %v604_v48 = vadd.f32 %v603_v46, %v2958_v24  ;;  %v532_v49 = vpop.f32.mrb[6].mxu0  ;;  %v605_v50 = vpop.f32.mrb[6].mxu1 }
 0x171   : > { %653 = vst [vmem:[%s2964_s24 + $0x40] sm:$0xff] %v529_v43  ;;  %655 = vst [vmem:[%s2964_s24 + $0x50] sm:$0xff] %v602_v44  ;;  %v533_v51 = vadd.f32 %v532_v49, %v2952_v21  ;;  %v606_v52 = vadd.f32 %v605_v50, %v2954_v22  ;;  %v534_v53 = vpop.f32.mrb[7].mxu0  ;;  %v607_v54 = vpop.f32.mrb[7].mxu1 }
 0x172   : > { %654 = vst [vmem:[%s2964_s24 + $0x48] sm:$0xff] %v531_v47  ;;  %656 = vst [vmem:[%s2964_s24 + $0x58] sm:$0xff] %v604_v48  ;;  %v535_v55 = vadd.f32 %v534_v53, %v2956_v23  ;;  %v608_v56 = vadd.f32 %v607_v54, %v2958_v24 }
 0x173   : > { %657 = vst [vmem:[%s2964_s24 + $0x60] sm:$0xff] %v533_v51  ;;  %659 = vst [vmem:[%s2964_s24 + $0x70] sm:$0xff] %v606_v52 }
 0x174   : > { %658 = vst [vmem:[%s2964_s24 + $0x68] sm:$0xff] %v535_v55  ;;  %660 = vst [vmem:[%s2964_s24 + $0x78] sm:$0xff] %v608_v56 }
 0x176   : > { %v538_v57 = vpop.f32.mrb[8].mxu0  ;;  %v611_v58 = vpop.f32.mrb[8].mxu1 }
 0x177   : > { %v539_v59 = vadd.f32 %v538_v57, %v2952_v21  ;;  %v612_v60 = vadd.f32 %v611_v58, %v2954_v22  ;;  %v540_v61 = vpop.f32.mrb[9].mxu0  ;;  %v613_v62 = vpop.f32.mrb[9].mxu1 }
 0x178   : > { %v541_v63 = vadd.f32 %v540_v61, %v2956_v23  ;;  %v614_v0 = vadd.f32 %v613_v62, %v2958_v24  ;;  %v542_v1 = vpop.f32.mrb[10].mxu0  ;;  %v615_v2 = vpop.f32.mrb[10].mxu1 }
 0x179   : > { %661 = vst [vmem:[%s2964_s24 + $0x80] sm:$0xff] %v539_v59  ;;  %663 = vst [vmem:[%s2964_s24 + $0x90] sm:$0xff] %v612_v60  ;;  %v543_v3 = vadd.f32 %v542_v1, %v2952_v21  ;;  %v616_v4 = vadd.f32 %v615_v2, %v2954_v22  ;;  %v544_v5 = vpop.f32.mrb[11].mxu0  ;;  %v617_v6 = vpop.f32.mrb[11].mxu1 }
 0x17a   : > { %662 = vst [vmem:[%s2964_s24 + $0x88] sm:$0xff] %v541_v63  ;;  %664 = vst [vmem:[%s2964_s24 + $0x98] sm:$0xff] %v614_v0  ;;  %v545_v7 = vadd.f32 %v544_v5, %v2956_v23  ;;  %v618_v8 = vadd.f32 %v617_v6, %v2958_v24 }
 0x17b   : > { %665 = vst [vmem:[%s2964_s24 + $0xa0] sm:$0xff] %v543_v3  ;;  %667 = vst [vmem:[%s2964_s24 + $0xb0] sm:$0xff] %v616_v4 }
 0x17c   : > { %666 = vst [vmem:[%s2964_s24 + $0xa8] sm:$0xff] %v545_v7  ;;  %668 = vst [vmem:[%s2964_s24 + $0xb8] sm:$0xff] %v618_v8 }
 0x17e   : > { %v548_v9 = vpop.f32.mrb[12].mxu0  ;;  %v621_v10 = vpop.f32.mrb[12].mxu1 }
 0x17f   : > { %v549_v11 = vadd.f32 %v548_v9, %v2952_v21  ;;  %v622_v12 = vadd.f32 %v621_v10, %v2954_v22  ;;  %v550_v13 = vpop.f32.mrb[13].mxu0  ;;  %v623_v14 = vpop.f32.mrb[13].mxu1 }
 0x180   : > { %v551_v15 = vadd.f32 %v550_v13, %v2956_v23  ;;  %v624_v16 = vadd.f32 %v623_v14, %v2958_v24  ;;  %v552_v17 = vpop.f32.mrb[14].mxu0  ;;  %v625_v18 = vpop.f32.mrb[14].mxu1 }
 0x181   : > { %669 = vst [vmem:[%s2964_s24 + $0xc0] sm:$0xff] %v549_v11  ;;  %671 = vst [vmem:[%s2964_s24 + $0xd0] sm:$0xff] %v622_v12  ;;  %v553_v19 = vadd.f32 %v552_v17, %v2952_v21  ;;  %v626_v20 = vadd.f32 %v625_v18, %v2954_v22  ;;  %v554_v25 = vpop.f32.mrb[15].mxu0  ;;  %v627_v26 = vpop.f32.mrb[15].mxu1 }
 0x182   : > { %670 = vst [vmem:[%s2964_s24 + $0xc8] sm:$0xff] %v551_v15  ;;  %672 = vst [vmem:[%s2964_s24 + $0xd8] sm:$0xff] %v624_v16  ;;  %v555_v27 = vadd.f32 %v554_v25, %v2956_v23  ;;  %v628_v28 = vadd.f32 %v627_v26, %v2958_v24 }
 0x183   : > { %673 = vst [vmem:[%s2964_s24 + $0xe0] sm:$0xff] %v553_v19  ;;  %675 = vst [vmem:[%s2964_s24 + $0xf0] sm:$0xff] %v626_v20 }
 0x184   : > { %674 = vst [vmem:[%s2964_s24 + $0xe8] sm:$0xff] %v555_v27  ;;  %676 = vst [vmem:[%s2964_s24 + $0xf8] sm:$0xff] %v628_v28 }
 0x185 PF: > { %p2063_p9 = scmp.le.s32.totalorder %s2690_s26, 0 }
 0x186   : > { %v3027_v29 = vld [vmem:[#allocation10 + $0x4] ss:$16 sps:$4 sm:$0xff] (!%p2063_p9)   ;;  %v3029_v21 = vld [vmem:[#allocation10] ss:$16 sps:$4 sm:$0xff] (!%p2063_p9)   ;;  %v2710_v22 = vmov (!%p2063_p9), 0   ;;  %s2064_s10 = sadd.s32 (!%p2063_p9), 4294967295, %s2690_s26 }
 0x187   : > { %680 = sbr.rel (%p2063_p9) target bundleno = 2431 (0x97f), region = 72  ;;  %928 = vmatprep.mubr.bf16.mxu0 (!%p2063_p9), %v2710_v22  ;;  %969 = vmatprep.mubr.bf16.mxu1 (!%p2063_p9), %v2710_v22  ;;  %v3034_v23 = vld [vmem:[#allocation10 + $0x24] ss:$16 sps:$4 sm:$0xff] (!%p2063_p9)   ;;  %v3037_v24 = vld [vmem:[#allocation10 + $0xc] ss:$16 sps:$4 sm:$0xff] (!%p2063_p9)   ;;  %s683_s11 = ssub.s32 (!%p2063_p9), 0, %s2064_s10 }
 0x188   : > { %896 = vmatprep.subr.bf16.mxu0 (!%p2063_p9), %v3027_v29  ;;  %v3039_v30 = vld [vmem:[#allocation10 + $0x20] ss:$16 sps:$4 sm:$0xff] (!%p2063_p9)   ;;  %v3041_v31 = vld [vmem:[#allocation10 + $0x8] ss:$16 sps:$4 sm:$0xff] (!%p2063_p9)   ;;  %v3044_v32 = vld [vmem:[#allocation10 + $0x44] ss:$16 sps:$4 sm:$0xff] (!%p2063_p9)   ;;  %937 = vmatprep.subr.bf16.mxu1 (!%p2063_p9), %v3037_v24  ;;  %s2065_s15 = smin.u32 (!%p2063_p9), %s2064_s10, %s683_s11 }
 0x189   : > { %897 = vmatpush1.bf16.msra.mxu0 (!%p2063_p9), %v3029_v21  ;;  %v3047_v33 = vld [vmem:[#allocation10 + $0x2c] ss:$16 sps:$4 sm:$0xff] (!%p2063_p9)   ;;  %938 = vmatpush1.bf16.msra.mxu1 (!%p2063_p9), %v3041_v31  ;;  %v3050_v34 = vld [vmem:[#allocation10 + $0x28] ss:$16 sps:$4 sm:$0xff] (!%p2063_p9)   ;;  %v3054_v35 = vld [vmem:[#allocation10 + $0x40] ss:$16 sps:$4 sm:$0xff] (!%p2063_p9)  }
 0x18a   : > { %898 = vmatprep.subr.bf16.mxu0 (!%p2063_p9), %v3034_v23  ;;  %939 = vmatprep.subr.bf16.mxu1 (!%p2063_p9), %v3047_v33  ;;  %v3057_v36 = vld [vmem:[#allocation10 + $0x64] ss:$16 sps:$4 sm:$0xff] (!%p2063_p9)   ;;  %v3059_v37 = vld [vmem:[#allocation10 + $0x4c] ss:$16 sps:$4 sm:$0xff] (!%p2063_p9)   ;;  %v3062_v38 = vld [vmem:[#allocation10 + $0x48] ss:$16 sps:$4 sm:$0xff] (!%p2063_p9)  }
 0x18b   : > { %v3066_v39 = vld [vmem:[#allocation10 + $0x60] ss:$16 sps:$4 sm:$0xff] (!%p2063_p9)   ;;  %v3068_v40 = vld [vmem:[#allocation10 + $0x6c] ss:$16 sps:$4 sm:$0xff] (!%p2063_p9)   ;;  %v3071_v41 = vld [vmem:[#allocation10 + $0x84] ss:$16 sps:$4 sm:$0xff] (!%p2063_p9)  }
 0x18c   : > { %v3074_v42 = vld [vmem:[#allocation10 + $0x80] ss:$16 sps:$4 sm:$0xff] (!%p2063_p9)   ;;  %v3076_v43 = vld [vmem:[#allocation10 + $0x68] ss:$16 sps:$4 sm:$0xff] (!%p2063_p9)   ;;  %v3080_v44 = vld [vmem:[#allocation10 + $0x8c] ss:$16 sps:$4 sm:$0xff] (!%p2063_p9)  }
 0x18d   : > { %899 = vmatpush1.bf16.msra.mxu0 (!%p2063_p9), %v3039_v30  ;;  %940 = vmatpush1.bf16.msra.mxu1 (!%p2063_p9), %v3050_v34  ;;  %v3083_v45 = vld [vmem:[#allocation10 + $0xa4] ss:$16 sps:$4 sm:$0xff] (!%p2063_p9)   ;;  %v3086_v46 = vld [vmem:[#allocation10 + $0x88] ss:$16 sps:$4 sm:$0xff] (!%p2063_p9)   ;;  %v3090_v47 = vld [vmem:[#allocation10 + $0xa0] ss:$16 sps:$4 sm:$0xff] (!%p2063_p9)  }
 0x18e   : > { %900 = vmatprep.subr.bf16.mxu0 %v3044_v32  ;;  %941 = vmatprep.subr.bf16.mxu1 %v3059_v37  ;;  %v3092_v48 = vld [vmem:[#allocation10 + $0xac] ss:$16 sps:$4 sm:$0xff]   ;;  %v3095_v49 = vld [vmem:[#allocation10 + $0xc4] ss:$16 sps:$4 sm:$0xff]   ;;  %v3098_v50 = vld [vmem:[#allocation10 + $0xa8] ss:$16 sps:$4 sm:$0xff]  }
 0x18f   : > { %v3102_v51 = vld [vmem:[#allocation10 + $0xc0] ss:$16 sps:$4 sm:$0xff]   ;;  %v3104_v52 = vld [vmem:[#allocation10 + $0xcc] ss:$16 sps:$4 sm:$0xff]   ;;  %v3107_v53 = vld [vmem:[#allocation10 + $0xe4] ss:$16 sps:$4 sm:$0xff]  }
 0x190   : > { %v3110_v54 = vld [vmem:[#allocation10 + $0xc8] ss:$16 sps:$4 sm:$0xff]   ;;  %v3114_v55 = vld [vmem:[#allocation10 + $0xe0] ss:$16 sps:$4 sm:$0xff]   ;;  %v3116_v57 = vld [vmem:[#allocation10 + $0xec] ss:$16 sps:$4 sm:$0xff]  }
 0x191   : > { %901 = vmatpush1.bf16.msra.mxu0 %v3054_v35  ;;  %942 = vmatpush1.bf16.msra.mxu1 %v3062_v38  ;;  %v726_v56 = vld [vmem:[#allocation2] sm:$0xff]  ;;  %v3120_v59 = vld [vmem:[#allocation10 + $0xe8] ss:$16 sps:$4 sm:$0xff]   ;;  %s685_s22 = sand.u32 1, %s2065_s15   ;;  %p682_p12 = scmp.lt.s32.totalorder %s2064_s10, 0 }
 0x192   : > { %902 = vmatprep.subr.bf16.mxu0 %v3057_v36  ;;  %943 = vmatprep.subr.bf16.mxu1 %v3068_v40  ;;  %v735_v58 = vpack.c.bf16 %v726_v56, %v726_v56  ;;  %s686_s17 = ssub.s32 0, %s685_s22  ;;  %v727_v25 = vld [vmem:[#allocation3] sm:$0xff] }
 0x193   : > { %s3503_s17 = smov (!%p682_p12, %s686_s17), %s685_s22 }
 0x194   : > { %p2067_p4 = scmp.lt.s32.totalorder %s3503_s17, 0  ;;  %s692_s12 = sadd.s32 2, %s3503_s17 }
 0x195   : > { %903 = vmatpush1.bf16.msra.mxu0 %v3066_v39  ;;  %944 = vmatpush1.bf16.msra.mxu1 %v3076_v43 }
 0x196   : > { %904 = vmatprep.subr.bf16.mxu0 %v3071_v41  ;;  %945 = vmatprep.subr.bf16.mxu1 %v3080_v44  ;;  %s3505_s12 = smov (!%p2067_p4, %s692_s12), %s3503_s17 }
 0x197   : > { %s2148_s20 = sshll.u32 %s3505_s12, 8 }
 0x198   : > { %s3162_s16 = scalar_lea.vmem [#allocation4], %s2148_s20 }
 0x199   : > { %905 = vmatpush1.bf16.msra.mxu0 %v3074_v42  ;;  %946 = vmatpush1.bf16.msra.mxu1 %v3086_v46  ;;  %v731_v60 = vld [vmem:[%s3162_s16] sm:$0xff]  ;;  %v732_v61 = vld [vmem:[%s3162_s16 + $0x8] sm:$0xff]  ;;  %v733_v1 = vld [vmem:[%s3162_s16 + $0x10] sm:$0xff] }
 0x19a   : > { %906 = vmatprep.subr.bf16.mxu0 %v3083_v45  ;;  %947 = vmatprep.subr.bf16.mxu1 %v3092_v48  ;;  %v734_v11 = vld [vmem:[%s3162_s16 + $0x18] sm:$0xff] }
 0x19d   : > { %907 = vmatpush1.bf16.msra.mxu0 %v3090_v47  ;;  %948 = vmatpush1.bf16.msra.mxu1 %v3098_v50 }
 0x19e   : > { %908 = vmatprep.subr.bf16.mxu0 %v3095_v49  ;;  %949 = vmatprep.subr.bf16.mxu1 %v3104_v52 }
 0x1a1   : > { %909 = vmatpush1.bf16.msra.mxu0 %v3102_v51  ;;  %950 = vmatpush1.bf16.msra.mxu1 %v3110_v54 }
 0x1a2   : > { %910 = vmatprep.subr.bf16.mxu0 %v3107_v53  ;;  %951 = vmatprep.subr.bf16.mxu1 %v3116_v57 }
 0x1a5   : > { %911 = vmatpush1.bf16.msra.mxu0 %v3114_v55  ;;  %952 = vmatpush1.bf16.msra.mxu1 %v3120_v59 }
 0x1a6   : > { %1006 = vmatprep.subr.bf16.mxu0 %v3027_v29  ;;  %1047 = vmatprep.subr.bf16.mxu1 %v3037_v24 }
 0x1a8   : > { %929 = vmatmul.mubr.bf16.vlgmr.msra.gmra.mrb[0].mxu0 %v735_v58  ;;  %970 = vmatmul.mubr.bf16.vlgmr.msra.gmra.mrb[0].mxu1 %v735_v58 }
 0x1a9   : > { %1007 = vmatpush1.bf16.msra.mxu0 %v3029_v21  ;;  %1038 = vmatprep.mubr.bf16.mxu0 %v2710_v22 }
 0x1aa   : > { %1008 = vmatprep.subr.bf16.mxu0 %v3034_v23  ;;  %1048 = vmatpush1.bf16.msra.mxu1 %v3041_v31 }
 0x1ab   : > { %1079 = vmatprep.mubr.bf16.mxu1 %v2710_v22  ;;  %1049 = vmatprep.subr.bf16.mxu1 %v3047_v33 }
 0x1ad   : > { %1009 = vmatpush1.bf16.msra.mxu0 %v3039_v30 }
 0x1ae   : > { %1010 = vmatprep.subr.bf16.mxu0 %v3044_v32  ;;  %1050 = vmatpush1.bf16.msra.mxu1 %v3050_v34 }
 0x1af   : > { %1051 = vmatprep.subr.bf16.mxu1 %v3059_v37 }
 0x1b1   : > { %1011 = vmatpush1.bf16.msra.mxu0 %v3054_v35 }
 0x1b2   : > { %1012 = vmatprep.subr.bf16.mxu0 %v3057_v36  ;;  %1052 = vmatpush1.bf16.msra.mxu1 %v3062_v38 }
 0x1b3   : > { %1053 = vmatprep.subr.bf16.mxu1 %v3068_v40 }
 0x1b5   : > { %1013 = vmatpush1.bf16.msra.mxu0 %v3066_v39 }
 0x1b6   : > { %1014 = vmatprep.subr.bf16.mxu0 %v3071_v41  ;;  %1054 = vmatpush1.bf16.msra.mxu1 %v3076_v43 }
 0x1b7   : > { %1055 = vmatprep.subr.bf16.mxu1 %v3080_v44 }
 0x1b9   : > { %1015 = vmatpush1.bf16.msra.mxu0 %v3074_v42 }
 0x1ba   : > { %1016 = vmatprep.subr.bf16.mxu0 %v3083_v45  ;;  %1056 = vmatpush1.bf16.msra.mxu1 %v3086_v46 }
 0x1bb   : > { %1057 = vmatprep.subr.bf16.mxu1 %v3092_v48 }
 0x1bd   : > { %1017 = vmatpush1.bf16.msra.mxu0 %v3090_v47 }
 0x1be   : > { %1018 = vmatprep.subr.bf16.mxu0 %v3095_v49  ;;  %1058 = vmatpush1.bf16.msra.mxu1 %v3098_v50 }
 0x1bf   : > { %1059 = vmatprep.subr.bf16.mxu1 %v3104_v52 }
 0x1c1   : > { %1019 = vmatpush1.bf16.msra.mxu0 %v3102_v51 }
 0x1c2   : > { %1020 = vmatprep.subr.bf16.mxu0 %v3107_v53  ;;  %1060 = vmatpush1.bf16.msra.mxu1 %v3110_v54 }
 0x1c3   : > { %1061 = vmatprep.subr.bf16.mxu1 %v3116_v57 }
 0x1c5   : > { %1021 = vmatpush1.bf16.msra.mxu0 %v3114_v55 }
 0x1c6   : > { %1116 = vmatprep.subr.bf16.mxu0 %v3027_v29  ;;  %1062 = vmatpush1.bf16.msra.mxu1 %v3120_v59 }
 0x1c7   : > { %1157 = vmatprep.subr.bf16.mxu1 %v3037_v24 }
 0x27b   : > { %v930_v62 = vpop.f32.mrb[0].mxu0  ;;  %v971_v6 = vpop.f32.mrb[0].mxu1 }
 0x27c   : > { %v978_v63 = vadd.f32 %v930_v62, %v731_v60  ;;  %v932_v0 = vpop.f32.mrb[1].mxu0  ;;  %v980_v8 = vadd.f32 %v971_v6, %v733_v1  ;;  %v973_v9 = vpop.f32.mrb[1].mxu1  ;;  %v2102_v1 = vld [vmem:[%s3162_s16 + $0x20] sm:$0xff] }
 0x27d   : > { %v979_v2 = vadd.f32 %v932_v0, %v732_v61  ;;  %v934_v3 = vpop.f32.mrb[2].mxu0  ;;  %v975_v10 = vpop.f32.mrb[2].mxu1  ;;  %v981_v13 = vadd.f32 %v973_v9, %v734_v11 }
 0x27e   : > { %v982_v4 = vmul.f32 0.5, %v978_v63  ;;  %v935_v5 = vpop.f32.mrb[3].mxu0  ;;  %v976_v12 = vpop.f32.mrb[3].mxu1 }
 0x27f   : > { %v986_v7 = vmul.f32 0.5, %v979_v2  ;;  %v991_v14 = vmul.f32 0.5, %v981_v13  ;;  %v2103_v2 = vld [vmem:[%s3162_s16 + $0x28] sm:$0xff] }
 0x280   : > { %2351 = vtanh.f32 %v982_v4 }
 0x281   : > { %2353 = vtanh.f32 %v986_v7 }
 0x282   : > { %2355 = vtanh.f32 %v980_v8  ;;  %v2104_v8 = vld [vmem:[%s3162_s16 + $0x30] sm:$0xff] }
 0x283   : > { %2357 = vtanh.f32 %v991_v14 }
 0x28a   : > { %v2352_v15 = vpop.eup %2351 }
 0x28b   : > { %v2354_v16 = vpop.eup %2353  ;;  %v984_v17 = vadd.f32 1.0, %v2352_v15 }
 0x28c   : > { %v2356_v18 = vpop.eup %2355  ;;  %v988_v19 = vadd.f32 1.0, %v2354_v16 }
 0x28d   : > { %v985_v20 = vmul.f32 0.5, %v984_v17  ;;  %v2358_v58 = vpop.eup %2357  ;;  %v2105_v17 = vld [vmem:[%s3162_s16 + $0x38] sm:$0xff] }
 0x28e   : > { %v989_v26 = vmul.f32 0.5, %v988_v19  ;;  %v993_v60 = vadd.f32 1.0, %v2358_v58 }
 0x28f   : > { %v996_v27 = vmul.f32 %v2356_v18, %v985_v20 }
 0x290   : > { %v995_v28 = vmul.f32 %v989_v26, %v727_v25  ;;  %v994_v61 = vmul.f32 0.5, %v993_v60 }
 0x292   : > { %v3168_v56 = vadd.f32 %v996_v27, %v995_v28 }
 0x294   : > { %2359 = vtanh.f32 %v3168_v56 }
 0x29e   : > { %v2360_v62 = vpop.eup %2359 }
 0x29f   : > { %v999_v63 = vmul.f32 %v2360_v62, %v994_v61 }
 0x2a1   : > { %v1005_v0 = vpack.c.bf16 %v999_v63, %v999_v63 }
 0x2a3   : > { %1039 = vmatmul.mubr.bf16.vlgmr.msra.gmra.mrb[4].mxu0 %v1005_v0  ;;  %1080 = vmatmul.mubr.bf16.vlgmr.msra.gmra.mrb[4].mxu1 %v1005_v0 }
 0x2a4   : > { %1117 = vmatpush1.bf16.msra.mxu0 %v3029_v21  ;;  %1158 = vmatpush1.bf16.msra.mxu1 %v3041_v31 }
 0x2a5   : > { %1118 = vmatprep.subr.bf16.mxu0 %v3034_v23  ;;  %1159 = vmatprep.subr.bf16.mxu1 %v3047_v33 }
 0x2a6   : > { %1148 = vmatprep.mubr.bf16.mxu0 %v2710_v22  ;;  %1189 = vmatprep.mubr.bf16.mxu1 %v2710_v22 }
 0x2a8   : > { %1119 = vmatpush1.bf16.msra.mxu0 %v3039_v30  ;;  %1160 = vmatpush1.bf16.msra.mxu1 %v3050_v34 }
 0x2a9   : > { %1120 = vmatprep.subr.bf16.mxu0 %v3044_v32  ;;  %1161 = vmatprep.subr.bf16.mxu1 %v3059_v37 }
 0x2ac   : > { %1121 = vmatpush1.bf16.msra.mxu0 %v3054_v35  ;;  %1162 = vmatpush1.bf16.msra.mxu1 %v3062_v38 }
 0x2ad   : > { %1122 = vmatprep.subr.bf16.mxu0 %v3057_v36  ;;  %1163 = vmatprep.subr.bf16.mxu1 %v3068_v40 }
 0x2b0   : > { %1123 = vmatpush1.bf16.msra.mxu0 %v3066_v39  ;;  %1164 = vmatpush1.bf16.msra.mxu1 %v3076_v43 }
 0x2b1   : > { %1124 = vmatprep.subr.bf16.mxu0 %v3071_v41  ;;  %1165 = vmatprep.subr.bf16.mxu1 %v3080_v44 }
 0x2b4   : > { %1125 = vmatpush1.bf16.msra.mxu0 %v3074_v42  ;;  %1166 = vmatpush1.bf16.msra.mxu1 %v3086_v46 }
 0x2b5   : > { %1126 = vmatprep.subr.bf16.mxu0 %v3083_v45  ;;  %1167 = vmatprep.subr.bf16.mxu1 %v3092_v48 }
 0x2b8   : > { %1127 = vmatpush1.bf16.msra.mxu0 %v3090_v47  ;;  %1168 = vmatpush1.bf16.msra.mxu1 %v3098_v50 }
 0x2b9   : > { %1128 = vmatprep.subr.bf16.mxu0 %v3095_v49  ;;  %1169 = vmatprep.subr.bf16.mxu1 %v3104_v52 }
 0x2bc   : > { %1129 = vmatpush1.bf16.msra.mxu0 %v3102_v51  ;;  %1170 = vmatpush1.bf16.msra.mxu1 %v3110_v54 }
 0x2bd   : > { %1130 = vmatprep.subr.bf16.mxu0 %v3107_v53  ;;  %1171 = vmatprep.subr.bf16.mxu1 %v3116_v57 }
 0x2c0   : > { %1131 = vmatpush1.bf16.msra.mxu0 %v3114_v55  ;;  %1172 = vmatpush1.bf16.msra.mxu1 %v3120_v59 }
 0x2c1   : > { %1226 = vmatprep.subr.bf16.mxu0 %v3027_v29  ;;  %1267 = vmatprep.subr.bf16.mxu1 %v3037_v24 }
 0x376   : > { %v1040_v3 = vpop.f32.mrb[4].mxu0  ;;  %v1081_v4 = vpop.f32.mrb[4].mxu1 }
 0x377   : > { %v1088_v5 = vadd.f32 %v2102_v1, %v1040_v3  ;;  %v1042_v6 = vpop.f32.mrb[5].mxu0  ;;  %v1083_v7 = vpop.f32.mrb[5].mxu1  ;;  %v1090_v16 = vadd.f32 %v2104_v8, %v1081_v4 }
 0x378   : > { %v1089_v9 = vadd.f32 %v2103_v2, %v1042_v6  ;;  %v1044_v10 = vpop.f32.mrb[6].mxu0  ;;  %v1085_v11 = vpop.f32.mrb[6].mxu1  ;;  %v1091_v18 = vadd.f32 %v2105_v17, %v1083_v7  ;;  %v2107_v6 = vld [vmem:[%s3162_s16 + $0x48] sm:$0xff] }
 0x379   : > { %v1092_v12 = vmul.f32 0.5, %v1088_v5  ;;  %v1045_v13 = vpop.f32.mrb[7].mxu0  ;;  %v1086_v14 = vpop.f32.mrb[7].mxu1 }
 0x37a   : > { %v1096_v15 = vmul.f32 0.5, %v1089_v9  ;;  %v1101_v19 = vmul.f32 0.5, %v1091_v18 }
 0x37b   : > { %2361 = vtanh.f32 %v1092_v12  ;;  %v2108_v12 = vld [vmem:[%s3162_s16 + $0x50] sm:$0xff] }
 0x37c   : > { %2363 = vtanh.f32 %v1096_v15 }
 0x37d   : > { %2365 = vtanh.f32 %v1090_v16 }
 0x37e   : > { %2367 = vtanh.f32 %v1101_v19 }
 0x385   : > { %v2362_v20 = vpop.eup %2361 }
 0x386   : > { %v2364_v25 = vpop.eup %2363  ;;  %v1094_v26 = vadd.f32 1.0, %v2362_v20 }
 0x387   : > { %v1098_v27 = vadd.f32 1.0, %v2364_v25  ;;  %v2366_v58 = vpop.eup %2365  ;;  %v2109_v25 = vld [vmem:[%s3162_s16 + $0x58] sm:$0xff] }
 0x388   : > { %v1095_v28 = vmul.f32 0.5, %v1094_v26  ;;  %v2368_v0 = vpop.eup %2367 }
 0x389   : > { %v1099_v60 = vmul.f32 0.5, %v1098_v27  ;;  %v1103_v1 = vadd.f32 1.0, %v2368_v0 }
 0x38a   : > { %v1106_v61 = vmul.f32 %v2366_v58, %v1095_v28 }
 0x38b   : > { %v1105_v62 = vmul.f32 %v1099_v60, %v3168_v56  ;;  %v1104_v2 = vmul.f32 0.5, %v1103_v1  ;;  %v2106_v56 = vld [vmem:[%s3162_s16 + $0x40] sm:$0xff] }
 0x38d   : > { %v3210_v63 = vadd.f32 %v1106_v61, %v1105_v62 }
 0x38f   : > { %2369 = vtanh.f32 %v3210_v63 }
 0x399   : > { %v2370_v3 = vpop.eup %2369 }
 0x39a   : > { %v1109_v4 = vmul.f32 %v2370_v3, %v1104_v2 }
 0x39c   : > { %v1115_v5 = vpack.c.bf16 %v1109_v4, %v1109_v4 }
 0x39e   : > { %1149 = vmatmul.mubr.bf16.vlgmr.msra.gmra.mrb[8].mxu0 %v1115_v5  ;;  %1190 = vmatmul.mubr.bf16.vlgmr.msra.gmra.mrb[8].mxu1 %v1115_v5 }
 0x39f   : > { %1227 = vmatpush1.bf16.msra.mxu0 %v3029_v21  ;;  %1268 = vmatpush1.bf16.msra.mxu1 %v3041_v31 }
 0x3a0   : > { %1228 = vmatprep.subr.bf16.mxu0 %v3034_v23  ;;  %1269 = vmatprep.subr.bf16.mxu1 %v3047_v33 }
 0x3a1   : > { %1258 = vmatprep.mubr.bf16.mxu0 %v2710_v22  ;;  %1299 = vmatprep.mubr.bf16.mxu1 %v2710_v22 }
 0x3a3   : > { %1229 = vmatpush1.bf16.msra.mxu0 %v3039_v30  ;;  %1270 = vmatpush1.bf16.msra.mxu1 %v3050_v34 }
 0x3a4   : > { %1230 = vmatprep.subr.bf16.mxu0 %v3044_v32  ;;  %1271 = vmatprep.subr.bf16.mxu1 %v3059_v37 }
 0x3a7   : > { %1231 = vmatpush1.bf16.msra.mxu0 %v3054_v35  ;;  %1272 = vmatpush1.bf16.msra.mxu1 %v3062_v38 }
 0x3a8   : > { %1232 = vmatprep.subr.bf16.mxu0 %v3057_v36  ;;  %1273 = vmatprep.subr.bf16.mxu1 %v3068_v40 }
 0x3ab   : > { %1233 = vmatpush1.bf16.msra.mxu0 %v3066_v39  ;;  %1274 = vmatpush1.bf16.msra.mxu1 %v3076_v43 }
 0x3ac   : > { %1234 = vmatprep.subr.bf16.mxu0 %v3071_v41  ;;  %1275 = vmatprep.subr.bf16.mxu1 %v3080_v44 }
 0x3af   : > { %1235 = vmatpush1.bf16.msra.mxu0 %v3074_v42  ;;  %1276 = vmatpush1.bf16.msra.mxu1 %v3086_v46 }
 0x3b0   : > { %1236 = vmatprep.subr.bf16.mxu0 %v3083_v45  ;;  %1277 = vmatprep.subr.bf16.mxu1 %v3092_v48 }
 0x3b3   : > { %1237 = vmatpush1.bf16.msra.mxu0 %v3090_v47  ;;  %1278 = vmatpush1.bf16.msra.mxu1 %v3098_v50 }
 0x3b4   : > { %1238 = vmatprep.subr.bf16.mxu0 %v3095_v49  ;;  %1279 = vmatprep.subr.bf16.mxu1 %v3104_v52 }
 0x3b7   : > { %1239 = vmatpush1.bf16.msra.mxu0 %v3102_v51  ;;  %1280 = vmatpush1.bf16.msra.mxu1 %v3110_v54 }
 0x3b8   : > { %1240 = vmatprep.subr.bf16.mxu0 %v3107_v53  ;;  %1281 = vmatprep.subr.bf16.mxu1 %v3116_v57 }
 0x3bb   : > { %1241 = vmatpush1.bf16.msra.mxu0 %v3114_v55  ;;  %1282 = vmatpush1.bf16.msra.mxu1 %v3120_v59 }
 0x3bc   : > { %1336 = vmatprep.subr.bf16.mxu0 %v3027_v29  ;;  %1377 = vmatprep.subr.bf16.mxu1 %v3037_v24 }
 0x471   : > { %v1150_v7 = vpop.f32.mrb[8].mxu0  ;;  %v1191_v8 = vpop.f32.mrb[8].mxu1 }
 0x472   : > { %v1198_v9 = vadd.f32 %v2106_v56, %v1150_v7  ;;  %v1152_v10 = vpop.f32.mrb[9].mxu0  ;;  %v1193_v11 = vpop.f32.mrb[9].mxu1  ;;  %v1200_v20 = vadd.f32 %v2108_v12, %v1191_v8 }
 0x473   : > { %v1199_v13 = vadd.f32 %v2107_v6, %v1152_v10  ;;  %v1154_v14 = vpop.f32.mrb[10].mxu0  ;;  %v1195_v15 = vpop.f32.mrb[10].mxu1  ;;  %v1201_v26 = vadd.f32 %v2109_v25, %v1193_v11  ;;  %v2111_v10 = vld [vmem:[%s3162_s16 + $0x68] sm:$0xff] }
 0x474   : > { %v1202_v16 = vmul.f32 0.5, %v1198_v9  ;;  %v1155_v17 = vpop.f32.mrb[11].mxu0  ;;  %v1196_v18 = vpop.f32.mrb[11].mxu1 }
 0x475   : > { %v1206_v19 = vmul.f32 0.5, %v1199_v13  ;;  %v1211_v27 = vmul.f32 0.5, %v1201_v26 }
 0x476   : > { %2371 = vtanh.f32 %v1202_v16  ;;  %v2112_v16 = vld [vmem:[%s3162_s16 + $0x70] sm:$0xff] }
 0x477   : > { %2373 = vtanh.f32 %v1206_v19 }
 0x478   : > { %2375 = vtanh.f32 %v1200_v20 }
 0x479   : > { %2377 = vtanh.f32 %v1211_v27 }
 0x480   : > { %v2372_v28 = vpop.eup %2371 }
 0x481   : > { %v2374_v58 = vpop.eup %2373  ;;  %v1204_v60 = vadd.f32 1.0, %v2372_v28 }
 0x482   : > { %v1208_v61 = vadd.f32 1.0, %v2374_v58  ;;  %v2376_v0 = vpop.eup %2375  ;;  %v2113_v58 = vld [vmem:[%s3162_s16 + $0x78] sm:$0xff] }
 0x483   : > { %v1205_v62 = vmul.f32 0.5, %v1204_v60  ;;  %v2378_v5 = vpop.eup %2377 }
 0x484   : > { %v1209_v1 = vmul.f32 0.5, %v1208_v61  ;;  %v1213_v56 = vadd.f32 1.0, %v2378_v5 }
 0x485   : > { %v1216_v2 = vmul.f32 %v2376_v0, %v1205_v62 }
 0x486   : > { %v1215_v3 = vmul.f32 %v1209_v1, %v3210_v63  ;;  %v1214_v6 = vmul.f32 0.5, %v1213_v56  ;;  %v2110_v63 = vld [vmem:[%s3162_s16 + $0x60] sm:$0xff] }
 0x488   : > { %v3252_v4 = vadd.f32 %v1216_v2, %v1215_v3 }
 0x48a   : > { %2379 = vtanh.f32 %v3252_v4 }
 0x494   : > { %v2380_v7 = vpop.eup %2379 }
 0x495   : > { %v1219_v8 = vmul.f32 %v2380_v7, %v1214_v6 }
 0x497   : > { %v1225_v9 = vpack.c.bf16 %v1219_v8, %v1219_v8 }
 0x499   : > { %1259 = vmatmul.mubr.bf16.vlgmr.msra.gmra.mrb[12].mxu0 %v1225_v9  ;;  %1300 = vmatmul.mubr.bf16.vlgmr.msra.gmra.mrb[12].mxu1 %v1225_v9 }
 0x49a   : > { %1337 = vmatpush1.bf16.msra.mxu0 %v3029_v21  ;;  %1378 = vmatpush1.bf16.msra.mxu1 %v3041_v31 }
 0x49b   : > { %1338 = vmatprep.subr.bf16.mxu0 %v3034_v23  ;;  %1379 = vmatprep.subr.bf16.mxu1 %v3047_v33 }
 0x49c   : > { %1368 = vmatprep.mubr.bf16.mxu0 %v2710_v22  ;;  %1409 = vmatprep.mubr.bf16.mxu1 %v2710_v22 }
 0x49e   : > { %1339 = vmatpush1.bf16.msra.mxu0 %v3039_v30  ;;  %1380 = vmatpush1.bf16.msra.mxu1 %v3050_v34 }
 0x49f   : > { %1340 = vmatprep.subr.bf16.mxu0 %v3044_v32  ;;  %1381 = vmatprep.subr.bf16.mxu1 %v3059_v37 }
 0x4a2   : > { %1341 = vmatpush1.bf16.msra.mxu0 %v3054_v35  ;;  %1382 = vmatpush1.bf16.msra.mxu1 %v3062_v38 }
 0x4a3   : > { %1342 = vmatprep.subr.bf16.mxu0 %v3057_v36  ;;  %1383 = vmatprep.subr.bf16.mxu1 %v3068_v40 }
 0x4a6   : > { %1343 = vmatpush1.bf16.msra.mxu0 %v3066_v39  ;;  %1384 = vmatpush1.bf16.msra.mxu1 %v3076_v43 }
 0x4a7   : > { %1344 = vmatprep.subr.bf16.mxu0 %v3071_v41  ;;  %1385 = vmatprep.subr.bf16.mxu1 %v3080_v44 }
 0x4aa   : > { %1345 = vmatpush1.bf16.msra.mxu0 %v3074_v42  ;;  %1386 = vmatpush1.bf16.msra.mxu1 %v3086_v46 }
 0x4ab   : > { %1346 = vmatprep.subr.bf16.mxu0 %v3083_v45  ;;  %1387 = vmatprep.subr.bf16.mxu1 %v3092_v48 }
 0x4ae   : > { %1347 = vmatpush1.bf16.msra.mxu0 %v3090_v47  ;;  %1388 = vmatpush1.bf16.msra.mxu1 %v3098_v50 }
 0x4af   : > { %1348 = vmatprep.subr.bf16.mxu0 %v3095_v49  ;;  %1389 = vmatprep.subr.bf16.mxu1 %v3104_v52 }
 0x4b2   : > { %1349 = vmatpush1.bf16.msra.mxu0 %v3102_v51  ;;  %1390 = vmatpush1.bf16.msra.mxu1 %v3110_v54 }
 0x4b3   : > { %1350 = vmatprep.subr.bf16.mxu0 %v3107_v53  ;;  %1391 = vmatprep.subr.bf16.mxu1 %v3116_v57 }
 0x4b6   : > { %1351 = vmatpush1.bf16.msra.mxu0 %v3114_v55  ;;  %1392 = vmatpush1.bf16.msra.mxu1 %v3120_v59 }
 0x4b7   : > { %1446 = vmatprep.subr.bf16.mxu0 %v3027_v29  ;;  %1487 = vmatprep.subr.bf16.mxu1 %v3037_v24 }
 0x56c   : > { %v1260_v11 = vpop.f32.mrb[12].mxu0  ;;  %v1301_v12 = vpop.f32.mrb[12].mxu1 }
 0x56d   : > { %v1308_v13 = vadd.f32 %v2110_v63, %v1260_v11  ;;  %v1262_v14 = vpop.f32.mrb[13].mxu0  ;;  %v1303_v15 = vpop.f32.mrb[13].mxu1  ;;  %v1310_v28 = vadd.f32 %v2112_v16, %v1301_v12 }
 0x56e   : > { %v1309_v17 = vadd.f32 %v2111_v10, %v1262_v14  ;;  %v1264_v18 = vpop.f32.mrb[14].mxu0  ;;  %v1305_v19 = vpop.f32.mrb[14].mxu1  ;;  %v1311_v60 = vadd.f32 %v2113_v58, %v1303_v15  ;;  %v2115_v14 = vld [vmem:[%s3162_s16 + $0x88] sm:$0xff] }
 0x56f   : > { %v1312_v20 = vmul.f32 0.5, %v1308_v13  ;;  %v1265_v25 = vpop.f32.mrb[15].mxu0  ;;  %v1306_v26 = vpop.f32.mrb[15].mxu1 }
 0x570   : > { %v1316_v27 = vmul.f32 0.5, %v1309_v17  ;;  %v1321_v61 = vmul.f32 0.5, %v1311_v60 }
 0x571   : > { %2381 = vtanh.f32 %v1312_v20  ;;  %v2116_v20 = vld [vmem:[%s3162_s16 + $0x90] sm:$0xff] }
 0x572   : > { %2383 = vtanh.f32 %v1316_v27 }
 0x573   : > { %2385 = vtanh.f32 %v1310_v28 }
 0x574   : > { %2387 = vtanh.f32 %v1321_v61 }
 0x57b   : > { %v2382_v62 = vpop.eup %2381 }
 0x57c   : > { %v2384_v0 = vpop.eup %2383  ;;  %v1314_v1 = vadd.f32 1.0, %v2382_v62 }
 0x57d   : > { %v1318_v2 = vadd.f32 1.0, %v2384_v0  ;;  %v2386_v5 = vpop.eup %2385 }
 0x57e   : > { %v1315_v3 = vmul.f32 0.5, %v1314_v1  ;;  %v2388_v9 = vpop.eup %2387 }
 0x57f   : > { %v1319_v56 = vmul.f32 0.5, %v1318_v2  ;;  %v1323_v63 = vadd.f32 1.0, %v2388_v9 }
 0x580   : > { %v1326_v6 = vmul.f32 %v2386_v5, %v1315_v3 }
 0x581   : > { %v1325_v7 = vmul.f32 %v1319_v56, %v3252_v4  ;;  %v1324_v10 = vmul.f32 0.5, %v1323_v63  ;;  %v2114_v4 = vld [vmem:[%s3162_s16 + $0x80] sm:$0xff] }
 0x583   : > { %v3294_v8 = vadd.f32 %v1326_v6, %v1325_v7 }
 0x585   : > { %2389 = vtanh.f32 %v3294_v8 }
 0x58f   : > { %v2390_v11 = vpop.eup %2389 }
 0x590   : > { %v1329_v12 = vmul.f32 %v2390_v11, %v1324_v10 }
 0x592   : > { %v1335_v13 = vpack.c.bf16 %v1329_v12, %v1329_v12 }
 0x594   : > { %1369 = vmatmul.mubr.bf16.vlgmr.msra.gmra.mrb[16].mxu0 %v1335_v13  ;;  %1410 = vmatmul.mubr.bf16.vlgmr.msra.gmra.mrb[16].mxu1 %v1335_v13 }
 0x595   : > { %1447 = vmatpush1.bf16.msra.mxu0 %v3029_v21  ;;  %1488 = vmatpush1.bf16.msra.mxu1 %v3041_v31 }
 0x596   : > { %1448 = vmatprep.subr.bf16.mxu0 %v3034_v23  ;;  %1489 = vmatprep.subr.bf16.mxu1 %v3047_v33 }
 0x597   : > { %1478 = vmatprep.mubr.bf16.mxu0 %v2710_v22  ;;  %1519 = vmatprep.mubr.bf16.mxu1 %v2710_v22 }
 0x599   : > { %1449 = vmatpush1.bf16.msra.mxu0 %v3039_v30  ;;  %1490 = vmatpush1.bf16.msra.mxu1 %v3050_v34 }
 0x59a   : > { %1450 = vmatprep.subr.bf16.mxu0 %v3044_v32  ;;  %1491 = vmatprep.subr.bf16.mxu1 %v3059_v37 }
 0x59d   : > { %1451 = vmatpush1.bf16.msra.mxu0 %v3054_v35  ;;  %1492 = vmatpush1.bf16.msra.mxu1 %v3062_v38 }
 0x59e   : > { %1452 = vmatprep.subr.bf16.mxu0 %v3057_v36  ;;  %1493 = vmatprep.subr.bf16.mxu1 %v3068_v40 }
 0x5a1   : > { %1453 = vmatpush1.bf16.msra.mxu0 %v3066_v39  ;;  %1494 = vmatpush1.bf16.msra.mxu1 %v3076_v43 }
 0x5a2   : > { %1454 = vmatprep.subr.bf16.mxu0 %v3071_v41  ;;  %1495 = vmatprep.subr.bf16.mxu1 %v3080_v44 }
 0x5a5   : > { %1455 = vmatpush1.bf16.msra.mxu0 %v3074_v42  ;;  %1496 = vmatpush1.bf16.msra.mxu1 %v3086_v46 }
 0x5a6   : > { %1456 = vmatprep.subr.bf16.mxu0 %v3083_v45  ;;  %1497 = vmatprep.subr.bf16.mxu1 %v3092_v48 }
 0x5a9   : > { %1457 = vmatpush1.bf16.msra.mxu0 %v3090_v47  ;;  %1498 = vmatpush1.bf16.msra.mxu1 %v3098_v50 }
 0x5aa   : > { %1458 = vmatprep.subr.bf16.mxu0 %v3095_v49  ;;  %1499 = vmatprep.subr.bf16.mxu1 %v3104_v52 }
 0x5ad   : > { %1459 = vmatpush1.bf16.msra.mxu0 %v3102_v51  ;;  %1500 = vmatpush1.bf16.msra.mxu1 %v3110_v54 }
 0x5ae   : > { %1460 = vmatprep.subr.bf16.mxu0 %v3107_v53  ;;  %1501 = vmatprep.subr.bf16.mxu1 %v3116_v57 }
 0x5b1   : > { %1461 = vmatpush1.bf16.msra.mxu0 %v3114_v55  ;;  %1502 = vmatpush1.bf16.msra.mxu1 %v3120_v59 }
 0x5b2   : > { %1556 = vmatprep.subr.bf16.mxu0 %v3027_v29  ;;  %1597 = vmatprep.subr.bf16.mxu1 %v3037_v24  ;;  %v2117_v24 = vld [vmem:[%s3162_s16 + $0x98] sm:$0xff] }
 0x667   : > { %v1370_v15 = vpop.f32.mrb[16].mxu0  ;;  %v1411_v16 = vpop.f32.mrb[16].mxu1 }
 0x668   : > { %v1418_v17 = vadd.f32 %v2114_v4, %v1370_v15  ;;  %v1372_v18 = vpop.f32.mrb[17].mxu0  ;;  %v1413_v19 = vpop.f32.mrb[17].mxu1  ;;  %v1420_v29 = vadd.f32 %v2116_v20, %v1411_v16 }
 0x669   : > { %v1419_v25 = vadd.f32 %v2115_v14, %v1372_v18  ;;  %v1374_v26 = vpop.f32.mrb[18].mxu0  ;;  %v1415_v27 = vpop.f32.mrb[18].mxu1  ;;  %v1421_v62 = vadd.f32 %v2117_v24, %v1413_v19  ;;  %v2438_v24 = vld [vmem:[#allocation10 + $0x28] ss:$16 sps:$4 sm:$0xff]  }
 0x66a   : > { %v1422_v28 = vmul.f32 0.5, %v1418_v17  ;;  %v1375_v58 = vpop.f32.mrb[19].mxu0  ;;  %v1416_v60 = vpop.f32.mrb[19].mxu1 }
 0x66b   : > { %v1426_v61 = vmul.f32 0.5, %v1419_v25  ;;  %v1431_v0 = vmul.f32 0.5, %v1421_v62  ;;  %v2434_v58 = vld [vmem:[#allocation10 + $0x8] ss:$16 sps:$4 sm:$0xff]   ;;  %v2435_v60 = vld [vmem:[#allocation10 + $0x24] ss:$16 sps:$4 sm:$0xff]  }
 0x66c   : > { %2391 = vtanh.f32 %v1422_v28  ;;  %v2433_v28 = vld [vmem:[#allocation10] ss:$16 sps:$4 sm:$0xff]   ;;  %v2439_v62 = vld [vmem:[#allocation10 + $0x44] ss:$16 sps:$4 sm:$0xff]  }
 0x66d   : > { %2393 = vtanh.f32 %v1426_v61  ;;  %v2436_v61 = vld [vmem:[#allocation10 + $0x2c] ss:$16 sps:$4 sm:$0xff]  }
 0x66e   : > { %2395 = vtanh.f32 %v1420_v29  ;;  %v2437_v29 = vld [vmem:[#allocation10 + $0x20] ss:$16 sps:$4 sm:$0xff]  }
 0x66f   : > { %2397 = vtanh.f32 %v1431_v0  ;;  %v2440_v0 = vld [vmem:[#allocation10 + $0x4c] ss:$16 sps:$4 sm:$0xff]  }
 0x676   : > { %v2392_v1 = vpop.eup %2391 }
 0x677   : > { %v2394_v2 = vpop.eup %2393  ;;  %v1424_v3 = vadd.f32 1.0, %v2392_v1  ;;  %v2441_v1 = vld [vmem:[#allocation10 + $0x40] ss:$16 sps:$4 sm:$0xff]  }
 0x678   : > { %v1428_v5 = vadd.f32 1.0, %v2394_v2  ;;  %v2396_v6 = vpop.eup %2395  ;;  %v2442_v2 = vld [vmem:[#allocation10 + $0x48] ss:$16 sps:$4 sm:$0xff]  }
 0x679   : > { %v1425_v56 = vmul.f32 0.5, %v1424_v3  ;;  %v2398_v11 = vpop.eup %2397  ;;  %v2443_v3 = vld [vmem:[#allocation10 + $0x64] ss:$16 sps:$4 sm:$0xff]  }
 0x67a   : > { %v1429_v7 = vmul.f32 0.5, %v1428_v5  ;;  %v1433_v12 = vadd.f32 1.0, %v2398_v11  ;;  %v2444_v5 = vld [vmem:[#allocation10 + $0x6c] ss:$16 sps:$4 sm:$0xff]  }
 0x67b   : > { %v1436_v9 = vmul.f32 %v2396_v6, %v1425_v56  ;;  %v2445_v56 = vld [vmem:[#allocation10 + $0x60] ss:$16 sps:$4 sm:$0xff]   ;;  %v2446_v6 = vld [vmem:[#allocation10 + $0x68] ss:$16 sps:$4 sm:$0xff]   ;;  %v2452_v11 = vld [vmem:[#allocation10 + $0xac] ss:$16 sps:$4 sm:$0xff]  }
 0x67c   : > { %v1435_v63 = vmul.f32 %v1429_v7, %v3294_v8  ;;  %v1434_v13 = vmul.f32 0.5, %v1433_v12  ;;  %v2448_v7 = vld [vmem:[#allocation10 + $0x8c] ss:$16 sps:$4 sm:$0xff]   ;;  %v2453_v12 = vld [vmem:[#allocation10 + $0xa0] ss:$16 sps:$4 sm:$0xff]  }
 0x67e   : > { %v3336_v10 = vadd.f32 %v1436_v9, %v1435_v63  ;;  %v2449_v9 = vld [vmem:[#allocation10 + $0x80] ss:$16 sps:$4 sm:$0xff]   ;;  %v2450_v63 = vld [vmem:[#allocation10 + $0x88] ss:$16 sps:$4 sm:$0xff]  }
 0x680   : > { %2399 = vtanh.f32 %v3336_v10 }
 0x68a   : > { %v2400_v4 = vpop.eup %2399 }
 0x68b   : > { %v1439_v14 = vmul.f32 %v2400_v4, %v1434_v13  ;;  %v2454_v13 = vld [vmem:[#allocation10 + $0xa8] ss:$16 sps:$4 sm:$0xff]   ;;  %v2455_v4 = vld [vmem:[#allocation10 + $0xc4] ss:$16 sps:$4 sm:$0xff]  }
 0x68d   : > { %v1445_v15 = vpack.c.bf16 %v1439_v14, %v1439_v14  ;;  %v2456_v14 = vld [vmem:[#allocation10 + $0xcc] ss:$16 sps:$4 sm:$0xff]  }
 0x68f   : > { %1479 = vmatmul.mubr.bf16.vlgmr.msra.gmra.mrb[20].mxu0 %v1445_v15  ;;  %1520 = vmatmul.mubr.bf16.vlgmr.msra.gmra.mrb[20].mxu1 %v1445_v15  ;;  %v2457_v15 = vld [vmem:[#allocation10 + $0xc0] ss:$16 sps:$4 sm:$0xff]  }
 0x690   : > { %1557 = vmatpush1.bf16.msra.mxu0 %v3029_v21  ;;  %1598 = vmatpush1.bf16.msra.mxu1 %v3041_v31  ;;  %v2431_v21 = vld [vmem:[#allocation10 + $0x4] ss:$16 sps:$4 sm:$0xff]   ;;  %v2119_v31 = vld [vmem:[%s3162_s16 + $0xa8] sm:$0xff] }
 0x691   : > { %1558 = vmatprep.subr.bf16.mxu0 %v3034_v23  ;;  %1599 = vmatprep.subr.bf16.mxu1 %v3047_v33  ;;  %v2432_v23 = vld [vmem:[#allocation10 + $0xc] ss:$16 sps:$4 sm:$0xff]  }
 0x692   : > { %1588 = vmatprep.mubr.bf16.mxu0 %v2710_v22  ;;  %1629 = vmatprep.mubr.bf16.mxu1 %v2710_v22 }
 0x694   : > { %1559 = vmatpush1.bf16.msra.mxu0 %v3039_v30  ;;  %1600 = vmatpush1.bf16.msra.mxu1 %v3050_v34  ;;  %v2118_v30 = vld [vmem:[%s3162_s16 + $0xa0] sm:$0xff] }
 0x695   : > { %1560 = vmatprep.subr.bf16.mxu0 %v3044_v32  ;;  %1601 = vmatprep.subr.bf16.mxu1 %v3059_v37  ;;  %v2120_v37 = vld [vmem:[%s3162_s16 + $0xb0] sm:$0xff] }
 0x698   : > { %1561 = vmatpush1.bf16.msra.mxu0 %v3054_v35  ;;  %1602 = vmatpush1.bf16.msra.mxu1 %v3062_v38 }
 0x699   : > { %1562 = vmatprep.subr.bf16.mxu0 %v3057_v36  ;;  %1603 = vmatprep.subr.bf16.mxu1 %v3068_v40 }
 0x69c   : > { %1563 = vmatpush1.bf16.msra.mxu0 %v3066_v39  ;;  %1604 = vmatpush1.bf16.msra.mxu1 %v3076_v43 }
 0x69d   : > { %1564 = vmatprep.subr.bf16.mxu0 %v3071_v41  ;;  %1605 = vmatprep.subr.bf16.mxu1 %v3080_v44 }
 0x6a0   : > { %1565 = vmatpush1.bf16.msra.mxu0 %v3074_v42  ;;  %1606 = vmatpush1.bf16.msra.mxu1 %v3086_v46  ;;  %v2121_v46 = vld [vmem:[%s3162_s16 + $0xb8] sm:$0xff] }
 0x6a1   : > { %1566 = vmatprep.subr.bf16.mxu0 %v3083_v45  ;;  %1607 = vmatprep.subr.bf16.mxu1 %v3092_v48 }
 0x6a4   : > { %1567 = vmatpush1.bf16.msra.mxu0 %v3090_v47  ;;  %1608 = vmatpush1.bf16.msra.mxu1 %v3098_v50 }
 0x6a5   : > { %1568 = vmatprep.subr.bf16.mxu0 %v3095_v49  ;;  %1609 = vmatprep.subr.bf16.mxu1 %v3104_v52 }
 0x6a8   : > { %1569 = vmatpush1.bf16.msra.mxu0 %v3102_v51  ;;  %1610 = vmatpush1.bf16.msra.mxu1 %v3110_v54 }
 0x6a9   : > { %1570 = vmatprep.subr.bf16.mxu0 %v3107_v53  ;;  %1611 = vmatprep.subr.bf16.mxu1 %v3116_v57 }
 0x6ac   : > { %1571 = vmatpush1.bf16.msra.mxu0 %v3114_v55  ;;  %1612 = vmatpush1.bf16.msra.mxu1 %v3120_v59 }
 0x6ad   : > { %1666 = vmatprep.subr.bf16.mxu0 %v2431_v21  ;;  %1707 = vmatprep.subr.bf16.mxu1 %v2432_v23  ;;  %v2458_v21 = vld [vmem:[#allocation10 + $0xc8] ss:$16 sps:$4 sm:$0xff]   ;;  %v2459_v23 = vld [vmem:[#allocation10 + $0xe4] ss:$16 sps:$4 sm:$0xff]  }
 0x762   : > { %v1480_v32 = vpop.f32.mrb[20].mxu0  ;;  %v1521_v33 = vpop.f32.mrb[20].mxu1 }
 0x763   : > { %v1528_v34 = vadd.f32 %v2118_v30, %v1480_v32  ;;  %v1482_v35 = vpop.f32.mrb[21].mxu0  ;;  %v1523_v36 = vpop.f32.mrb[21].mxu1  ;;  %v1530_v45 = vadd.f32 %v2120_v37, %v1521_v33  ;;  %v2460_v30 = vld [vmem:[#allocation10 + $0xe0] ss:$16 sps:$4 sm:$0xff]   ;;  %v2123_v32 = vld [vmem:[%s3162_s16 + $0xc8] sm:$0xff] }
 0x764   : > { %v1529_v38 = vadd.f32 %v2119_v31, %v1482_v35  ;;  %v1484_v39 = vpop.f32.mrb[22].mxu0  ;;  %v1525_v40 = vpop.f32.mrb[22].mxu1  ;;  %v1531_v47 = vadd.f32 %v2121_v46, %v1523_v36  ;;  %v2122_v31 = vld [vmem:[%s3162_s16 + $0xc0] sm:$0xff] }
 0x765   : > { %v1532_v41 = vmul.f32 0.5, %v1528_v34  ;;  %v1485_v42 = vpop.f32.mrb[23].mxu0  ;;  %v1526_v43 = vpop.f32.mrb[23].mxu1 }
 0x766   : > { %v1536_v44 = vmul.f32 0.5, %v1529_v38  ;;  %v1541_v48 = vmul.f32 0.5, %v1531_v47  ;;  %v2124_v38 = vld [vmem:[%s3162_s16 + $0xd0] sm:$0xff] }
 0x767   : > { %2401 = vtanh.f32 %v1532_v41 }
 0x768   : > { %2403 = vtanh.f32 %v1536_v44 }
 0x769   : > { %2405 = vtanh.f32 %v1530_v45 }
 0x76a   : > { %2407 = vtanh.f32 %v1541_v48 }
 0x771   : > { %v2402_v49 = vpop.eup %2401 }
 0x772   : > { %v2404_v50 = vpop.eup %2403  ;;  %v1534_v51 = vadd.f32 1.0, %v2402_v49 }
 0x773   : > { %v1538_v52 = vadd.f32 1.0, %v2404_v50  ;;  %v2406_v54 = vpop.eup %2405 }
 0x774   : > { %v1535_v53 = vmul.f32 0.5, %v1534_v51  ;;  %v2408_v18 = vpop.eup %2407 }
 0x775   : > { %v1539_v55 = vmul.f32 0.5, %v1538_v52  ;;  %v1543_v19 = vadd.f32 1.0, %v2408_v18 }
 0x776   : > { %v1546_v8 = vmul.f32 %v2406_v54, %v1535_v53 }
 0x777   : > { %v1545_v16 = vmul.f32 %v1539_v55, %v3336_v10  ;;  %v1544_v20 = vmul.f32 0.5, %v1543_v19  ;;  %v2451_v10 = vld [vmem:[#allocation10 + $0xa4] ss:$16 sps:$4 sm:$0xff]  }
 0x779   : > { %v3376_v17 = vadd.f32 %v1546_v8, %v1545_v16 }
 0x77b   : > { %2409 = vtanh.f32 %v3376_v17 }
 0x785   : > { %v2410_v25 = vpop.eup %2409 }
 0x786   : > { %v1549_v26 = vmul.f32 %v2410_v25, %v1544_v20 }
 0x788   : > { %v1555_v27 = vpack.c.bf16 %v1549_v26, %v1549_v26 }
 0x78a   : > { %1589 = vmatmul.mubr.bf16.vlgmr.msra.gmra.mrb[24].mxu0 %v1555_v27  ;;  %1630 = vmatmul.mubr.bf16.vlgmr.msra.gmra.mrb[24].mxu1 %v1555_v27 }
 0x78b   : > { %1667 = vmatpush1.bf16.msra.mxu0 %v2433_v28  ;;  %1708 = vmatpush1.bf16.msra.mxu1 %v2434_v58  ;;  %v2126_v28 = vld [vmem:[%s3162_s16 + $0xe0] sm:$0xff]  ;;  %v2127_v58 = vld [vmem:[%s3162_s16 + $0xe8] sm:$0xff] }
 0x78c   : > { %1668 = vmatprep.subr.bf16.mxu0 %v2435_v60  ;;  %1709 = vmatprep.subr.bf16.mxu1 %v2436_v61 }
 0x78d   : > { %1698 = vmatprep.mubr.bf16.mxu0 %v2710_v22  ;;  %1739 = vmatprep.mubr.bf16.mxu1 %v2710_v22  ;;  %v2447_v22 = vld [vmem:[#allocation10 + $0x84] ss:$16 sps:$4 sm:$0xff]  }
 0x78f   : > { %1669 = vmatpush1.bf16.msra.mxu0 %v2437_v29  ;;  %1710 = vmatpush1.bf16.msra.mxu1 %v2438_v24 }
 0x790   : > { %1670 = vmatprep.subr.bf16.mxu0 %v2439_v62  ;;  %1711 = vmatprep.subr.bf16.mxu1 %v2440_v0 }
 0x793   : > { %1671 = vmatpush1.bf16.msra.mxu0 %v2441_v1  ;;  %1712 = vmatpush1.bf16.msra.mxu1 %v2442_v2 }
 0x794   : > { %1672 = vmatprep.subr.bf16.mxu0 %v2443_v3  ;;  %1713 = vmatprep.subr.bf16.mxu1 %v2444_v5 }
 0x797   : > { %1673 = vmatpush1.bf16.msra.mxu0 %v2445_v56  ;;  %1714 = vmatpush1.bf16.msra.mxu1 %v2446_v6 }
 0x798   : > { %1674 = vmatprep.subr.bf16.mxu0 %v2447_v22  ;;  %1715 = vmatprep.subr.bf16.mxu1 %v2448_v7  ;;  %v2129_v7 = vld [vmem:[%s3162_s16 + $0xf8] sm:$0xff] }
 0x79b   : > { %1675 = vmatpush1.bf16.msra.mxu0 %v2449_v9  ;;  %1716 = vmatpush1.bf16.msra.mxu1 %v2450_v63 }
 0x79c   : > { %1676 = vmatprep.subr.bf16.mxu0 %v2451_v10  ;;  %1717 = vmatprep.subr.bf16.mxu1 %v2452_v11 }
 0x79f   : > { %1677 = vmatpush1.bf16.msra.mxu0 %v2453_v12  ;;  %1718 = vmatpush1.bf16.msra.mxu1 %v2454_v13 }
 0x7a0   : > { %1678 = vmatprep.subr.bf16.mxu0 %v2455_v4  ;;  %1719 = vmatprep.subr.bf16.mxu1 %v2456_v14 }
 0x7a3   : > { %1679 = vmatpush1.bf16.msra.mxu0 %v2457_v15  ;;  %1720 = vmatpush1.bf16.msra.mxu1 %v2458_v21 }
 0x7a4   : > { %1680 = vmatprep.subr.bf16.mxu0 %v2459_v23  ;;  %1721 = vmatprep.subr.bf16.mxu1 %v3116_v57 }
 0x7a7   : > { %1681 = vmatpush1.bf16.msra.mxu0 %v2460_v30  ;;  %1722 = vmatpush1.bf16.msra.mxu1 %v3120_v59  ;;  %v2125_v59 = vld [vmem:[%s3162_s16 + $0xd8] sm:$0xff] }
 0x85d   : > { %v1590_v33 = vpop.f32.mrb[24].mxu0  ;;  %v1631_v34 = vpop.f32.mrb[24].mxu1 }
 0x85e   : > { %v1638_v35 = vadd.f32 %v2122_v31, %v1590_v33  ;;  %v1592_v36 = vpop.f32.mrb[25].mxu0  ;;  %v1633_v37 = vpop.f32.mrb[25].mxu1  ;;  %v1640_v45 = vadd.f32 %v2124_v38, %v1631_v34 }
 0x85f   : > { %v1639_v39 = vadd.f32 %v2123_v32, %v1592_v36  ;;  %v1594_v40 = vpop.f32.mrb[26].mxu0  ;;  %v1635_v41 = vpop.f32.mrb[26].mxu1  ;;  %v1641_v46 = vadd.f32 %v2125_v59, %v1633_v37 }
 0x860   : > { %v1642_v42 = vmul.f32 0.5, %v1638_v35  ;;  %v1595_v43 = vpop.f32.mrb[27].mxu0  ;;  %v1636_v44 = vpop.f32.mrb[27].mxu1 }
 0x861   : > { %v1646_v57 = vmul.f32 0.5, %v1639_v39  ;;  %v1651_v47 = vmul.f32 0.5, %v1641_v46 }
 0x862   : > { %2411 = vtanh.f32 %v1642_v42 }
 0x863   : > { %2413 = vtanh.f32 %v1646_v57 }
 0x864   : > { %2415 = vtanh.f32 %v1640_v45 }
 0x865   : > { %2417 = vtanh.f32 %v1651_v47 }
 0x86c   : > { %v2412_v48 = vpop.eup %2411 }
 0x86d   : > { %v2414_v49 = vpop.eup %2413  ;;  %v1644_v50 = vadd.f32 1.0, %v2412_v48 }
 0x86e   : > { %v1648_v51 = vadd.f32 1.0, %v2414_v49  ;;  %v2416_v53 = vpop.eup %2415 }
 0x86f   : > { %v1645_v52 = vmul.f32 0.5, %v1644_v50  ;;  %v2418_v18 = vpop.eup %2417 }
 0x870   : > { %v1649_v54 = vmul.f32 0.5, %v1648_v51  ;;  %v1653_v19 = vadd.f32 1.0, %v2418_v18 }
 0x871   : > { %v1656_v55 = vmul.f32 %v2416_v53, %v1645_v52 }
 0x872   : > { %v1655_v8 = vmul.f32 %v1649_v54, %v3376_v17  ;;  %v1654_v20 = vmul.f32 0.5, %v1653_v19  ;;  %v2128_v17 = vld [vmem:[%s3162_s16 + $0xf0] sm:$0xff] }
 0x874   : > { %v1657_v16 = vadd.f32 %v1656_v55, %v1655_v8 }
 0x876   : > { %2419 = vtanh.f32 %v1657_v16 }
 0x880   : > { %v2420_v25 = vpop.eup %2419 }
 0x881   : > { %v1659_v26 = vmul.f32 %v2420_v25, %v1654_v20 }
 0x883   : > { %v1665_v27 = vpack.c.bf16 %v1659_v26, %v1659_v26 }
 0x885   : > { %1699 = vmatmul.mubr.bf16.vlgmr.msra.gmra.mrb[28].mxu0 %v1665_v27  ;;  %1740 = vmatmul.mubr.bf16.vlgmr.msra.gmra.mrb[28].mxu1 %v1665_v27 }
 0x958   : > { %v1700_v60 = vpop.f32.mrb[28].mxu0  ;;  %v1741_v61 = vpop.f32.mrb[28].mxu1 }
 0x959   : > { %v1748_v29 = vadd.f32 %v2126_v28, %v1700_v60  ;;  %v1702_v24 = vpop.f32.mrb[29].mxu0  ;;  %v1743_v62 = vpop.f32.mrb[29].mxu1  ;;  %v1750_v22 = vadd.f32 %v2128_v17, %v1741_v61 }
 0x95a   : > { %v1749_v0 = vadd.f32 %v2127_v58, %v1702_v24  ;;  %v1704_v1 = vpop.f32.mrb[30].mxu0  ;;  %v1745_v2 = vpop.f32.mrb[30].mxu1  ;;  %v1751_v9 = vadd.f32 %v2129_v7, %v1743_v62 }
 0x95b   : > { %v1752_v3 = vmul.f32 0.5, %v1748_v29  ;;  %v1705_v5 = vpop.f32.mrb[31].mxu0  ;;  %v1746_v56 = vpop.f32.mrb[31].mxu1 }
 0x95c   : > { %v1756_v6 = vmul.f32 0.5, %v1749_v0  ;;  %v1761_v63 = vmul.f32 0.5, %v1751_v9 }
 0x95d   : > { %2421 = vtanh.f32 %v1752_v3 }
 0x95e   : > { %2423 = vtanh.f32 %v1756_v6 }
 0x95f   : > { %2425 = vtanh.f32 %v1750_v22 }
 0x960   : > { %2427 = vtanh.f32 %v1761_v63 }
 0x967   : > { %v2422_v10 = vpop.eup %2421 }
 0x968   : > { %v2424_v11 = vpop.eup %2423  ;;  %v1754_v12 = vadd.f32 1.0, %v2422_v10 }
 0x969   : > { %v1758_v13 = vadd.f32 1.0, %v2424_v11  ;;  %v2426_v14 = vpop.eup %2425 }
 0x96a   : > { %v1755_v4 = vmul.f32 0.5, %v1754_v12  ;;  %v2428_v31 = vpop.eup %2427 }
 0x96b   : > { %v1759_v15 = vmul.f32 0.5, %v1758_v13  ;;  %v1763_v32 = vadd.f32 1.0, %v2428_v31 }
 0x96c   : > { %v1766_v21 = vmul.f32 %v2426_v14, %v1755_v4 }
 0x96d   : > { %v1765_v23 = vmul.f32 %v1759_v15, %v1657_v16  ;;  %v1764_v33 = vmul.f32 0.5, %v1763_v32 }
 0x96f   : > { %v1767_v30 = vadd.f32 %v1766_v21, %v1765_v23 }
 0x971   : > { %2429 = vtanh.f32 %v1767_v30  ;;  %1771 = vst [vmem:[#allocation3] sm:$0xff] %v1767_v30 }
 0x97b   : > { %v2430_v34 = vpop.eup %2429 }
 0x97c   : > { %v1769_v35 = vmul.f32 %v2430_v34, %v1764_v33 }
 0x97e   : > { %1770 = vst [vmem:[#allocation2] sm:$0xff] %v1769_v35 }
 0x97f PF: > { %p2130_p5 = scmp.ne.s32.totalorder %s2690_s26, 1 }
 0x980   : > { %v2461_v36 = vld [vmem:[#allocation11] sm:$0xff] (!%p2130_p5)   ;;  %v2711_v37 = vmov (!%p2130_p5), 0.0   ;;  %v2462_v38 = vld [vmem:[#allocation11 + $0x8] sm:$0xff] (!%p2130_p5)   ;;  %vm2712_vm1 = vmmov (!%p2130_p5), 0   ;;  %v2463_v39 = vld [vmem:[#allocation11 + $0x10] sm:$0xff] (!%p2130_p5)  }
 0x981   : > { %1775 = sbr.rel (%p2130_p5) target bundleno = 2680 (0xa78), region = 76  ;;  %2158 = vmatprep.subr.bf16.mxu0 (!%p2130_p5), %v2711_v37  ;;  %2174 = vmatprep.mubr.msk.bf16.mxu0 (!%p2130_p5), %vm2712_vm1, %v2711_v37  ;;  %v2464_v41 = vld [vmem:[#allocation11 + $0x18] sm:$0xff] (!%p2130_p5)   ;;  %v2465_v42 = vld [vmem:[#allocation11 + $0x20] sm:$0xff] (!%p2130_p5)   ;;  %v2466_v43 = vld [vmem:[#allocation11 + $0x28] sm:$0xff] (!%p2130_p5)  }
 0x982   : > { %2159 = vmatpush3.bf16.msra.mxu0 (!%p2130_p5), %v2461_v36  ;;  %v2467_v44 = vld [vmem:[#allocation11 + $0x30] sm:$0xff] (!%p2130_p5)   ;;  %v2468_v57 = vld [vmem:[#allocation11 + $0x38] sm:$0xff] (!%p2130_p5)  }
 0x983   : > { %2160 = vmatprep.subr.bf16.mxu0 (!%p2130_p5), %v2711_v37  ;;  %v2131_v59 = vld [vmem:[%s3472_s5] ss:$0 sm:$0xff] (!%p2130_p5) }
 0x985   : > { %v1776_v40 = vld [vmem:[#allocation2] sm:$0xff] (!%p2130_p5) }
 0x986   : > { %2161 = vmatpush3.bf16.msra.mxu0 (!%p2130_p5), %v2462_v38  ;;  %1777 = vst [vmem:[#allocation14] sm:$0xff] (!%p2130_p5), %v1776_v40  ;;  %v1778_v45 = vpack.c.bf16 (!%p2130_p5), %v1776_v40, %v1776_v40 }
 0x987   : > { %2162 = vmatprep.subr.bf16.mxu0 (!%p2130_p5), %v2711_v37 }
 0x98a   : > { %2163 = vmatpush3.bf16.msra.mxu0 %v2463_v39 }
 0x98b   : > { %2164 = vmatprep.subr.bf16.mxu0 %v2711_v37 }
 0x98e   : > { %2165 = vmatpush3.bf16.msra.mxu0 %v2464_v41 }
 0x98f   : > { %2166 = vmatprep.subr.bf16.mxu0 %v2711_v37 }
 0x992   : > { %2167 = vmatpush3.bf16.msra.mxu0 %v2465_v42 }
 0x993   : > { %2168 = vmatprep.subr.bf16.mxu0 %v2711_v37 }
 0x996   : > { %2169 = vmatpush3.bf16.msra.mxu0 %v2466_v43 }
 0x997   : > { %2170 = vmatprep.subr.bf16.mxu0 %v2711_v37 }
 0x99a   : > { %2171 = vmatpush3.bf16.msra.mxu0 %v2467_v44 }
 0x99b   : > { %2172 = vmatprep.subr.bf16.mxu0 %v2711_v37 }
 0x99e   : > { %2173 = vmatpush3.bf16.msra.mxu0 %v2468_v57 }
 0x9a1   : > { %2175 = vmatmul.mubr.bf16.vlgmr.msra.gmra.mrb[0].mxu0 %v1778_v45 }
 0xa74   : > { %v1884_v46 = vpop.f32.mrb[0].mxu0 }
 0xa75   : > { %v1885_v47 = vadd.f32 %v2131_v59, %v1884_v46  ;;  %v2176_v48 = vpop.f32.mrb[1].mxu0 }
 0xa76   : > { %v1887_v49 = vpop.f32.mrb[2].mxu0 }
 0xa77   : > { %1890 = vst [vmem:[#allocation13] sm:$0xff] %v1885_v47  ;;  %v2177_v50 = vpop.f32.mrb[3].mxu0 }
 0xa78 PF: > { %s3491_s30 = sadd.s32 4294967295, %s2698_s28   ;;  %s2713_s9 = smov [#allocation13]  }
 0xa79   : > { %p3398_p13 = scmp.eq.s32.totalorder %s3491_s30, 1  ;;  %s1900_s14 = sshll.u32 %s2713_s9, 4  ;;  %s1901_s14 = int_to_ptr.vmem [resolvable:$true] %s1900_s14 }
 0xa7a   : > { %s2714_s13 = smov [#allocation14]   ;;  %s2583_s19 = scalar_lea.vmem %s1901_s14, 128 }
 0xa7b   : > { %s1913_s18 = sshll.u32 %s2714_s13, 4  ;;  %p2584_p7 = scmp.ne.s32.totalorder %s1901_s14, %s2583_s19  ;;  %s3402_s18 = int_to_ptr.vmem [resolvable:$true] %s1913_s18 }
 0xa7c   : > { %p2590_p0 = scmp.lt.s32.totalorder %s1901_s14, %s1901_s14  ;;  %p2591_p2 = scmp.lt.s32.totalorder %s2583_s19, %s2583_s19 }
 0xa7d   : > { %p2585_p3 = pnand %p2584_p7, %p3398_p13 }
 0xa7e   : > { %p2592_p8 = por %p2591_p2, %p2590_p0 }
 0xa7f   : > { %p2586_p6 = pneg %p2585_p3 }
 0xa81   : > { %p2593_p10 = pnand %p2592_p8, %p2586_p6 }
 0xa83   : > { %2596 = shalt.err (!%p2593_p10)
}
 0xa84   : > { %s2597_s10 = scalar_lea.hbm %s3473_s6, 128 }
 0xa85   : > { %p2598_p1 = scmp.ne.s32.totalorder %s3473_s6, %s2597_s10  ;;  %p2603_p12 = scmp.lt.u32.totalorder %s2597_s10, %s3473_s6 }
 0xa87   : > { %p2599_p11 = pnand %p2598_p1, %p3398_p13 }
 0xa89   : > { %p2600_p9 = pneg %p2599_p11 }
 0xa8b   : > { %p2605_p4 = pnand %p2603_p12, %p2600_p9 }
 0xa8d   : > { %2608 = shalt.err (!%p2605_p4)
}
 0xa8e   : > { %2193 = dma.vmem_to_hbm [thread:$0]  (%p3398_p13), %s1901_s14, 128, %s3473_s6, [#allocation7]  }
 0xa8f   : > { %s2609_s16 = scalar_lea.vmem %s3402_s18, 128  ;;  %p2616_p6 = scmp.lt.s32.totalorder %s3402_s18, %s3402_s18 }
 0xa90   : > { %p2610_p5 = scmp.ne.s32.totalorder %s3402_s18, %s2609_s16  ;;  %p2617_p0 = scmp.lt.s32.totalorder %s2609_s16, %s2609_s16 }
 0xa92   : > { %p2611_p7 = pnand %p2610_p5, %p3398_p13  ;;  %p2618_p2 = por %p2617_p0, %p2616_p6 }
 0xa94   : > { %p2612_p3 = pneg %p2611_p7 }
 0xa96   : > { %p2619_p8 = pnand %p2618_p2, %p2612_p3 }
 0xa98   : > { %2622 = shalt.err (!%p2619_p8)
}
 0xa99   : > { %s2623_s30 = scalar_lea.hbm %s3474_s7, 128 }
 0xa9a   : > { %p2624_p10 = scmp.ne.s32.totalorder %s3474_s7, %s2623_s30  ;;  %p2629_p9 = scmp.lt.u32.totalorder %s2623_s30, %s3474_s7 }
 0xa9c   : > { %p2625_p1 = pnand %p2624_p10, %p3398_p13 }
 0xa9e   : > { %p2626_p11 = pneg %p2625_p1 }
 0xaa0   : > { %p2631_p12 = pnand %p2629_p9, %p2626_p11 }
 0xaa2   : > { %2634 = shalt.err (!%p2631_p12)
}
 0xaa3   : > { %2195 = dma.vmem_to_hbm [thread:$0]  (%p3398_p13), %s3402_s18, 128, %s3474_s7, [#allocation15]  }
 0xaa4   : > { %2672 = dma.done.wait (%p3398_p13), [#allocation7], 128  }
 0xaa5   : > { %2674 = vsyncadd (%p3398_p13), [#allocation7], 4294967168 }
 0xaa6   : > { %2676 = dma.done.wait (%p3398_p13), [#allocation15], 128  }
 0xaa7   : > { %2678 = vsyncadd (%p3398_p13), [#allocation15], 4294967168 }
 0xaa8 PF: > { %s25_s28 = sadd.s32 1, %s2698_s28   ;;  %s3493_s24 = smov %s2686_s25 }
 0xaa9   : > { %p22_p4 = scmp.ge.s32.totalorder %s25_s28, 4   ;;  %s3457_s25 = smov 0  }
 0xaaa   : > { %s3494_s26 = smov %s2694_s27  ;;  %s3495_s27 = smov %s3497_s29 }
 0xaab   :  { %24 = sbr.rel (!%p22_p4) target bundleno = 8 (0x8), region = 128 }
 0xab2   :  { %1930 = vsyncpa [#allocation6], 1 }
 0xab3   :  { %1932 = vsyncpa [#allocation6 + $0x1], 1 }
 0xab4   :  { %1933 = vsyncpa [#allocation9], 1 }
 0xab5   :  { %1934 = vsyncpa [#allocation12], 1 }
 0xab6   :  { %1935 = vsyncpa [#allocation7], 1 }
 0xab7   :  { %1937 = vsyncpa [#allocation7 + $0x1], 1 }
 0xab8   :  { %1938 = vsyncpa [#allocation15], 1 }

// kernel: tpu_custom_call.1
= control target key start
LH: loop header
LB: loop body
LE: loop exit
PB: predicated region body
PF: predicated region fallthrough
CT: control target
= control target key end

     0   :  { %13 = vsyncpa [#allocation6], 0  ;;  %s3467_s0 = inlined_call_operand.hbm [shape: bf16[8,8,32], index: 0, kind: input, shape index: {}]   ;;  %s3468_s1 = inlined_call_operand.hbm [shape: bf16[32,512], index: 1, kind: input, shape index: {}]   ;;  %s3469_s2 = inlined_call_operand.hbm [shape: bf16[128,512], index: 2, kind: input, shape index: {}]   ;;  %s3470_s3 = inlined_call_operand.vmem [shape: f32[1,512], index: 3, kind: input, shape index: {}]   ;;  %s3471_s4 = inlined_call_operand.hbm [shape: bf16[128,128], index: 4, kind: input, shape index: {}]   ;;  %s3472_s5 = inlined_call_operand.vmem [shape: f32[1,128], index: 5, kind: input, shape index: {}]   ;;  %s3473_s6 = inlined_call_operand.hbm [shape: f32[8,128], index: 6, kind: output, shape index: {0}]   ;;  %s3474_s7 = inlined_call_operand.hbm [shape: f32[8,128], index: 7, kind: output, shape index: {1}]  }
   0x1   :  { %15 = vsyncpa [#allocation6 + $0x1], 0 }
   0x2   :  { %16 = vsyncpa [#allocation9], 0 }
   0x3   :  { %17 = vsyncpa [#allocation12], 0 }
   0x4   :  { %18 = vsyncpa [#allocation7], 0 }
   0x5   :  { %19 = vsyncpa [#allocation15], 0  ;;  %s2755_s24 = smov 0   ;;  %s2757_s25 = smov 0  }
   0x6   :  { %s2759_s26 = smov 0   ;;  %s2761_s27 = smov 0  }
   0x7   :  { %s2763_s28 = smov 0  }
   0x8 LB: > { %s3477_s29 = sadd.s32 4294967295, %s2698_s28   ;;  %p63_p0 = scmp.ne.s32.totalorder %s2686_s25, %s2682_s24  ;;  %s2698_s28 = sphi %s2763_s28, %s25_s28   ;;  %s2694_s27 = sphi %s2761_s27, %s3495_s27   ;;  %s2690_s26 = sphi %s2759_s26, %s3494_s26   ;;  %s2686_s25 = sphi %s2757_s25, %s3457_s25   ;;  %s2682_s24 = sphi %s2755_s24, %s3493_s24  }
   0x9   : > { %p2782_p1 = scmp.eq.s32.totalorder %s3477_s29, 0  ;;  %p2023_p2 = scmp.ge.s32.totalorder %s2698_s28, 1 }
   0xa   : > { %p231_p3 = scmp.lt.s32.totalorder %s2698_s28, 3  ;;  %s2700_s10 = smov [#allocation8]  }
   0xb   : > { %s3481_s30 = scalar_select %p2782_p1, 1, 0 }
   0xc   : > { %p2790_p4 = por %p2782_p1, %p63_p0  ;;  %p2794_p5 = pnand %p2023_p2, %p231_p3 }
   0xd   : > { %s243_s11 = sshll.u32 %s2700_s10, 4  ;;  %s2701_s13 = smov [#allocation10]   ;;  %s2798_s11 = int_to_ptr.vmem [resolvable:$true] %s243_s11 }
   0xe   : > { %s3482_s8 = scalar_select %p2790_p4, 1, 0 }
   0xf   : > { %s3483_s9 = scalar_select %p2794_p5, 1, 0 }
  0x10   : > { %p2200_p6 = pneg %p2794_p5  ;;  %s256_s14 = sshll.u32 %s2701_s13, 4  ;;  %s2808_s14 = int_to_ptr.vmem [resolvable:$true] %s256_s14 }
  0x11   : > { %s2702_s15 = smov [#allocation11]   ;;  %s2469_s19 = scalar_lea.hbm %s3468_s1, 1024 }
  0x12   : > { %p2804_p7 = pnand %p2200_p6, %p2782_p1  ;;  %s2810_s16 = sshll.u32 %s2702_s15, 4  ;;  %s273_s16 = int_to_ptr.vmem [resolvable:$true] %s2810_s16 }
  0x13   : > { %p2470_p8 = scmp.ne.s32.totalorder %s3468_s1, %s2469_s19  ;;  %p2476_p12 = scmp.lt.u32.totalorder %s2469_s19, %s3468_s1 }
  0x14   : > { %p2820_p9 = pneg %p2804_p7 }
  0x16   : > { %p2472_p10 = pnand %p2820_p9, %p2470_p8 }
  0x18   : > { %p2473_p11 = pneg %p2472_p10 }
  0x1a   : > { %p2478_p13 = pnand %p2476_p12, %p2473_p11 }
  0x1c   : > { %2481 = shalt.err (!%p2478_p13)
}
  0x1d   : > { %s2482_s10 = scalar_lea.vmem %s2798_s11, 1024  ;;  %p2490_p6 = scmp.lt.s32.totalorder %s2798_s11, %s2798_s11 }
  0x1e   : > { %p2483_p0 = scmp.ne.s32.totalorder %s2798_s11, %s2482_s10  ;;  %p2491_p1 = scmp.lt.s32.totalorder %s2482_s10, %s2482_s10 }
  0x20   : > { %p2485_p2 = pnand %p2483_p0, %p2820_p9  ;;  %p2492_p8 = por %p2491_p1, %p2490_p6 }
  0x22   : > { %p2486_p3 = pneg %p2485_p2 }
  0x24   : > { %p2493_p10 = pnand %p2492_p8, %p2486_p3 }
  0x26   : > { %2496 = shalt.err (!%p2493_p10)
}
  0x27   : > { %s2703_s13 = smov 256   ;;  %s2704_s15 = smov 16  }
  0x28   : > { %2203 = dma.hbm_to_vmem [thread:$0]  (!%p2804_p7), %s3468_s1, 1024, %s2798_s11, [#allocation9], %s2703_s13, %s2703_s13, %s2704_s15  }
  0x29   : > { %s2497_s21 = scalar_lea.hbm %s3469_s2, 4096 }
  0x2a   : > { %p2498_p1 = scmp.ne.s32.totalorder %s3469_s2, %s2497_s21  ;;  %p2504_p13 = scmp.lt.u32.totalorder %s2497_s21, %s3469_s2 }
  0x2c   : > { %p2500_p11 = pnand %p2498_p1, %p2820_p9 }
  0x2e   : > { %p2501_p12 = pneg %p2500_p11 }
  0x30   : > { %p2506_p0 = pnand %p2504_p13, %p2501_p12 }
  0x32   : > { %2509 = shalt.err (!%p2506_p0)
}
  0x33   : > { %s2510_s11 = scalar_lea.vmem %s2808_s14, 4096  ;;  %p2518_p8 = scmp.lt.s32.totalorder %s2808_s14, %s2808_s14 }
  0x34   : > { %p2511_p2 = scmp.ne.s32.totalorder %s2808_s14, %s2510_s11  ;;  %p2519_p10 = scmp.lt.s32.totalorder %s2510_s11, %s2510_s11 }
  0x36   : > { %p2513_p3 = pnand %p2511_p2, %p2820_p9  ;;  %p2520_p1 = por %p2519_p10, %p2518_p8 }
  0x38   : > { %p2514_p6 = pneg %p2513_p3 }
  0x3a   : > { %p2521_p11 = pnand %p2520_p1, %p2514_p6 }
  0x3c   : > { %2524 = shalt.err (!%p2521_p11)
}
  0x3d   : > { %2206 = dma.hbm_to_vmem [thread:$0]  (!%p2804_p7), %s3469_s2, 4096, %s2808_s14, [#allocation9], %s2703_s13, %s2703_s13, %s2704_s15  }
  0x3e   : > { %s2525_s20 = scalar_lea.hbm %s3471_s4, 1024 }
  0x3f   : > { %p2526_p12 = scmp.ne.s32.totalorder %s3471_s4, %s2525_s20  ;;  %p2532_p2 = scmp.lt.u32.totalorder %s2525_s20, %s3471_s4 }
  0x41   : > { %p2528_p13 = pnand %p2526_p12, %p2820_p9 }
  0x43   : > { %p2529_p0 = pneg %p2528_p13 }
  0x45   : > { %p2534_p3 = pnand %p2532_p2, %p2529_p0 }
  0x47   : > { %2537 = shalt.err (!%p2534_p3)
}
  0x48   : > { %s2538_s11 = scalar_lea.vmem %s273_s16, 1024  ;;  %p2546_p1 = scmp.lt.s32.totalorder %s273_s16, %s273_s16 }
  0x49   : > { %p2539_p6 = scmp.ne.s32.totalorder %s273_s16, %s2538_s11  ;;  %p2547_p11 = scmp.lt.s32.totalorder %s2538_s11, %s2538_s11 }
  0x4b   : > { %p2541_p8 = pnand %p2539_p6, %p2820_p9  ;;  %p2548_p4 = por %p2547_p11, %p2546_p1 }
  0x4d   : > { %p2542_p10 = pneg %p2541_p8 }
  0x4f   : > { %p2549_p5 = pnand %p2548_p4, %p2542_p10 }
  0x51   : > { %2552 = shalt.err (!%p2549_p5)
}
  0x52   : > { %s2705_s14 = smov 64   ;;  %s2706_s13 = smov 4  }
  0x53   : > { %2209 = dma.hbm_to_vmem [thread:$0]  (!%p2804_p7), %s3471_s4, 1024, %s273_s16, [#allocation12], %s2705_s14, %s2705_s14, %s2706_s13  }
  0x54   : > { %s34_s29 = sadd.s32 1, %s2694_s27  ;;  %p2679_p12 = scmp.ne.s32.totalorder %s2686_s25, 0 }
  0x55   : > { %p35_p9 = scmp.ge.s32.totalorder %s34_s29, 2  ;;  %p58_p4 = scmp.eq.s32.totalorder %s2698_s28, 0 }
  0x56   : > { %p2217_p5 = scmp.lt.s32.totalorder %s2698_s28, 2  ;;  %s2707_s17 = smov [#allocation5]  }
  0x57   : > { %s3497_s29 = smov (%p35_p9, %s34_s29), 0  ;;  %p59_p13 = por %p2679_p12, %p58_p4 }
  0x58   : > { %s303_s18 = sshll.u32 %s2707_s17, 4  ;;  %s2553_s16 = scalar_lea.hbm %s3467_s0, 512  ;;  %s304_s18 = int_to_ptr.vmem [resolvable:$true] %s303_s18 }
  0x59   : > { %p2892_p0 = pnand %p2217_p5, %p59_p13  ;;  %p2554_p7 = scmp.ne.s32.totalorder %s3467_s0, %s2553_s16 }
  0x5a   : > { %p2560_p8 = scmp.lt.u32.totalorder %s2553_s16, %s2553_s16  ;;  %p2562_p10 = scmp.lt.u32.totalorder %s2553_s16, %s3467_s0 }
  0x5b   : > { %s3486_s19 = scalar_select %p2892_p0, 1, 0 }
  0x5c   : > { %p2555_p2 = pneg %p2892_p0  ;;  %p2563_p1 = por %p2562_p10, %p2560_p8 }
  0x5e   : > { %p2556_p3 = pnand %p2555_p2, %p2554_p7 }
  0x60   : > { %p2557_p6 = pneg %p2556_p3 }
  0x62   : > { %p2564_p11 = pnand %p2563_p1, %p2557_p6 }
  0x64   : > { %2567 = shalt.err (!%p2564_p11)
}
  0x65   : > { %s2568_s11 = scalar_lea.vmem %s304_s18, 512  ;;  %s2575_s15 = scalar_lea.vmem %s304_s18, 1024 }
  0x66   : > { %p2569_p9 = scmp.ne.s32.totalorder %s304_s18, %s2568_s11  ;;  %p2576_p5 = scmp.lt.s32.totalorder %s304_s18, %s304_s18 }
  0x67   : > { %p2577_p13 = scmp.lt.s32.totalorder %s2575_s15, %s2568_s11 }
  0x68   : > { %p2571_p12 = pnand %p2569_p9, %p2555_p2 }
  0x69   : > { %p2578_p0 = por %p2577_p13, %p2576_p5 }
  0x6a   : > { %p2572_p4 = pneg %p2571_p12 }
  0x6c   : > { %p2579_p7 = pnand %p2578_p0, %p2572_p4 }
  0x6e   : > { %2582 = shalt.err (!%p2579_p7)
}
  0x6f   : > { %p3487_p3 = scmp.ne.s32.totalorder %s3486_s19, 0  ;;  %p3488_p6 = scmp.ne.s32.totalorder %s3483_s9, 0 }
  0x70   : > { %s317_s12 = sand.u32 (!%p3488_p6), 1, %s2686_s25   ;;  %p3489_p0 = scmp.ne.s32.totalorder (!%p3488_p6), %s3482_s8, 0 }
  0x71   : > { %2213 = dma.hbm_to_vmem [thread:$0]  (!%p3487_p3), %s3467_s0, 512, %s304_s18, [#allocation6], %s2705_s14, %s2705_s14, %s2706_s13  }
  0x72   : > { %315 = sbr.rel (%p3488_p6) target bundleno = 2728 (0xaa8), region = 44  ;;  %s2032_s20 = sshll.u32 (!%p3488_p6), %s317_s12, 5 }
  0x73   : > { %s318_s16 = scalar_lea.sflag (!%p3488_p6), [#allocation6], %s317_s12  ;;  %s2918_s21 = scalar_lea.vmem (!%p3488_p6), [#allocation5], %s2032_s20 }
  0x79   : > { %2660 = dma.done.wait (%p3489_p0), %s318_s16, 512  }
  0x7a   : > { %2662 = vsyncadd (%p3489_p0), %s318_s16, 4294966784  ;;  %p3490_p2 = scmp.ne.s32.totalorder %s3481_s30, 0 }
  0x7c   : > { %2664 = dma.done.wait (%p3490_p2), [#allocation9], 5120  }
  0x7d   : > { %2666 = vsyncadd (%p3490_p2), [#allocation9], 4294962176 }
  0x7e   : > { %2668 = dma.done.wait (%p3490_p2), [#allocation12], 1024  }
  0x7f   : > { %2670 = vsyncadd (%p3490_p2), [#allocation12], 4294966272  ;;  %p2036_p8 = scmp.ne.s32.totalorder %s2690_s26, 0 }
  0x80   : > { %v2708_v0 = vmov (!%p2036_p8), 0.0  }
  0x81   : > { %366 = sbr.rel (%p2036_p8) target bundleno = 136 (0x88), region = 64  ;;  %367 = vst [vmem:[#allocation2] sm:$0xff] (!%p2036_p8), %v2708_v0  ;;  %368 = vst [vmem:[#allocation3] sm:$0xff] (!%p2036_p8), %v2708_v0 }
  0x88 PF: > { %p2037_p10 = scmp.ge.s32.totalorder %s2690_s26, 1 }
  0x89   : > { %v2287_v1 = vld [vmem:[#allocation8 + $0x4] ss:$16 sps:$4 sm:$0xff] (!%p2037_p10)   ;;  %v2289_v2 = vld [vmem:[#allocation8 + $0xc] ss:$16 sps:$4 sm:$0xff] (!%p2037_p10)   ;;  %v2709_v3 = vmov (!%p2037_p10), 0   ;;  %vm471_vm0 = vcmask (!%p2037_p10), 261120   ;;  %v391_v14 = vlaneseq (!%p2037_p10) }
  0x8a   : > { %372 = sbr.rel (%p2037_p10) target bundleno = 389 (0x185), region = 68  ;;  %516 = vmatprep.mubr.bf16.mxu0 (!%p2037_p10), %v2709_v3  ;;  %589 = vmatprep.mubr.bf16.mxu1 (!%p2037_p10), %v2709_v3  ;;  %v2291_v4 = vld [vmem:[#allocation8] ss:$16 sps:$4 sm:$0xff] (!%p2037_p10)   ;;  %v2292_v5 = vld [vmem:[#allocation8 + $0x8] ss:$16 sps:$4 sm:$0xff] (!%p2037_p10)   ;;  %s631_s30 = ssub.s32 (!%p2037_p10), 0, %s2690_s26 }
  0x8b   : > { %484 = vmatprep.subr.bf16.mxu0 (!%p2037_p10), %v2287_v1  ;;  %557 = vmatprep.subr.bf16.mxu1 (!%p2037_p10), %v2289_v2  ;;  %v2293_v6 = vld [vmem:[#allocation8 + $0x24] ss:$16 sps:$4 sm:$0xff] (!%p2037_p10)   ;;  %v2295_v7 = vld [vmem:[#allocation8 + $0x2c] ss:$16 sps:$4 sm:$0xff] (!%p2037_p10)   ;;  %v2297_v8 = vld [vmem:[#allocation8 + $0x20] ss:$16 sps:$4 sm:$0xff] (!%p2037_p10)   ;;  %s2058_s8 = smin.u32 (!%p2037_p10), %s2690_s26, %s631_s30 }
  0x8c   : > { %485 = vmatpush1.bf16.msra.mxu0 (!%p2037_p10), %v2291_v4  ;;  %558 = vmatpush1.bf16.msra.mxu1 (!%p2037_p10), %v2292_v5  ;;  %v2298_v9 = vld [vmem:[#allocation8 + $0x28] ss:$16 sps:$4 sm:$0xff] (!%p2037_p10)   ;;  %v2299_v10 = vld [vmem:[%s2918_s21] sm:$0xff] (!%p2037_p10)   ;;  %v2301_v12 = vld [vmem:[%s2918_s21 + $0x10] sm:$0xff] (!%p2037_p10)   ;;  %s633_s9 = sand.u32 (!%p2037_p10), 1, %s2058_s8   ;;  %p630_p1 = scmp.lt.s32.totalorder (!%p2037_p10), %s2690_s26, 0 }
  0x8d   : > { %486 = vmatprep.subr.bf16.mxu0 (!%p2037_p10), %v2293_v6  ;;  %559 = vmatprep.subr.bf16.mxu1 (!%p2037_p10), %v2295_v7  ;;  %v2300_v11 = vld [vmem:[%s2918_s21 + $0x8] sm:$0xff] (!%p2037_p10)   ;;  %v2302_v13 = vld [vmem:[%s2918_s21 + $0x18] sm:$0xff] (!%p2037_p10)   ;;  %s634_s14 = ssub.s32 (!%p2037_p10), 0, %s633_s9  ;;  %v392_v15 = vshrl.u32 (!%p2037_p10), %v391_v14, 7  ;;  %v389_v18 = vld [vmem:[%s3470_s3] sm:$0xf] (!%p2037_p10) }
  0x8f   : > { %v393_v16 = vsub.s32 (!%p2037_p10), 0, %v392_v15  ;;  %v401_v17 = vsub.s32 (!%p2037_p10), 2, %v392_v15  ;;  %v397_v19 = vsub.s32 (!%p2037_p10), 1, %v392_v15  ;;  %v405_v20 = vsub.s32 (!%p2037_p10), 3, %v392_v15 }
  0x90   : > { %487 = vmatpush1.bf16.msra.mxu0 (!%p2037_p10), %v2297_v8  ;;  %560 = vmatpush1.bf16.msra.mxu1 (!%p2037_p10), %v2298_v9 }
  0x91   : > { %s3499_s14 = smov (!%p630_p1, %s634_s14), %s633_s9  ;;  %v2952_v21 = vrot.slane %v389_v18, %v393_v16  ;;  %v2954_v22 = vrot.slane %v389_v18, %v401_v17  ;;  %v2956_v23 = vrot.slane %v389_v18, %v397_v19  ;;  %v2958_v24 = vrot.slane %v389_v18, %v405_v20 }
  0x92   : > { %p2060_p11 = scmp.lt.s32.totalorder %s3499_s14, 0  ;;  %s640_s13 = sadd.s32 2, %s3499_s14 }
  0x93   : > { %2050 = vmatmul.mubr.msk.bf16.vlgmr.msra.gmra.mrb[0].mxu0 %vm471_vm0, %v2299_v10  ;;  %2054 = vmatmul.mubr.msk.bf16.vlgmr.msra.gmra.mrb[0].mxu1 %vm471_vm0, %v2299_v10 }
  0x94   : > { %526 = vmatprep.mubr.bf16.mxu0 %v2709_v3  ;;  %599 = vmatprep.mubr.bf16.mxu1 %v2709_v3  ;;  %s3501_s13 = smov (!%p2060_p11, %s640_s13), %s3499_s14 }
  0x95   : > { %s2147_s23 = sshll.u32 %s3501_s13, 8 }
  0x96   : > { %s2964_s24 = scalar_lea.vmem [#allocation4], %s2147_s23 }
  0x9b   : > { %2051 = vmatmul.mubr.msk.bf16.gmra.mrb[4].mxu0 %vm471_vm0, %v2300_v11  ;;  %2055 = vmatmul.mubr.msk.bf16.gmra.mrb[4].mxu1 %vm471_vm0, %v2300_v11 }
  0x9c   : > { %536 = vmatprep.mubr.bf16.mxu0 %v2709_v3  ;;  %609 = vmatprep.mubr.bf16.mxu1 %v2709_v3 }
  0xa3   : > { %2052 = vmatmul.mubr.msk.bf16.gmra.mrb[8].mxu0 %vm471_vm0, %v2301_v12  ;;  %2056 = vmatmul.mubr.msk.bf16.gmra.mrb[8].mxu1 %vm471_vm0, %v2301_v12 }
  0xa4   : > { %546 = vmatprep.mubr.bf16.mxu0 %v2709_v3  ;;  %619 = vmatprep.mubr.bf16.mxu1 %v2709_v3 }
  0xab   : > { %2053 = vmatmul.mubr.msk.bf16.gmra.mrb[12].mxu0 %vm471_vm0, %v2302_v13  ;;  %2057 = vmatmul.mubr.msk.bf16.gmra.mrb[12].mxu1 %vm471_vm0, %v2302_v13 }
 0x166   : > { %v518_v25 = vpop.f32.mrb[0].mxu0  ;;  %v591_v26 = vpop.f32.mrb[0].mxu1 }
 0x167   : > { %v519_v27 = vadd.f32 %v518_v25, %v2952_v21  ;;  %v592_v28 = vadd.f32 %v591_v26, %v2954_v22  ;;  %v520_v29 = vpop.f32.mrb[1].mxu0  ;;  %v593_v30 = vpop.f32.mrb[1].mxu1 }
 0x168   : > { %v521_v31 = vadd.f32 %v520_v29, %v2956_v23  ;;  %v594_v32 = vadd.f32 %v593_v30, %v2958_v24  ;;  %v522_v33 = vpop.f32.mrb[2].mxu0  ;;  %v595_v34 = vpop.f32.mrb[2].mxu1 }
 0x169   : > { %645 = vst [vmem:[%s2964_s24] sm:$0xff] %v519_v27  ;;  %647 = vst [vmem:[%s2964_s24 + $0x10] sm:$0xff] %v592_v28  ;;  %v523_v35 = vadd.f32 %v522_v33, %v2952_v21  ;;  %v596_v36 = vadd.f32 %v595_v34, %v2954_v22  ;;  %v524_v37 = vpop.f32.mrb[3].mxu0  ;;  %v597_v38 = vpop.f32.mrb[3].mxu1 }
 0x16a   : > { %646 = vst [vmem:[%s2964_s24 + $0x8] sm:$0xff] %v521_v31  ;;  %648 = vst [vmem:[%s2964_s24 + $0x18] sm:$0xff] %v594_v32  ;;  %v525_v39 = vadd.f32 %v524_v37, %v2956_v23  ;;  %v598_v40 = vadd.f32 %v597_v38, %v2958_v24 }
 0x16b   : > { %649 = vst [vmem:[%s2964_s24 + $0x20] sm:$0xff] %v523_v35  ;;  %651 = vst [vmem:[%s2964_s24 + $0x30] sm:$0xff] %v596_v36 }
 0x16c   : > { %650 = vst [vmem:[%s2964_s24 + $0x28] sm:$0xff] %v525_v39  ;;  %652 = vst [vmem:[%s2964_s24 + $0x38] sm:$0xff] %v598_v40 }
 0x16e   : > { %v528_v41 = vpop.f32.mrb[4].mxu0  ;;  %v601_v42 = vpop.f32.mrb[4].mxu1 }
 0x16f   : > { %v529_v43 = vadd.f32 %v528_v41, %v2952_v21  ;;  %v602_v44 = vadd.f32 %v601_v42, %v2954_v22  ;;  %v530_v45 = vpop.f32.mrb[5].mxu0  ;;  %v603_v46 = vpop.f32.mrb[5].mxu1 }
 0x170   : > { %v531_v47 = vadd.f32 %v530_v45, %v2956_v23  ;;  %v604_v48 = vadd.f32 %v603_v46, %v2958_v24  ;;  %v532_v49 = vpop.f32.mrb[6].mxu0  ;;  %v605_v50 = vpop.f32.mrb[6].mxu1 }
 0x171   : > { %653 = vst [vmem:[%s2964_s24 + $0x40] sm:$0xff] %v529_v43  ;;  %655 = vst [vmem:[%s2964_s24 + $0x50] sm:$0xff] %v602_v44  ;;  %v533_v51 = vadd.f32 %v532_v49, %v2952_v21  ;;  %v606_v52 = vadd.f32 %v605_v50, %v2954_v22  ;;  %v534_v53 = vpop.f32.mrb[7].mxu0  ;;  %v607_v54 = vpop.f32.mrb[7].mxu1 }
 0x172   : > { %654 = vst [vmem:[%s2964_s24 + $0x48] sm:$0xff] %v531_v47  ;;  %656 = vst [vmem:[%s2964_s24 + $0x58] sm:$0xff] %v604_v48  ;;  %v535_v55 = vadd.f32 %v534_v53, %v2956_v23  ;;  %v608_v56 = vadd.f32 %v607_v54, %v2958_v24 }
 0x173   : > { %657 = vst [vmem:[%s2964_s24 + $0x60] sm:$0xff] %v533_v51  ;;  %659 = vst [vmem:[%s2964_s24 + $0x70] sm:$0xff] %v606_v52 }
 0x174   : > { %658 = vst [vmem:[%s2964_s24 + $0x68] sm:$0xff] %v535_v55  ;;  %660 = vst [vmem:[%s2964_s24 + $0x78] sm:$0xff] %v608_v56 }
 0x176   : > { %v538_v57 = vpop.f32.mrb[8].mxu0  ;;  %v611_v58 = vpop.f32.mrb[8].mxu1 }
 0x177   : > { %v539_v59 = vadd.f32 %v538_v57, %v2952_v21  ;;  %v612_v60 = vadd.f32 %v611_v58, %v2954_v22  ;;  %v540_v61 = vpop.f32.mrb[9].mxu0  ;;  %v613_v62 = vpop.f32.mrb[9].mxu1 }
 0x178   : > { %v541_v63 = vadd.f32 %v540_v61, %v2956_v23  ;;  %v614_v0 = vadd.f32 %v613_v62, %v2958_v24  ;;  %v542_v1 = vpop.f32.mrb[10].mxu0  ;;  %v615_v2 = vpop.f32.mrb[10].mxu1 }
 0x179   : > { %661 = vst [vmem:[%s2964_s24 + $0x80] sm:$0xff] %v539_v59  ;;  %663 = vst [vmem:[%s2964_s24 + $0x90] sm:$0xff] %v612_v60  ;;  %v543_v3 = vadd.f32 %v542_v1, %v2952_v21  ;;  %v616_v4 = vadd.f32 %v615_v2, %v2954_v22  ;;  %v544_v5 = vpop.f32.mrb[11].mxu0  ;;  %v617_v6 = vpop.f32.mrb[11].mxu1 }
 0x17a   : > { %662 = vst [vmem:[%s2964_s24 + $0x88] sm:$0xff] %v541_v63  ;;  %664 = vst [vmem:[%s2964_s24 + $0x98] sm:$0xff] %v614_v0  ;;  %v545_v7 = vadd.f32 %v544_v5, %v2956_v23  ;;  %v618_v8 = vadd.f32 %v617_v6, %v2958_v24 }
 0x17b   : > { %665 = vst [vmem:[%s2964_s24 + $0xa0] sm:$0xff] %v543_v3  ;;  %667 = vst [vmem:[%s2964_s24 + $0xb0] sm:$0xff] %v616_v4 }
 0x17c   : > { %666 = vst [vmem:[%s2964_s24 + $0xa8] sm:$0xff] %v545_v7  ;;  %668 = vst [vmem:[%s2964_s24 + $0xb8] sm:$0xff] %v618_v8 }
 0x17e   : > { %v548_v9 = vpop.f32.mrb[12].mxu0  ;;  %v621_v10 = vpop.f32.mrb[12].mxu1 }
 0x17f   : > { %v549_v11 = vadd.f32 %v548_v9, %v2952_v21  ;;  %v622_v12 = vadd.f32 %v621_v10, %v2954_v22  ;;  %v550_v13 = vpop.f32.mrb[13].mxu0  ;;  %v623_v14 = vpop.f32.mrb[13].mxu1 }
 0x180   : > { %v551_v15 = vadd.f32 %v550_v13, %v2956_v23  ;;  %v624_v16 = vadd.f32 %v623_v14, %v2958_v24  ;;  %v552_v17 = vpop.f32.mrb[14].mxu0  ;;  %v625_v18 = vpop.f32.mrb[14].mxu1 }
 0x181   : > { %669 = vst [vmem:[%s2964_s24 + $0xc0] sm:$0xff] %v549_v11  ;;  %671 = vst [vmem:[%s2964_s24 + $0xd0] sm:$0xff] %v622_v12  ;;  %v553_v19 = vadd.f32 %v552_v17, %v2952_v21  ;;  %v626_v20 = vadd.f32 %v625_v18, %v2954_v22  ;;  %v554_v25 = vpop.f32.mrb[15].mxu0  ;;  %v627_v26 = vpop.f32.mrb[15].mxu1 }
 0x182   : > { %670 = vst [vmem:[%s2964_s24 + $0xc8] sm:$0xff] %v551_v15  ;;  %672 = vst [vmem:[%s2964_s24 + $0xd8] sm:$0xff] %v624_v16  ;;  %v555_v27 = vadd.f32 %v554_v25, %v2956_v23  ;;  %v628_v28 = vadd.f32 %v627_v26, %v2958_v24 }
 0x183   : > { %673 = vst [vmem:[%s2964_s24 + $0xe0] sm:$0xff] %v553_v19  ;;  %675 = vst [vmem:[%s2964_s24 + $0xf0] sm:$0xff] %v626_v20 }
 0x184   : > { %674 = vst [vmem:[%s2964_s24 + $0xe8] sm:$0xff] %v555_v27  ;;  %676 = vst [vmem:[%s2964_s24 + $0xf8] sm:$0xff] %v628_v28 }
 0x185 PF: > { %p2063_p9 = scmp.le.s32.totalorder %s2690_s26, 0 }
 0x186   : > { %v3027_v29 = vld [vmem:[#allocation10 + $0x4] ss:$16 sps:$4 sm:$0xff] (!%p2063_p9)   ;;  %v3029_v21 = vld [vmem:[#allocation10] ss:$16 sps:$4 sm:$0xff] (!%p2063_p9)   ;;  %v2710_v22 = vmov (!%p2063_p9), 0   ;;  %s2064_s10 = sadd.s32 (!%p2063_p9), 4294967295, %s2690_s26 }
 0x187   : > { %680 = sbr.rel (%p2063_p9) target bundleno = 2431 (0x97f), region = 72  ;;  %928 = vmatprep.mubr.bf16.mxu0 (!%p2063_p9), %v2710_v22  ;;  %969 = vmatprep.mubr.bf16.mxu1 (!%p2063_p9), %v2710_v22  ;;  %v3034_v23 = vld [vmem:[#allocation10 + $0x24] ss:$16 sps:$4 sm:$0xff] (!%p2063_p9)   ;;  %v3037_v24 = vld [vmem:[#allocation10 + $0xc] ss:$16 sps:$4 sm:$0xff] (!%p2063_p9)   ;;  %s683_s11 = ssub.s32 (!%p2063_p9), 0, %s2064_s10 }
 0x188   : > { %896 = vmatprep.subr.bf16.mxu0 (!%p2063_p9), %v3027_v29  ;;  %v3039_v30 = vld [vmem:[#allocation10 + $0x20] ss:$16 sps:$4 sm:$0xff] (!%p2063_p9)   ;;  %v3041_v31 = vld [vmem:[#allocation10 + $0x8] ss:$16 sps:$4 sm:$0xff] (!%p2063_p9)   ;;  %v3044_v32 = vld [vmem:[#allocation10 + $0x44] ss:$16 sps:$4 sm:$0xff] (!%p2063_p9)   ;;  %937 = vmatprep.subr.bf16.mxu1 (!%p2063_p9), %v3037_v24  ;;  %s2065_s15 = smin.u32 (!%p2063_p9), %s2064_s10, %s683_s11 }
 0x189   : > { %897 = vmatpush1.bf16.msra.mxu0 (!%p2063_p9), %v3029_v21  ;;  %v3047_v33 = vld [vmem:[#allocation10 + $0x2c] ss:$16 sps:$4 sm:$0xff] (!%p2063_p9)   ;;  %938 = vmatpush1.bf16.msra.mxu1 (!%p2063_p9), %v3041_v31  ;;  %v3050_v34 = vld [vmem:[#allocation10 + $0x28] ss:$16 sps:$4 sm:$0xff] (!%p2063_p9)   ;;  %v3054_v35 = vld [vmem:[#allocation10 + $0x40] ss:$16 sps:$4 sm:$0xff] (!%p2063_p9)  }
 0x18a   : > { %898 = vmatprep.subr.bf16.mxu0 (!%p2063_p9), %v3034_v23  ;;  %939 = vmatprep.subr.bf16.mxu1 (!%p2063_p9), %v3047_v33  ;;  %v3057_v36 = vld [vmem:[#allocation10 + $0x64] ss:$16 sps:$4 sm:$0xff] (!%p2063_p9)   ;;  %v3059_v37 = vld [vmem:[#allocation10 + $0x4c] ss:$16 sps:$4 sm:$0xff] (!%p2063_p9)   ;;  %v3062_v38 = vld [vmem:[#allocation10 + $0x48] ss:$16 sps:$4 sm:$0xff] (!%p2063_p9)  }
 0x18b   : > { %v3066_v39 = vld [vmem:[#allocation10 + $0x60] ss:$16 sps:$4 sm:$0xff] (!%p2063_p9)   ;;  %v3068_v40 = vld [vmem:[#allocation10 + $0x6c] ss:$16 sps:$4 sm:$0xff] (!%p2063_p9)   ;;  %v3071_v41 = vld [vmem:[#allocation10 + $0x84] ss:$16 sps:$4 sm:$0xff] (!%p2063_p9)  }
 0x18c   : > { %v3074_v42 = vld [vmem:[#allocation10 + $0x80] ss:$16 sps:$4 sm:$0xff] (!%p2063_p9)   ;;  %v3076_v43 = vld [vmem:[#allocation10 + $0x68] ss:$16 sps:$4 sm:$0xff] (!%p2063_p9)   ;;  %v3080_v44 = vld [vmem:[#allocation10 + $0x8c] ss:$16 sps:$4 sm:$0xff] (!%p2063_p9)  }
 0x18d   : > { %899 = vmatpush1.bf16.msra.mxu0 (!%p2063_p9), %v3039_v30  ;;  %940 = vmatpush1.bf16.msra.mxu1 (!%p2063_p9), %v3050_v34  ;;  %v3083_v45 = vld [vmem:[#allocation10 + $0xa4] ss:$16 sps:$4 sm:$0xff] (!%p2063_p9)   ;;  %v3086_v46 = vld [vmem:[#allocation10 + $0x88] ss:$16 sps:$4 sm:$0xff] (!%p2063_p9)   ;;  %v3090_v47 = vld [vmem:[#allocation10 + $0xa0] ss:$16 sps:$4 sm:$0xff] (!%p2063_p9)  }
 0x18e   : > { %900 = vmatprep.subr.bf16.mxu0 %v3044_v32  ;;  %941 = vmatprep.subr.bf16.mxu1 %v3059_v37  ;;  %v3092_v48 = vld [vmem:[#allocation10 + $0xac] ss:$16 sps:$4 sm:$0xff]   ;;  %v3095_v49 = vld [vmem:[#allocation10 + $0xc4] ss:$16 sps:$4 sm:$0xff]   ;;  %v3098_v50 = vld [vmem:[#allocation10 + $0xa8] ss:$16 sps:$4 sm:$0xff]  }
 0x18f   : > { %v3102_v51 = vld [vmem:[#allocation10 + $0xc0] ss:$16 sps:$4 sm:$0xff]   ;;  %v3104_v52 = vld [vmem:[#allocation10 + $0xcc] ss:$16 sps:$4 sm:$0xff]   ;;  %v3107_v53 = vld [vmem:[#allocation10 + $0xe4] ss:$16 sps:$4 sm:$0xff]  }
 0x190   : > { %v3110_v54 = vld [vmem:[#allocation10 + $0xc8] ss:$16 sps:$4 sm:$0xff]   ;;  %v3114_v55 = vld [vmem:[#allocation10 + $0xe0] ss:$16 sps:$4 sm:$0xff]   ;;  %v3116_v57 = vld [vmem:[#allocation10 + $0xec] ss:$16 sps:$4 sm:$0xff]  }
 0x191   : > { %901 = vmatpush1.bf16.msra.mxu0 %v3054_v35  ;;  %942 = vmatpush1.bf16.msra.mxu1 %v3062_v38  ;;  %v726_v56 = vld [vmem:[#allocation2] sm:$0xff]  ;;  %v3120_v59 = vld [vmem:[#allocation10 + $0xe8] ss:$16 sps:$4 sm:$0xff]   ;;  %s685_s22 = sand.u32 1, %s2065_s15   ;;  %p682_p12 = scmp.lt.s32.totalorder %s2064_s10, 0 }
 0x192   : > { %902 = vmatprep.subr.bf16.mxu0 %v3057_v36  ;;  %943 = vmatprep.subr.bf16.mxu1 %v3068_v40  ;;  %v735_v58 = vpack.c.bf16 %v726_v56, %v726_v56  ;;  %s686_s17 = ssub.s32 0, %s685_s22  ;;  %v727_v25 = vld [vmem:[#allocation3] sm:$0xff] }
 0x193   : > { %s3503_s17 = smov (!%p682_p12, %s686_s17), %s685_s22 }
 0x194   : > { %p2067_p4 = scmp.lt.s32.totalorder %s3503_s17, 0  ;;  %s692_s12 = sadd.s32 2, %s3503_s17 }
 0x195   : > { %903 = vmatpush1.bf16.msra.mxu0 %v3066_v39  ;;  %944 = vmatpush1.bf16.msra.mxu1 %v3076_v43 }
 0x196   : > { %904 = vmatprep.subr.bf16.mxu0 %v3071_v41  ;;  %945 = vmatprep.subr.bf16.mxu1 %v3080_v44  ;;  %s3505_s12 = smov (!%p2067_p4, %s692_s12), %s3503_s17 }
 0x197   : > { %s2148_s20 = sshll.u32 %s3505_s12, 8 }
 0x198   : > { %s3162_s16 = scalar_lea.vmem [#allocation4], %s2148_s20 }
 0x199   : > { %905 = vmatpush1.bf16.msra.mxu0 %v3074_v42  ;;  %946 = vmatpush1.bf16.msra.mxu1 %v3086_v46  ;;  %v731_v60 = vld [vmem:[%s3162_s16] sm:$0xff]  ;;  %v732_v61 = vld [vmem:[%s3162_s16 + $0x8] sm:$0xff]  ;;  %v733_v1 = vld [vmem:[%s3162_s16 + $0x10] sm:$0xff] }
 0x19a   : > { %906 = vmatprep.subr.bf16.mxu0 %v3083_v45  ;;  %947 = vmatprep.subr.bf16.mxu1 %v3092_v48  ;;  %v734_v11 = vld [vmem:[%s3162_s16 + $0x18] sm:$0xff] }
 0x19d   : > { %907 = vmatpush1.bf16.msra.mxu0 %v3090_v47  ;;  %948 = vmatpush1.bf16.msra.mxu1 %v3098_v50 }
 0x19e   : > { %908 = vmatprep.subr.bf16.mxu0 %v3095_v49  ;;  %949 = vmatprep.subr.bf16.mxu1 %v3104_v52 }
 0x1a1   : > { %909 = vmatpush1.bf16.msra.mxu0 %v3102_v51  ;;  %950 = vmatpush1.bf16.msra.mxu1 %v3110_v54 }
 0x1a2   : > { %910 = vmatprep.subr.bf16.mxu0 %v3107_v53  ;;  %951 = vmatprep.subr.bf16.mxu1 %v3116_v57 }
 0x1a5   : > { %911 = vmatpush1.bf16.msra.mxu0 %v3114_v55  ;;  %952 = vmatpush1.bf16.msra.mxu1 %v3120_v59 }
 0x1a6   : > { %1006 = vmatprep.subr.bf16.mxu0 %v3027_v29  ;;  %1047 = vmatprep.subr.bf16.mxu1 %v3037_v24 }
 0x1a8   : > { %929 = vmatmul.mubr.bf16.vlgmr.msra.gmra.mrb[0].mxu0 %v735_v58  ;;  %970 = vmatmul.mubr.bf16.vlgmr.msra.gmra.mrb[0].mxu1 %v735_v58 }
 0x1a9   : > { %1007 = vmatpush1.bf16.msra.mxu0 %v3029_v21  ;;  %1038 = vmatprep.mubr.bf16.mxu0 %v2710_v22 }
 0x1aa   : > { %1008 = vmatprep.subr.bf16.mxu0 %v3034_v23  ;;  %1048 = vmatpush1.bf16.msra.mxu1 %v3041_v31 }
 0x1ab   : > { %1079 = vmatprep.mubr.bf16.mxu1 %v2710_v22  ;;  %1049 = vmatprep.subr.bf16.mxu1 %v3047_v33 }
 0x1ad   : > { %1009 = vmatpush1.bf16.msra.mxu0 %v3039_v30 }
 0x1ae   : > { %1010 = vmatprep.subr.bf16.mxu0 %v3044_v32  ;;  %1050 = vmatpush1.bf16.msra.mxu1 %v3050_v34 }
 0x1af   : > { %1051 = vmatprep.subr.bf16.mxu1 %v3059_v37 }
 0x1b1   : > { %1011 = vmatpush1.bf16.msra.mxu0 %v3054_v35 }
 0x1b2   : > { %1012 = vmatprep.subr.bf16.mxu0 %v3057_v36  ;;  %1052 = vmatpush1.bf16.msra.mxu1 %v3062_v38 }
 0x1b3   : > { %1053 = vmatprep.subr.bf16.mxu1 %v3068_v40 }
 0x1b5   : > { %1013 = vmatpush1.bf16.msra.mxu0 %v3066_v39 }
 0x1b6   : > { %1014 = vmatprep.subr.bf16.mxu0 %v3071_v41  ;;  %1054 = vmatpush1.bf16.msra.mxu1 %v3076_v43 }
 0x1b7   : > { %1055 = vmatprep.subr.bf16.mxu1 %v3080_v44 }
 0x1b9   : > { %1015 = vmatpush1.bf16.msra.mxu0 %v3074_v42 }
 0x1ba   : > { %1016 = vmatprep.subr.bf16.mxu0 %v3083_v45  ;;  %1056 = vmatpush1.bf16.msra.mxu1 %v3086_v46 }
 0x1bb   : > { %1057 = vmatprep.subr.bf16.mxu1 %v3092_v48 }
 0x1bd   : > { %1017 = vmatpush1.bf16.msra.mxu0 %v3090_v47 }
 0x1be   : > { %1018 = vmatprep.subr.bf16.mxu0 %v3095_v49  ;;  %1058 = vmatpush1.bf16.msra.mxu1 %v3098_v50 }
 0x1bf   : > { %1059 = vmatprep.subr.bf16.mxu1 %v3104_v52 }
 0x1c1   : > { %1019 = vmatpush1.bf16.msra.mxu0 %v3102_v51 }
 0x1c2   : > { %1020 = vmatprep.subr.bf16.mxu0 %v3107_v53  ;;  %1060 = vmatpush1.bf16.msra.mxu1 %v3110_v54 }
 0x1c3   : > { %1061 = vmatprep.subr.bf16.mxu1 %v3116_v57 }
 0x1c5   : > { %1021 = vmatpush1.bf16.msra.mxu0 %v3114_v55 }
 0x1c6   : > { %1116 = vmatprep.subr.bf16.mxu0 %v3027_v29  ;;  %1062 = vmatpush1.bf16.msra.mxu1 %v3120_v59 }
 0x1c7   : > { %1157 = vmatprep.subr.bf16.mxu1 %v3037_v24 }
 0x27b   : > { %v930_v62 = vpop.f32.mrb[0].mxu0  ;;  %v971_v6 = vpop.f32.mrb[0].mxu1 }
 0x27c   : > { %v978_v63 = vadd.f32 %v930_v62, %v731_v60  ;;  %v932_v0 = vpop.f32.mrb[1].mxu0  ;;  %v980_v8 = vadd.f32 %v971_v6, %v733_v1  ;;  %v973_v9 = vpop.f32.mrb[1].mxu1  ;;  %v2102_v1 = vld [vmem:[%s3162_s16 + $0x20] sm:$0xff] }
 0x27d   : > { %v979_v2 = vadd.f32 %v932_v0, %v732_v61  ;;  %v934_v3 = vpop.f32.mrb[2].mxu0  ;;  %v975_v10 = vpop.f32.mrb[2].mxu1  ;;  %v981_v13 = vadd.f32 %v973_v9, %v734_v11 }
 0x27e   : > { %v982_v4 = vmul.f32 0.5, %v978_v63  ;;  %v935_v5 = vpop.f32.mrb[3].mxu0  ;;  %v976_v12 = vpop.f32.mrb[3].mxu1 }
 0x27f   : > { %v986_v7 = vmul.f32 0.5, %v979_v2  ;;  %v991_v14 = vmul.f32 0.5, %v981_v13  ;;  %v2103_v2 = vld [vmem:[%s3162_s16 + $0x28] sm:$0xff] }
 0x280   : > { %2351 = vtanh.f32 %v982_v4 }
 0x281   : > { %2353 = vtanh.f32 %v986_v7 }
 0x282   : > { %2355 = vtanh.f32 %v980_v8  ;;  %v2104_v8 = vld [vmem:[%s3162_s16 + $0x30] sm:$0xff] }
 0x283   : > { %2357 = vtanh.f32 %v991_v14 }
 0x28a   : > { %v2352_v15 = vpop.eup %2351 }
 0x28b   : > { %v2354_v16 = vpop.eup %2353  ;;  %v984_v17 = vadd.f32 1.0, %v2352_v15 }
 0x28c   : > { %v2356_v18 = vpop.eup %2355  ;;  %v988_v19 = vadd.f32 1.0, %v2354_v16 }
 0x28d   : > { %v985_v20 = vmul.f32 0.5, %v984_v17  ;;  %v2358_v58 = vpop.eup %2357  ;;  %v2105_v17 = vld [vmem:[%s3162_s16 + $0x38] sm:$0xff] }
 0x28e   : > { %v989_v26 = vmul.f32 0.5, %v988_v19  ;;  %v993_v60 = vadd.f32 1.0, %v2358_v58 }
 0x28f   : > { %v996_v27 = vmul.f32 %v2356_v18, %v985_v20 }
 0x290   : > { %v995_v28 = vmul.f32 %v989_v26, %v727_v25  ;;  %v994_v61 = vmul.f32 0.5, %v993_v60 }
 0x292   : > { %v3168_v56 = vadd.f32 %v996_v27, %v995_v28 }
 0x294   : > { %2359 = vtanh.f32 %v3168_v56 }
 0x29e   : > { %v2360_v62 = vpop.eup %2359 }
 0x29f   : > { %v999_v63 = vmul.f32 %v2360_v62, %v994_v61 }
 0x2a1   : > { %v1005_v0 = vpack.c.bf16 %v999_v63, %v999_v63 }
 0x2a3   : > { %1039 = vmatmul.mubr.bf16.vlgmr.msra.gmra.mrb[4].mxu0 %v1005_v0  ;;  %1080 = vmatmul.mubr.bf16.vlgmr.msra.gmra.mrb[4].mxu1 %v1005_v0 }
 0x2a4   : > { %1117 = vmatpush1.bf16.msra.mxu0 %v3029_v21  ;;  %1158 = vmatpush1.bf16.msra.mxu1 %v3041_v31 }
 0x2a5   : > { %1118 = vmatprep.subr.bf16.mxu0 %v3034_v23  ;;  %1159 = vmatprep.subr.bf16.mxu1 %v3047_v33 }
 0x2a6   : > { %1148 = vmatprep.mubr.bf16.mxu0 %v2710_v22  ;;  %1189 = vmatprep.mubr.bf16.mxu1 %v2710_v22 }
 0x2a8   : > { %1119 = vmatpush1.bf16.msra.mxu0 %v3039_v30  ;;  %1160 = vmatpush1.bf16.msra.mxu1 %v3050_v34 }
 0x2a9   : > { %1120 = vmatprep.subr.bf16.mxu0 %v3044_v32  ;;  %1161 = vmatprep.subr.bf16.mxu1 %v3059_v37 }
 0x2ac   : > { %1121 = vmatpush1.bf16.msra.mxu0 %v3054_v35  ;;  %1162 = vmatpush1.bf16.msra.mxu1 %v3062_v38 }
 0x2ad   : > { %1122 = vmatprep.subr.bf16.mxu0 %v3057_v36  ;;  %1163 = vmatprep.subr.bf16.mxu1 %v3068_v40 }
 0x2b0   : > { %1123 = vmatpush1.bf16.msra.mxu0 %v3066_v39  ;;  %1164 = vmatpush1.bf16.msra.mxu1 %v3076_v43 }
 0x2b1   : > { %1124 = vmatprep.subr.bf16.mxu0 %v3071_v41  ;;  %1165 = vmatprep.subr.bf16.mxu1 %v3080_v44 }
 0x2b4   : > { %1125 = vmatpush1.bf16.msra.mxu0 %v3074_v42  ;;  %1166 = vmatpush1.bf16.msra.mxu1 %v3086_v46 }
 0x2b5   : > { %1126 = vmatprep.subr.bf16.mxu0 %v3083_v45  ;;  %1167 = vmatprep.subr.bf16.mxu1 %v3092_v48 }
 0x2b8   : > { %1127 = vmatpush1.bf16.msra.mxu0 %v3090_v47  ;;  %1168 = vmatpush1.bf16.msra.mxu1 %v3098_v50 }
 0x2b9   : > { %1128 = vmatprep.subr.bf16.mxu0 %v3095_v49  ;;  %1169 = vmatprep.subr.bf16.mxu1 %v3104_v52 }
 0x2bc   : > { %1129 = vmatpush1.bf16.msra.mxu0 %v3102_v51  ;;  %1170 = vmatpush1.bf16.msra.mxu1 %v3110_v54 }
 0x2bd   : > { %1130 = vmatprep.subr.bf16.mxu0 %v3107_v53  ;;  %1171 = vmatprep.subr.bf16.mxu1 %v3116_v57 }
 0x2c0   : > { %1131 = vmatpush1.bf16.msra.mxu0 %v3114_v55  ;;  %1172 = vmatpush1.bf16.msra.mxu1 %v3120_v59 }
 0x2c1   : > { %1226 = vmatprep.subr.bf16.mxu0 %v3027_v29  ;;  %1267 = vmatprep.subr.bf16.mxu1 %v3037_v24 }
 0x376   : > { %v1040_v3 = vpop.f32.mrb[4].mxu0  ;;  %v1081_v4 = vpop.f32.mrb[4].mxu1 }
 0x377   : > { %v1088_v5 = vadd.f32 %v2102_v1, %v1040_v3  ;;  %v1042_v6 = vpop.f32.mrb[5].mxu0  ;;  %v1083_v7 = vpop.f32.mrb[5].mxu1  ;;  %v1090_v16 = vadd.f32 %v2104_v8, %v1081_v4 }
 0x378   : > { %v1089_v9 = vadd.f32 %v2103_v2, %v1042_v6  ;;  %v1044_v10 = vpop.f32.mrb[6].mxu0  ;;  %v1085_v11 = vpop.f32.mrb[6].mxu1  ;;  %v1091_v18 = vadd.f32 %v2105_v17, %v1083_v7  ;;  %v2107_v6 = vld [vmem:[%s3162_s16 + $0x48] sm:$0xff] }
 0x379   : > { %v1092_v12 = vmul.f32 0.5, %v1088_v5  ;;  %v1045_v13 = vpop.f32.mrb[7].mxu0  ;;  %v1086_v14 = vpop.f32.mrb[7].mxu1 }
 0x37a   : > { %v1096_v15 = vmul.f32 0.5, %v1089_v9  ;;  %v1101_v19 = vmul.f32 0.5, %v1091_v18 }
 0x37b   : > { %2361 = vtanh.f32 %v1092_v12  ;;  %v2108_v12 = vld [vmem:[%s3162_s16 + $0x50] sm:$0xff] }
 0x37c   : > { %2363 = vtanh.f32 %v1096_v15 }
 0x37d   : > { %2365 = vtanh.f32 %v1090_v16 }
 0x37e   : > { %2367 = vtanh.f32 %v1101_v19 }
 0x385   : > { %v2362_v20 = vpop.eup %2361 }
 0x386   : > { %v2364_v25 = vpop.eup %2363  ;;  %v1094_v26 = vadd.f32 1.0, %v2362_v20 }
 0x387   : > { %v1098_v27 = vadd.f32 1.0, %v2364_v25  ;;  %v2366_v58 = vpop.eup %2365  ;;  %v2109_v25 = vld [vmem:[%s3162_s16 + $0x58] sm:$0xff] }
 0x388   : > { %v1095_v28 = vmul.f32 0.5, %v1094_v26  ;;  %v2368_v0 = vpop.eup %2367 }
 0x389   : > { %v1099_v60 = vmul.f32 0.5, %v1098_v27  ;;  %v1103_v1 = vadd.f32 1.0, %v2368_v0 }
 0x38a   : > { %v1106_v61 = vmul.f32 %v2366_v58, %v1095_v28 }
 0x38b   : > { %v1105_v62 = vmul.f32 %v1099_v60, %v3168_v56  ;;  %v1104_v2 = vmul.f32 0.5, %v1103_v1  ;;  %v2106_v56 = vld [vmem:[%s3162_s16 + $0x40] sm:$0xff] }
 0x38d   : > { %v3210_v63 = vadd.f32 %v1106_v61, %v1105_v62 }
 0x38f   : > { %2369 = vtanh.f32 %v3210_v63 }
 0x399   : > { %v2370_v3 = vpop.eup %2369 }
 0x39a   : > { %v1109_v4 = vmul.f32 %v2370_v3, %v1104_v2 }
 0x39c   : > { %v1115_v5 = vpack.c.bf16 %v1109_v4, %v1109_v4 }
 0x39e   : > { %1149 = vmatmul.mubr.bf16.vlgmr.msra.gmra.mrb[8].mxu0 %v1115_v5  ;;  %1190 = vmatmul.mubr.bf16.vlgmr.msra.gmra.mrb[8].mxu1 %v1115_v5 }
 0x39f   : > { %1227 = vmatpush1.bf16.msra.mxu0 %v3029_v21  ;;  %1268 = vmatpush1.bf16.msra.mxu1 %v3041_v31 }
 0x3a0   : > { %1228 = vmatprep.subr.bf16.mxu0 %v3034_v23  ;;  %1269 = vmatprep.subr.bf16.mxu1 %v3047_v33 }
 0x3a1   : > { %1258 = vmatprep.mubr.bf16.mxu0 %v2710_v22  ;;  %1299 = vmatprep.mubr.bf16.mxu1 %v2710_v22 }
 0x3a3   : > { %1229 = vmatpush1.bf16.msra.mxu0 %v3039_v30  ;;  %1270 = vmatpush1.bf16.msra.mxu1 %v3050_v34 }
 0x3a4   : > { %1230 = vmatprep.subr.bf16.mxu0 %v3044_v32  ;;  %1271 = vmatprep.subr.bf16.mxu1 %v3059_v37 }
 0x3a7   : > { %1231 = vmatpush1.bf16.msra.mxu0 %v3054_v35  ;;  %1272 = vmatpush1.bf16.msra.mxu1 %v3062_v38 }
 0x3a8   : > { %1232 = vmatprep.subr.bf16.mxu0 %v3057_v36  ;;  %1273 = vmatprep.subr.bf16.mxu1 %v3068_v40 }
 0x3ab   : > { %1233 = vmatpush1.bf16.msra.mxu0 %v3066_v39  ;;  %1274 = vmatpush1.bf16.msra.mxu1 %v3076_v43 }
 0x3ac   : > { %1234 = vmatprep.subr.bf16.mxu0 %v3071_v41  ;;  %1275 = vmatprep.subr.bf16.mxu1 %v3080_v44 }
 0x3af   : > { %1235 = vmatpush1.bf16.msra.mxu0 %v3074_v42  ;;  %1276 = vmatpush1.bf16.msra.mxu1 %v3086_v46 }
 0x3b0   : > { %1236 = vmatprep.subr.bf16.mxu0 %v3083_v45  ;;  %1277 = vmatprep.subr.bf16.mxu1 %v3092_v48 }
 0x3b3   : > { %1237 = vmatpush1.bf16.msra.mxu0 %v3090_v47  ;;  %1278 = vmatpush1.bf16.msra.mxu1 %v3098_v50 }
 0x3b4   : > { %1238 = vmatprep.subr.bf16.mxu0 %v3095_v49  ;;  %1279 = vmatprep.subr.bf16.mxu1 %v3104_v52 }
 0x3b7   : > { %1239 = vmatpush1.bf16.msra.mxu0 %v3102_v51  ;;  %1280 = vmatpush1.bf16.msra.mxu1 %v3110_v54 }
 0x3b8   : > { %1240 = vmatprep.subr.bf16.mxu0 %v3107_v53  ;;  %1281 = vmatprep.subr.bf16.mxu1 %v3116_v57 }
 0x3bb   : > { %1241 = vmatpush1.bf16.msra.mxu0 %v3114_v55  ;;  %1282 = vmatpush1.bf16.msra.mxu1 %v3120_v59 }
 0x3bc   : > { %1336 = vmatprep.subr.bf16.mxu0 %v3027_v29  ;;  %1377 = vmatprep.subr.bf16.mxu1 %v3037_v24 }
 0x471   : > { %v1150_v7 = vpop.f32.mrb[8].mxu0  ;;  %v1191_v8 = vpop.f32.mrb[8].mxu1 }
 0x472   : > { %v1198_v9 = vadd.f32 %v2106_v56, %v1150_v7  ;;  %v1152_v10 = vpop.f32.mrb[9].mxu0  ;;  %v1193_v11 = vpop.f32.mrb[9].mxu1  ;;  %v1200_v20 = vadd.f32 %v2108_v12, %v1191_v8 }
 0x473   : > { %v1199_v13 = vadd.f32 %v2107_v6, %v1152_v10  ;;  %v1154_v14 = vpop.f32.mrb[10].mxu0  ;;  %v1195_v15 = vpop.f32.mrb[10].mxu1  ;;  %v1201_v26 = vadd.f32 %v2109_v25, %v1193_v11  ;;  %v2111_v10 = vld [vmem:[%s3162_s16 + $0x68] sm:$0xff] }
 0x474   : > { %v1202_v16 = vmul.f32 0.5, %v1198_v9  ;;  %v1155_v17 = vpop.f32.mrb[11].mxu0  ;;  %v1196_v18 = vpop.f32.mrb[11].mxu1 }
 0x475   : > { %v1206_v19 = vmul.f32 0.5, %v1199_v13  ;;  %v1211_v27 = vmul.f32 0.5, %v1201_v26 }
 0x476   : > { %2371 = vtanh.f32 %v1202_v16  ;;  %v2112_v16 = vld [vmem:[%s3162_s16 + $0x70] sm:$0xff] }
 0x477   : > { %2373 = vtanh.f32 %v1206_v19 }
 0x478   : > { %2375 = vtanh.f32 %v1200_v20 }
 0x479   : > { %2377 = vtanh.f32 %v1211_v27 }
 0x480   : > { %v2372_v28 = vpop.eup %2371 }
 0x481   : > { %v2374_v58 = vpop.eup %2373  ;;  %v1204_v60 = vadd.f32 1.0, %v2372_v28 }
 0x482   : > { %v1208_v61 = vadd.f32 1.0, %v2374_v58  ;;  %v2376_v0 = vpop.eup %2375  ;;  %v2113_v58 = vld [vmem:[%s3162_s16 + $0x78] sm:$0xff] }
 0x483   : > { %v1205_v62 = vmul.f32 0.5, %v1204_v60  ;;  %v2378_v5 = vpop.eup %2377 }
 0x484   : > { %v1209_v1 = vmul.f32 0.5, %v1208_v61  ;;  %v1213_v56 = vadd.f32 1.0, %v2378_v5 }
 0x485   : > { %v1216_v2 = vmul.f32 %v2376_v0, %v1205_v62 }
 0x486   : > { %v1215_v3 = vmul.f32 %v1209_v1, %v3210_v63  ;;  %v1214_v6 = vmul.f32 0.5, %v1213_v56  ;;  %v2110_v63 = vld [vmem:[%s3162_s16 + $0x60] sm:$0xff] }
 0x488   : > { %v3252_v4 = vadd.f32 %v1216_v2, %v1215_v3 }
 0x48a   : > { %2379 = vtanh.f32 %v3252_v4 }
 0x494   : > { %v2380_v7 = vpop.eup %2379 }
 0x495   : > { %v1219_v8 = vmul.f32 %v2380_v7, %v1214_v6 }
 0x497   : > { %v1225_v9 = vpack.c.bf16 %v1219_v8, %v1219_v8 }
 0x499   : > { %1259 = vmatmul.mubr.bf16.vlgmr.msra.gmra.mrb[12].mxu0 %v1225_v9  ;;  %1300 = vmatmul.mubr.bf16.vlgmr.msra.gmra.mrb[12].mxu1 %v1225_v9 }
 0x49a   : > { %1337 = vmatpush1.bf16.msra.mxu0 %v3029_v21  ;;  %1378 = vmatpush1.bf16.msra.mxu1 %v3041_v31 }
 0x49b   : > { %1338 = vmatprep.subr.bf16.mxu0 %v3034_v23  ;;  %1379 = vmatprep.subr.bf16.mxu1 %v3047_v33 }
 0x49c   : > { %1368 = vmatprep.mubr.bf16.mxu0 %v2710_v22  ;;  %1409 = vmatprep.mubr.bf16.mxu1 %v2710_v22 }
 0x49e   : > { %1339 = vmatpush1.bf16.msra.mxu0 %v3039_v30  ;;  %1380 = vmatpush1.bf16.msra.mxu1 %v3050_v34 }
 0x49f   : > { %1340 = vmatprep.subr.bf16.mxu0 %v3044_v32  ;;  %1381 = vmatprep.subr.bf16.mxu1 %v3059_v37 }
 0x4a2   : > { %1341 = vmatpush1.bf16.msra.mxu0 %v3054_v35  ;;  %1382 = vmatpush1.bf16.msra.mxu1 %v3062_v38 }
 0x4a3   : > { %1342 = vmatprep.subr.bf16.mxu0 %v3057_v36  ;;  %1383 = vmatprep.subr.bf16.mxu1 %v3068_v40 }
 0x4a6   : > { %1343 = vmatpush1.bf16.msra.mxu0 %v3066_v39  ;;  %1384 = vmatpush1.bf16.msra.mxu1 %v3076_v43 }
 0x4a7   : > { %1344 = vmatprep.subr.bf16.mxu0 %v3071_v41  ;;  %1385 = vmatprep.subr.bf16.mxu1 %v3080_v44 }
 0x4aa   : > { %1345 = vmatpush1.bf16.msra.mxu0 %v3074_v42  ;;  %1386 = vmatpush1.bf16.msra.mxu1 %v3086_v46 }
 0x4ab   : > { %1346 = vmatprep.subr.bf16.mxu0 %v3083_v45  ;;  %1387 = vmatprep.subr.bf16.mxu1 %v3092_v48 }
 0x4ae   : > { %1347 = vmatpush1.bf16.msra.mxu0 %v3090_v47  ;;  %1388 = vmatpush1.bf16.msra.mxu1 %v3098_v50 }
 0x4af   : > { %1348 = vmatprep.subr.bf16.mxu0 %v3095_v49  ;;  %1389 = vmatprep.subr.bf16.mxu1 %v3104_v52 }
 0x4b2   : > { %1349 = vmatpush1.bf16.msra.mxu0 %v3102_v51  ;;  %1390 = vmatpush1.bf16.msra.mxu1 %v3110_v54 }
 0x4b3   : > { %1350 = vmatprep.subr.bf16.mxu0 %v3107_v53  ;;  %1391 = vmatprep.subr.bf16.mxu1 %v3116_v57 }
 0x4b6   : > { %1351 = vmatpush1.bf16.msra.mxu0 %v3114_v55  ;;  %1392 = vmatpush1.bf16.msra.mxu1 %v3120_v59 }
 0x4b7   : > { %1446 = vmatprep.subr.bf16.mxu0 %v3027_v29  ;;  %1487 = vmatprep.subr.bf16.mxu1 %v3037_v24 }
 0x56c   : > { %v1260_v11 = vpop.f32.mrb[12].mxu0  ;;  %v1301_v12 = vpop.f32.mrb[12].mxu1 }
 0x56d   : > { %v1308_v13 = vadd.f32 %v2110_v63, %v1260_v11  ;;  %v1262_v14 = vpop.f32.mrb[13].mxu0  ;;  %v1303_v15 = vpop.f32.mrb[13].mxu1  ;;  %v1310_v28 = vadd.f32 %v2112_v16, %v1301_v12 }
 0x56e   : > { %v1309_v17 = vadd.f32 %v2111_v10, %v1262_v14  ;;  %v1264_v18 = vpop.f32.mrb[14].mxu0  ;;  %v1305_v19 = vpop.f32.mrb[14].mxu1  ;;  %v1311_v60 = vadd.f32 %v2113_v58, %v1303_v15  ;;  %v2115_v14 = vld [vmem:[%s3162_s16 + $0x88] sm:$0xff] }
 0x56f   : > { %v1312_v20 = vmul.f32 0.5, %v1308_v13  ;;  %v1265_v25 = vpop.f32.mrb[15].mxu0  ;;  %v1306_v26 = vpop.f32.mrb[15].mxu1 }
 0x570   : > { %v1316_v27 = vmul.f32 0.5, %v1309_v17  ;;  %v1321_v61 = vmul.f32 0.5, %v1311_v60 }
 0x571   : > { %2381 = vtanh.f32 %v1312_v20  ;;  %v2116_v20 = vld [vmem:[%s3162_s16 + $0x90] sm:$0xff] }
 0x572   : > { %2383 = vtanh.f32 %v1316_v27 }
 0x573   : > { %2385 = vtanh.f32 %v1310_v28 }
 0x574   : > { %2387 = vtanh.f32 %v1321_v61 }
 0x57b   : > { %v2382_v62 = vpop.eup %2381 }
 0x57c   : > { %v2384_v0 = vpop.eup %2383  ;;  %v1314_v1 = vadd.f32 1.0, %v2382_v62 }
 0x57d   : > { %v1318_v2 = vadd.f32 1.0, %v2384_v0  ;;  %v2386_v5 = vpop.eup %2385 }
 0x57e   : > { %v1315_v3 = vmul.f32 0.5, %v1314_v1  ;;  %v2388_v9 = vpop.eup %2387 }
 0x57f   : > { %v1319_v56 = vmul.f32 0.5, %v1318_v2  ;;  %v1323_v63 = vadd.f32 1.0, %v2388_v9 }
 0x580   : > { %v1326_v6 = vmul.f32 %v2386_v5, %v1315_v3 }
 0x581   : > { %v1325_v7 = vmul.f32 %v1319_v56, %v3252_v4  ;;  %v1324_v10 = vmul.f32 0.5, %v1323_v63  ;;  %v2114_v4 = vld [vmem:[%s3162_s16 + $0x80] sm:$0xff] }
 0x583   : > { %v3294_v8 = vadd.f32 %v1326_v6, %v1325_v7 }
 0x585   : > { %2389 = vtanh.f32 %v3294_v8 }
 0x58f   : > { %v2390_v11 = vpop.eup %2389 }
 0x590   : > { %v1329_v12 = vmul.f32 %v2390_v11, %v1324_v10 }
 0x592   : > { %v1335_v13 = vpack.c.bf16 %v1329_v12, %v1329_v12 }
 0x594   : > { %1369 = vmatmul.mubr.bf16.vlgmr.msra.gmra.mrb[16].mxu0 %v1335_v13  ;;  %1410 = vmatmul.mubr.bf16.vlgmr.msra.gmra.mrb[16].mxu1 %v1335_v13 }
 0x595   : > { %1447 = vmatpush1.bf16.msra.mxu0 %v3029_v21  ;;  %1488 = vmatpush1.bf16.msra.mxu1 %v3041_v31 }
 0x596   : > { %1448 = vmatprep.subr.bf16.mxu0 %v3034_v23  ;;  %1489 = vmatprep.subr.bf16.mxu1 %v3047_v33 }
 0x597   : > { %1478 = vmatprep.mubr.bf16.mxu0 %v2710_v22  ;;  %1519 = vmatprep.mubr.bf16.mxu1 %v2710_v22 }
 0x599   : > { %1449 = vmatpush1.bf16.msra.mxu0 %v3039_v30  ;;  %1490 = vmatpush1.bf16.msra.mxu1 %v3050_v34 }
 0x59a   : > { %1450 = vmatprep.subr.bf16.mxu0 %v3044_v32  ;;  %1491 = vmatprep.subr.bf16.mxu1 %v3059_v37 }
 0x59d   : > { %1451 = vmatpush1.bf16.msra.mxu0 %v3054_v35  ;;  %1492 = vmatpush1.bf16.msra.mxu1 %v3062_v38 }
 0x59e   : > { %1452 = vmatprep.subr.bf16.mxu0 %v3057_v36  ;;  %1493 = vmatprep.subr.bf16.mxu1 %v3068_v40 }
 0x5a1   : > { %1453 = vmatpush1.bf16.msra.mxu0 %v3066_v39  ;;  %1494 = vmatpush1.bf16.msra.mxu1 %v3076_v43 }
 0x5a2   : > { %1454 = vmatprep.subr.bf16.mxu0 %v3071_v41  ;;  %1495 = vmatprep.subr.bf16.mxu1 %v3080_v44 }
 0x5a5   : > { %1455 = vmatpush1.bf16.msra.mxu0 %v3074_v42  ;;  %1496 = vmatpush1.bf16.msra.mxu1 %v3086_v46 }
 0x5a6   : > { %1456 = vmatprep.subr.bf16.mxu0 %v3083_v45  ;;  %1497 = vmatprep.subr.bf16.mxu1 %v3092_v48 }
 0x5a9   : > { %1457 = vmatpush1.bf16.msra.mxu0 %v3090_v47  ;;  %1498 = vmatpush1.bf16.msra.mxu1 %v3098_v50 }
 0x5aa   : > { %1458 = vmatprep.subr.bf16.mxu0 %v3095_v49  ;;  %1499 = vmatprep.subr.bf16.mxu1 %v3104_v52 }
 0x5ad   : > { %1459 = vmatpush1.bf16.msra.mxu0 %v3102_v51  ;;  %1500 = vmatpush1.bf16.msra.mxu1 %v3110_v54 }
 0x5ae   : > { %1460 = vmatprep.subr.bf16.mxu0 %v3107_v53  ;;  %1501 = vmatprep.subr.bf16.mxu1 %v3116_v57 }
 0x5b1   : > { %1461 = vmatpush1.bf16.msra.mxu0 %v3114_v55  ;;  %1502 = vmatpush1.bf16.msra.mxu1 %v3120_v59 }
 0x5b2   : > { %1556 = vmatprep.subr.bf16.mxu0 %v3027_v29  ;;  %1597 = vmatprep.subr.bf16.mxu1 %v3037_v24  ;;  %v2117_v24 = vld [vmem:[%s3162_s16 + $0x98] sm:$0xff] }
 0x667   : > { %v1370_v15 = vpop.f32.mrb[16].mxu0  ;;  %v1411_v16 = vpop.f32.mrb[16].mxu1 }
 0x668   : > { %v1418_v17 = vadd.f32 %v2114_v4, %v1370_v15  ;;  %v1372_v18 = vpop.f32.mrb[17].mxu0  ;;  %v1413_v19 = vpop.f32.mrb[17].mxu1  ;;  %v1420_v29 = vadd.f32 %v2116_v20, %v1411_v16 }
 0x669   : > { %v1419_v25 = vadd.f32 %v2115_v14, %v1372_v18  ;;  %v1374_v26 = vpop.f32.mrb[18].mxu0  ;;  %v1415_v27 = vpop.f32.mrb[18].mxu1  ;;  %v1421_v62 = vadd.f32 %v2117_v24, %v1413_v19  ;;  %v2438_v24 = vld [vmem:[#allocation10 + $0x28] ss:$16 sps:$4 sm:$0xff]  }
 0x66a   : > { %v1422_v28 = vmul.f32 0.5, %v1418_v17  ;;  %v1375_v58 = vpop.f32.mrb[19].mxu0  ;;  %v1416_v60 = vpop.f32.mrb[19].mxu1 }
 0x66b   : > { %v1426_v61 = vmul.f32 0.5, %v1419_v25  ;;  %v1431_v0 = vmul.f32 0.5, %v1421_v62  ;;  %v2434_v58 = vld [vmem:[#allocation10 + $0x8] ss:$16 sps:$4 sm:$0xff]   ;;  %v2435_v60 = vld [vmem:[#allocation10 + $0x24] ss:$16 sps:$4 sm:$0xff]  }
 0x66c   : > { %2391 = vtanh.f32 %v1422_v28  ;;  %v2433_v28 = vld [vmem:[#allocation10] ss:$16 sps:$4 sm:$0xff]   ;;  %v2439_v62 = vld [vmem:[#allocation10 + $0x44] ss:$16 sps:$4 sm:$0xff]  }
 0x66d   : > { %2393 = vtanh.f32 %v1426_v61  ;;  %v2436_v61 = vld [vmem:[#allocation10 + $0x2c] ss:$16 sps:$4 sm:$0xff]  }
 0x66e   : > { %2395 = vtanh.f32 %v1420_v29  ;;  %v2437_v29 = vld [vmem:[#allocation10 + $0x20] ss:$16 sps:$4 sm:$0xff]  }
 0x66f   : > { %2397 = vtanh.f32 %v1431_v0  ;;  %v2440_v0 = vld [vmem:[#allocation10 + $0x4c] ss:$16 sps:$4 sm:$0xff]  }
 0x676   : > { %v2392_v1 = vpop.eup %2391 }
 0x677   : > { %v2394_v2 = vpop.eup %2393  ;;  %v1424_v3 = vadd.f32 1.0, %v2392_v1  ;;  %v2441_v1 = vld [vmem:[#allocation10 + $0x40] ss:$16 sps:$4 sm:$0xff]  }
 0x678   : > { %v1428_v5 = vadd.f32 1.0, %v2394_v2  ;;  %v2396_v6 = vpop.eup %2395  ;;  %v2442_v2 = vld [vmem:[#allocation10 + $0x48] ss:$16 sps:$4 sm:$0xff]  }
 0x679   : > { %v1425_v56 = vmul.f32 0.5, %v1424_v3  ;;  %v2398_v11 = vpop.eup %2397  ;;  %v2443_v3 = vld [vmem:[#allocation10 + $0x64] ss:$16 sps:$4 sm:$0xff]  }
 0x67a   : > { %v1429_v7 = vmul.f32 0.5, %v1428_v5  ;;  %v1433_v12 = vadd.f32 1.0, %v2398_v11  ;;  %v2444_v5 = vld [vmem:[#allocation10 + $0x6c] ss:$16 sps:$4 sm:$0xff]  }
 0x67b   : > { %v1436_v9 = vmul.f32 %v2396_v6, %v1425_v56  ;;  %v2445_v56 = vld [vmem:[#allocation10 + $0x60] ss:$16 sps:$4 sm:$0xff]   ;;  %v2446_v6 = vld [vmem:[#allocation10 + $0x68] ss:$16 sps:$4 sm:$0xff]   ;;  %v2452_v11 = vld [vmem:[#allocation10 + $0xac] ss:$16 sps:$4 sm:$0xff]  }
 0x67c   : > { %v1435_v63 = vmul.f32 %v1429_v7, %v3294_v8  ;;  %v1434_v13 = vmul.f32 0.5, %v1433_v12  ;;  %v2448_v7 = vld [vmem:[#allocation10 + $0x8c] ss:$16 sps:$4 sm:$0xff]   ;;  %v2453_v12 = vld [vmem:[#allocation10 + $0xa0] ss:$16 sps:$4 sm:$0xff]  }
 0x67e   : > { %v3336_v10 = vadd.f32 %v1436_v9, %v1435_v63  ;;  %v2449_v9 = vld [vmem:[#allocation10 + $0x80] ss:$16 sps:$4 sm:$0xff]   ;;  %v2450_v63 = vld [vmem:[#allocation10 + $0x88] ss:$16 sps:$4 sm:$0xff]  }
 0x680   : > { %2399 = vtanh.f32 %v3336_v10 }
 0x68a   : > { %v2400_v4 = vpop.eup %2399 }
 0x68b   : > { %v1439_v14 = vmul.f32 %v2400_v4, %v1434_v13  ;;  %v2454_v13 = vld [vmem:[#allocation10 + $0xa8] ss:$16 sps:$4 sm:$0xff]   ;;  %v2455_v4 = vld [vmem:[#allocation10 + $0xc4] ss:$16 sps:$4 sm:$0xff]  }
 0x68d   : > { %v1445_v15 = vpack.c.bf16 %v1439_v14, %v1439_v14  ;;  %v2456_v14 = vld [vmem:[#allocation10 + $0xcc] ss:$16 sps:$4 sm:$0xff]  }
 0x68f   : > { %1479 = vmatmul.mubr.bf16.vlgmr.msra.gmra.mrb[20].mxu0 %v1445_v15  ;;  %1520 = vmatmul.mubr.bf16.vlgmr.msra.gmra.mrb[20].mxu1 %v1445_v15  ;;  %v2457_v15 = vld [vmem:[#allocation10 + $0xc0] ss:$16 sps:$4 sm:$0xff]  }
 0x690   : > { %1557 = vmatpush1.bf16.msra.mxu0 %v3029_v21  ;;  %1598 = vmatpush1.bf16.msra.mxu1 %v3041_v31  ;;  %v2431_v21 = vld [vmem:[#allocation10 + $0x4] ss:$16 sps:$4 sm:$0xff]   ;;  %v2119_v31 = vld [vmem:[%s3162_s16 + $0xa8] sm:$0xff] }
 0x691   : > { %1558 = vmatprep.subr.bf16.mxu0 %v3034_v23  ;;  %1599 = vmatprep.subr.bf16.mxu1 %v3047_v33  ;;  %v2432_v23 = vld [vmem:[#allocation10 + $0xc] ss:$16 sps:$4 sm:$0xff]  }
 0x692   : > { %1588 = vmatprep.mubr.bf16.mxu0 %v2710_v22  ;;  %1629 = vmatprep.mubr.bf16.mxu1 %v2710_v22 }
 0x694   : > { %1559 = vmatpush1.bf16.msra.mxu0 %v3039_v30  ;;  %1600 = vmatpush1.bf16.msra.mxu1 %v3050_v34  ;;  %v2118_v30 = vld [vmem:[%s3162_s16 + $0xa0] sm:$0xff] }
 0x695   : > { %1560 = vmatprep.subr.bf16.mxu0 %v3044_v32  ;;  %1601 = vmatprep.subr.bf16.mxu1 %v3059_v37  ;;  %v2120_v37 = vld [vmem:[%s3162_s16 + $0xb0] sm:$0xff] }
 0x698   : > { %1561 = vmatpush1.bf16.msra.mxu0 %v3054_v35  ;;  %1602 = vmatpush1.bf16.msra.mxu1 %v3062_v38 }
 0x699   : > { %1562 = vmatprep.subr.bf16.mxu0 %v3057_v36  ;;  %1603 = vmatprep.subr.bf16.mxu1 %v3068_v40 }
 0x69c   : > { %1563 = vmatpush1.bf16.msra.mxu0 %v3066_v39  ;;  %1604 = vmatpush1.bf16.msra.mxu1 %v3076_v43 }
 0x69d   : > { %1564 = vmatprep.subr.bf16.mxu0 %v3071_v41  ;;  %1605 = vmatprep.subr.bf16.mxu1 %v3080_v44 }
 0x6a0   : > { %1565 = vmatpush1.bf16.msra.mxu0 %v3074_v42  ;;  %1606 = vmatpush1.bf16.msra.mxu1 %v3086_v46  ;;  %v2121_v46 = vld [vmem:[%s3162_s16 + $0xb8] sm:$0xff] }
 0x6a1   : > { %1566 = vmatprep.subr.bf16.mxu0 %v3083_v45  ;;  %1607 = vmatprep.subr.bf16.mxu1 %v3092_v48 }
 0x6a4   : > { %1567 = vmatpush1.bf16.msra.mxu0 %v3090_v47  ;;  %1608 = vmatpush1.bf16.msra.mxu1 %v3098_v50 }
 0x6a5   : > { %1568 = vmatprep.subr.bf16.mxu0 %v3095_v49  ;;  %1609 = vmatprep.subr.bf16.mxu1 %v3104_v52 }
 0x6a8   : > { %1569 = vmatpush1.bf16.msra.mxu0 %v3102_v51  ;;  %1610 = vmatpush1.bf16.msra.mxu1 %v3110_v54 }
 0x6a9   : > { %1570 = vmatprep.subr.bf16.mxu0 %v3107_v53  ;;  %1611 = vmatprep.subr.bf16.mxu1 %v3116_v57 }
 0x6ac   : > { %1571 = vmatpush1.bf16.msra.mxu0 %v3114_v55  ;;  %1612 = vmatpush1.bf16.msra.mxu1 %v3120_v59 }
 0x6ad   : > { %1666 = vmatprep.subr.bf16.mxu0 %v2431_v21  ;;  %1707 = vmatprep.subr.bf16.mxu1 %v2432_v23  ;;  %v2458_v21 = vld [vmem:[#allocation10 + $0xc8] ss:$16 sps:$4 sm:$0xff]   ;;  %v2459_v23 = vld [vmem:[#allocation10 + $0xe4] ss:$16 sps:$4 sm:$0xff]  }
 0x762   : > { %v1480_v32 = vpop.f32.mrb[20].mxu0  ;;  %v1521_v33 = vpop.f32.mrb[20].mxu1 }
 0x763   : > { %v1528_v34 = vadd.f32 %v2118_v30, %v1480_v32  ;;  %v1482_v35 = vpop.f32.mrb[21].mxu0  ;;  %v1523_v36 = vpop.f32.mrb[21].mxu1  ;;  %v1530_v45 = vadd.f32 %v2120_v37, %v1521_v33  ;;  %v2460_v30 = vld [vmem:[#allocation10 + $0xe0] ss:$16 sps:$4 sm:$0xff]   ;;  %v2123_v32 = vld [vmem:[%s3162_s16 + $0xc8] sm:$0xff] }
 0x764   : > { %v1529_v38 = vadd.f32 %v2119_v31, %v1482_v35  ;;  %v1484_v39 = vpop.f32.mrb[22].mxu0  ;;  %v1525_v40 = vpop.f32.mrb[22].mxu1  ;;  %v1531_v47 = vadd.f32 %v2121_v46, %v1523_v36  ;;  %v2122_v31 = vld [vmem:[%s3162_s16 + $0xc0] sm:$0xff] }
 0x765   : > { %v1532_v41 = vmul.f32 0.5, %v1528_v34  ;;  %v1485_v42 = vpop.f32.mrb[23].mxu0  ;;  %v1526_v43 = vpop.f32.mrb[23].mxu1 }
 0x766   : > { %v1536_v44 = vmul.f32 0.5, %v1529_v38  ;;  %v1541_v48 = vmul.f32 0.5, %v1531_v47  ;;  %v2124_v38 = vld [vmem:[%s3162_s16 + $0xd0] sm:$0xff] }
 0x767   : > { %2401 = vtanh.f32 %v1532_v41 }
 0x768   : > { %2403 = vtanh.f32 %v1536_v44 }
 0x769   : > { %2405 = vtanh.f32 %v1530_v45 }
 0x76a   : > { %2407 = vtanh.f32 %v1541_v48 }
 0x771   : > { %v2402_v49 = vpop.eup %2401 }
 0x772   : > { %v2404_v50 = vpop.eup %2403  ;;  %v1534_v51 = vadd.f32 1.0, %v2402_v49 }
 0x773   : > { %v1538_v52 = vadd.f32 1.0, %v2404_v50  ;;  %v2406_v54 = vpop.eup %2405 }
 0x774   : > { %v1535_v53 = vmul.f32 0.5, %v1534_v51  ;;  %v2408_v18 = vpop.eup %2407 }
 0x775   : > { %v1539_v55 = vmul.f32 0.5, %v1538_v52  ;;  %v1543_v19 = vadd.f32 1.0, %v2408_v18 }
 0x776   : > { %v1546_v8 = vmul.f32 %v2406_v54, %v1535_v53 }
 0x777   : > { %v1545_v16 = vmul.f32 %v1539_v55, %v3336_v10  ;;  %v1544_v20 = vmul.f32 0.5, %v1543_v19  ;;  %v2451_v10 = vld [vmem:[#allocation10 + $0xa4] ss:$16 sps:$4 sm:$0xff]  }
 0x779   : > { %v3376_v17 = vadd.f32 %v1546_v8, %v1545_v16 }
 0x77b   : > { %2409 = vtanh.f32 %v3376_v17 }
 0x785   : > { %v2410_v25 = vpop.eup %2409 }
 0x786   : > { %v1549_v26 = vmul.f32 %v2410_v25, %v1544_v20 }
 0x788   : > { %v1555_v27 = vpack.c.bf16 %v1549_v26, %v1549_v26 }
 0x78a   : > { %1589 = vmatmul.mubr.bf16.vlgmr.msra.gmra.mrb[24].mxu0 %v1555_v27  ;;  %1630 = vmatmul.mubr.bf16.vlgmr.msra.gmra.mrb[24].mxu1 %v1555_v27 }
 0x78b   : > { %1667 = vmatpush1.bf16.msra.mxu0 %v2433_v28  ;;  %1708 = vmatpush1.bf16.msra.mxu1 %v2434_v58  ;;  %v2126_v28 = vld [vmem:[%s3162_s16 + $0xe0] sm:$0xff]  ;;  %v2127_v58 = vld [vmem:[%s3162_s16 + $0xe8] sm:$0xff] }
 0x78c   : > { %1668 = vmatprep.subr.bf16.mxu0 %v2435_v60  ;;  %1709 = vmatprep.subr.bf16.mxu1 %v2436_v61 }
 0x78d   : > { %1698 = vmatprep.mubr.bf16.mxu0 %v2710_v22  ;;  %1739 = vmatprep.mubr.bf16.mxu1 %v2710_v22  ;;  %v2447_v22 = vld [vmem:[#allocation10 + $0x84] ss:$16 sps:$4 sm:$0xff]  }
 0x78f   : > { %1669 = vmatpush1.bf16.msra.mxu0 %v2437_v29  ;;  %1710 = vmatpush1.bf16.msra.mxu1 %v2438_v24 }
 0x790   : > { %1670 = vmatprep.subr.bf16.mxu0 %v2439_v62  ;;  %1711 = vmatprep.subr.bf16.mxu1 %v2440_v0 }
 0x793   : > { %1671 = vmatpush1.bf16.msra.mxu0 %v2441_v1  ;;  %1712 = vmatpush1.bf16.msra.mxu1 %v2442_v2 }
 0x794   : > { %1672 = vmatprep.subr.bf16.mxu0 %v2443_v3  ;;  %1713 = vmatprep.subr.bf16.mxu1 %v2444_v5 }
 0x797   : > { %1673 = vmatpush1.bf16.msra.mxu0 %v2445_v56  ;;  %1714 = vmatpush1.bf16.msra.mxu1 %v2446_v6 }
 0x798   : > { %1674 = vmatprep.subr.bf16.mxu0 %v2447_v22  ;;  %1715 = vmatprep.subr.bf16.mxu1 %v2448_v7  ;;  %v2129_v7 = vld [vmem:[%s3162_s16 + $0xf8] sm:$0xff] }
 0x79b   : > { %1675 = vmatpush1.bf16.msra.mxu0 %v2449_v9  ;;  %1716 = vmatpush1.bf16.msra.mxu1 %v2450_v63 }
 0x79c   : > { %1676 = vmatprep.subr.bf16.mxu0 %v2451_v10  ;;  %1717 = vmatprep.subr.bf16.mxu1 %v2452_v11 }
 0x79f   : > { %1677 = vmatpush1.bf16.msra.mxu0 %v2453_v12  ;;  %1718 = vmatpush1.bf16.msra.mxu1 %v2454_v13 }
 0x7a0   : > { %1678 = vmatprep.subr.bf16.mxu0 %v2455_v4  ;;  %1719 = vmatprep.subr.bf16.mxu1 %v2456_v14 }
 0x7a3   : > { %1679 = vmatpush1.bf16.msra.mxu0 %v2457_v15  ;;  %1720 = vmatpush1.bf16.msra.mxu1 %v2458_v21 }
 0x7a4   : > { %1680 = vmatprep.subr.bf16.mxu0 %v2459_v23  ;;  %1721 = vmatprep.subr.bf16.mxu1 %v3116_v57 }
 0x7a7   : > { %1681 = vmatpush1.bf16.msra.mxu0 %v2460_v30  ;;  %1722 = vmatpush1.bf16.msra.mxu1 %v3120_v59  ;;  %v2125_v59 = vld [vmem:[%s3162_s16 + $0xd8] sm:$0xff] }
 0x85d   : > { %v1590_v33 = vpop.f32.mrb[24].mxu0  ;;  %v1631_v34 = vpop.f32.mrb[24].mxu1 }
 0x85e   : > { %v1638_v35 = vadd.f32 %v2122_v31, %v1590_v33  ;;  %v1592_v36 = vpop.f32.mrb[25].mxu0  ;;  %v1633_v37 = vpop.f32.mrb[25].mxu1  ;;  %v1640_v45 = vadd.f32 %v2124_v38, %v1631_v34 }
 0x85f   : > { %v1639_v39 = vadd.f32 %v2123_v32, %v1592_v36  ;;  %v1594_v40 = vpop.f32.mrb[26].mxu0  ;;  %v1635_v41 = vpop.f32.mrb[26].mxu1  ;;  %v1641_v46 = vadd.f32 %v2125_v59, %v1633_v37 }
 0x860   : > { %v1642_v42 = vmul.f32 0.5, %v1638_v35  ;;  %v1595_v43 = vpop.f32.mrb[27].mxu0  ;;  %v1636_v44 = vpop.f32.mrb[27].mxu1 }
 0x861   : > { %v1646_v57 = vmul.f32 0.5, %v1639_v39  ;;  %v1651_v47 = vmul.f32 0.5, %v1641_v46 }
 0x862   : > { %2411 = vtanh.f32 %v1642_v42 }
 0x863   : > { %2413 = vtanh.f32 %v1646_v57 }
 0x864   : > { %2415 = vtanh.f32 %v1640_v45 }
 0x865   : > { %2417 = vtanh.f32 %v1651_v47 }
 0x86c   : > { %v2412_v48 = vpop.eup %2411 }
 0x86d   : > { %v2414_v49 = vpop.eup %2413  ;;  %v1644_v50 = vadd.f32 1.0, %v2412_v48 }
 0x86e   : > { %v1648_v51 = vadd.f32 1.0, %v2414_v49  ;;  %v2416_v53 = vpop.eup %2415 }
 0x86f   : > { %v1645_v52 = vmul.f32 0.5, %v1644_v50  ;;  %v2418_v18 = vpop.eup %2417 }
 0x870   : > { %v1649_v54 = vmul.f32 0.5, %v1648_v51  ;;  %v1653_v19 = vadd.f32 1.0, %v2418_v18 }
 0x871   : > { %v1656_v55 = vmul.f32 %v2416_v53, %v1645_v52 }
 0x872   : > { %v1655_v8 = vmul.f32 %v1649_v54, %v3376_v17  ;;  %v1654_v20 = vmul.f32 0.5, %v1653_v19  ;;  %v2128_v17 = vld [vmem:[%s3162_s16 + $0xf0] sm:$0xff] }
 0x874   : > { %v1657_v16 = vadd.f32 %v1656_v55, %v1655_v8 }
 0x876   : > { %2419 = vtanh.f32 %v1657_v16 }
 0x880   : > { %v2420_v25 = vpop.eup %2419 }
 0x881   : > { %v1659_v26 = vmul.f32 %v2420_v25, %v1654_v20 }
 0x883   : > { %v1665_v27 = vpack.c.bf16 %v1659_v26, %v1659_v26 }
 0x885   : > { %1699 = vmatmul.mubr.bf16.vlgmr.msra.gmra.mrb[28].mxu0 %v1665_v27  ;;  %1740 = vmatmul.mubr.bf16.vlgmr.msra.gmra.mrb[28].mxu1 %v1665_v27 }
 0x958   : > { %v1700_v60 = vpop.f32.mrb[28].mxu0  ;;  %v1741_v61 = vpop.f32.mrb[28].mxu1 }
 0x959   : > { %v1748_v29 = vadd.f32 %v2126_v28, %v1700_v60  ;;  %v1702_v24 = vpop.f32.mrb[29].mxu0  ;;  %v1743_v62 = vpop.f32.mrb[29].mxu1  ;;  %v1750_v22 = vadd.f32 %v2128_v17, %v1741_v61 }
 0x95a   : > { %v1749_v0 = vadd.f32 %v2127_v58, %v1702_v24  ;;  %v1704_v1 = vpop.f32.mrb[30].mxu0  ;;  %v1745_v2 = vpop.f32.mrb[30].mxu1  ;;  %v1751_v9 = vadd.f32 %v2129_v7, %v1743_v62 }
 0x95b   : > { %v1752_v3 = vmul.f32 0.5, %v1748_v29  ;;  %v1705_v5 = vpop.f32.mrb[31].mxu0  ;;  %v1746_v56 = vpop.f32.mrb[31].mxu1 }
 0x95c   : > { %v1756_v6 = vmul.f32 0.5, %v1749_v0  ;;  %v1761_v63 = vmul.f32 0.5, %v1751_v9 }
 0x95d   : > { %2421 = vtanh.f32 %v1752_v3 }
 0x95e   : > { %2423 = vtanh.f32 %v1756_v6 }
 0x95f   : > { %2425 = vtanh.f32 %v1750_v22 }
 0x960   : > { %2427 = vtanh.f32 %v1761_v63 }
 0x967   : > { %v2422_v10 = vpop.eup %2421 }
 0x968   : > { %v2424_v11 = vpop.eup %2423  ;;  %v1754_v12 = vadd.f32 1.0, %v2422_v10 }
 0x969   : > { %v1758_v13 = vadd.f32 1.0, %v2424_v11  ;;  %v2426_v14 = vpop.eup %2425 }
 0x96a   : > { %v1755_v4 = vmul.f32 0.5, %v1754_v12  ;;  %v2428_v31 = vpop.eup %2427 }
 0x96b   : > { %v1759_v15 = vmul.f32 0.5, %v1758_v13  ;;  %v1763_v32 = vadd.f32 1.0, %v2428_v31 }
 0x96c   : > { %v1766_v21 = vmul.f32 %v2426_v14, %v1755_v4 }
 0x96d   : > { %v1765_v23 = vmul.f32 %v1759_v15, %v1657_v16  ;;  %v1764_v33 = vmul.f32 0.5, %v1763_v32 }
 0x96f   : > { %v1767_v30 = vadd.f32 %v1766_v21, %v1765_v23 }
 0x971   : > { %2429 = vtanh.f32 %v1767_v30  ;;  %1771 = vst [vmem:[#allocation3] sm:$0xff] %v1767_v30 }
 0x97b   : > { %v2430_v34 = vpop.eup %2429 }
 0x97c   : > { %v1769_v35 = vmul.f32 %v2430_v34, %v1764_v33 }
 0x97e   : > { %1770 = vst [vmem:[#allocation2] sm:$0xff] %v1769_v35 }
 0x97f PF: > { %p2130_p5 = scmp.ne.s32.totalorder %s2690_s26, 1 }
 0x980   : > { %v2461_v36 = vld [vmem:[#allocation11] sm:$0xff] (!%p2130_p5)   ;;  %v2711_v37 = vmov (!%p2130_p5), 0.0   ;;  %v2462_v38 = vld [vmem:[#allocation11 + $0x8] sm:$0xff] (!%p2130_p5)   ;;  %vm2712_vm1 = vmmov (!%p2130_p5), 0   ;;  %v2463_v39 = vld [vmem:[#allocation11 + $0x10] sm:$0xff] (!%p2130_p5)  }
 0x981   : > { %1775 = sbr.rel (%p2130_p5) target bundleno = 2680 (0xa78), region = 76  ;;  %2158 = vmatprep.subr.bf16.mxu0 (!%p2130_p5), %v2711_v37  ;;  %2174 = vmatprep.mubr.msk.bf16.mxu0 (!%p2130_p5), %vm2712_vm1, %v2711_v37  ;;  %v2464_v41 = vld [vmem:[#allocation11 + $0x18] sm:$0xff] (!%p2130_p5)   ;;  %v2465_v42 = vld [vmem:[#allocation11 + $0x20] sm:$0xff] (!%p2130_p5)   ;;  %v2466_v43 = vld [vmem:[#allocation11 + $0x28] sm:$0xff] (!%p2130_p5)  }
 0x982   : > { %2159 = vmatpush3.bf16.msra.mxu0 (!%p2130_p5), %v2461_v36  ;;  %v2467_v44 = vld [vmem:[#allocation11 + $0x30] sm:$0xff] (!%p2130_p5)   ;;  %v2468_v57 = vld [vmem:[#allocation11 + $0x38] sm:$0xff] (!%p2130_p5)  }
 0x983   : > { %2160 = vmatprep.subr.bf16.mxu0 (!%p2130_p5), %v2711_v37  ;;  %v2131_v59 = vld [vmem:[%s3472_s5] ss:$0 sm:$0xff] (!%p2130_p5) }
 0x985   : > { %v1776_v40 = vld [vmem:[#allocation2] sm:$0xff] (!%p2130_p5) }
 0x986   : > { %2161 = vmatpush3.bf16.msra.mxu0 (!%p2130_p5), %v2462_v38  ;;  %1777 = vst [vmem:[#allocation14] sm:$0xff] (!%p2130_p5), %v1776_v40  ;;  %v1778_v45 = vpack.c.bf16 (!%p2130_p5), %v1776_v40, %v1776_v40 }
 0x987   : > { %2162 = vmatprep.subr.bf16.mxu0 (!%p2130_p5), %v2711_v37 }
 0x98a   : > { %2163 = vmatpush3.bf16.msra.mxu0 %v2463_v39 }
 0x98b   : > { %2164 = vmatprep.subr.bf16.mxu0 %v2711_v37 }
 0x98e   : > { %2165 = vmatpush3.bf16.msra.mxu0 %v2464_v41 }
 0x98f   : > { %2166 = vmatprep.subr.bf16.mxu0 %v2711_v37 }
 0x992   : > { %2167 = vmatpush3.bf16.msra.mxu0 %v2465_v42 }
 0x993   : > { %2168 = vmatprep.subr.bf16.mxu0 %v2711_v37 }
 0x996   : > { %2169 = vmatpush3.bf16.msra.mxu0 %v2466_v43 }
 0x997   : > { %2170 = vmatprep.subr.bf16.mxu0 %v2711_v37 }
 0x99a   : > { %2171 = vmatpush3.bf16.msra.mxu0 %v2467_v44 }
 0x99b   : > { %2172 = vmatprep.subr.bf16.mxu0 %v2711_v37 }
 0x99e   : > { %2173 = vmatpush3.bf16.msra.mxu0 %v2468_v57 }
 0x9a1   : > { %2175 = vmatmul.mubr.bf16.vlgmr.msra.gmra.mrb[0].mxu0 %v1778_v45 }
 0xa74   : > { %v1884_v46 = vpop.f32.mrb[0].mxu0 }
 0xa75   : > { %v1885_v47 = vadd.f32 %v2131_v59, %v1884_v46  ;;  %v2176_v48 = vpop.f32.mrb[1].mxu0 }
 0xa76   : > { %v1887_v49 = vpop.f32.mrb[2].mxu0 }
 0xa77   : > { %1890 = vst [vmem:[#allocation13] sm:$0xff] %v1885_v47  ;;  %v2177_v50 = vpop.f32.mrb[3].mxu0 }
 0xa78 PF: > { %s3491_s30 = sadd.s32 4294967295, %s2698_s28   ;;  %s2713_s9 = smov [#allocation13]  }
 0xa79   : > { %p3398_p13 = scmp.eq.s32.totalorder %s3491_s30, 1  ;;  %s1900_s14 = sshll.u32 %s2713_s9, 4  ;;  %s1901_s14 = int_to_ptr.vmem [resolvable:$true] %s1900_s14 }
 0xa7a   : > { %s2714_s13 = smov [#allocation14]   ;;  %s2583_s19 = scalar_lea.vmem %s1901_s14, 128 }
 0xa7b   : > { %s1913_s18 = sshll.u32 %s2714_s13, 4  ;;  %p2584_p7 = scmp.ne.s32.totalorder %s1901_s14, %s2583_s19  ;;  %s3402_s18 = int_to_ptr.vmem [resolvable:$true] %s1913_s18 }
 0xa7c   : > { %p2590_p0 = scmp.lt.s32.totalorder %s1901_s14, %s1901_s14  ;;  %p2591_p2 = scmp.lt.s32.totalorder %s2583_s19, %s2583_s19 }
 0xa7d   : > { %p2585_p3 = pnand %p2584_p7, %p3398_p13 }
 0xa7e   : > { %p2592_p8 = por %p2591_p2, %p2590_p0 }
 0xa7f   : > { %p2586_p6 = pneg %p2585_p3 }
 0xa81   : > { %p2593_p10 = pnand %p2592_p8, %p2586_p6 }
 0xa83   : > { %2596 = shalt.err (!%p2593_p10)
}
 0xa84   : > { %s2597_s10 = scalar_lea.hbm %s3473_s6, 128 }
 0xa85   : > { %p2598_p1 = scmp.ne.s32.totalorder %s3473_s6, %s2597_s10  ;;  %p2603_p12 = scmp.lt.u32.totalorder %s2597_s10, %s3473_s6 }
 0xa87   : > { %p2599_p11 = pnand %p2598_p1, %p3398_p13 }
 0xa89   : > { %p2600_p9 = pneg %p2599_p11 }
 0xa8b   : > { %p2605_p4 = pnand %p2603_p12, %p2600_p9 }
 0xa8d   : > { %2608 = shalt.err (!%p2605_p4)
}
 0xa8e   : > { %2193 = dma.vmem_to_hbm [thread:$0]  (%p3398_p13), %s1901_s14, 128, %s3473_s6, [#allocation7]  }
 0xa8f   : > { %s2609_s16 = scalar_lea.vmem %s3402_s18, 128  ;;  %p2616_p6 = scmp.lt.s32.totalorder %s3402_s18, %s3402_s18 }
 0xa90   : > { %p2610_p5 = scmp.ne.s32.totalorder %s3402_s18, %s2609_s16  ;;  %p2617_p0 = scmp.lt.s32.totalorder %s2609_s16, %s2609_s16 }
 0xa92   : > { %p2611_p7 = pnand %p2610_p5, %p3398_p13  ;;  %p2618_p2 = por %p2617_p0, %p2616_p6 }
 0xa94   : > { %p2612_p3 = pneg %p2611_p7 }
 0xa96   : > { %p2619_p8 = pnand %p2618_p2, %p2612_p3 }
 0xa98   : > { %2622 = shalt.err (!%p2619_p8)
}
 0xa99   : > { %s2623_s30 = scalar_lea.hbm %s3474_s7, 128 }
 0xa9a   : > { %p2624_p10 = scmp.ne.s32.totalorder %s3474_s7, %s2623_s30  ;;  %p2629_p9 = scmp.lt.u32.totalorder %s2623_s30, %s3474_s7 }
 0xa9c   : > { %p2625_p1 = pnand %p2624_p10, %p3398_p13 }
 0xa9e   : > { %p2626_p11 = pneg %p2625_p1 }
 0xaa0   : > { %p2631_p12 = pnand %p2629_p9, %p2626_p11 }
 0xaa2   : > { %2634 = shalt.err (!%p2631_p12)
}
 0xaa3   : > { %2195 = dma.vmem_to_hbm [thread:$0]  (%p3398_p13), %s3402_s18, 128, %s3474_s7, [#allocation15]  }
 0xaa4   : > { %2672 = dma.done.wait (%p3398_p13), [#allocation7], 128  }
 0xaa5   : > { %2674 = vsyncadd (%p3398_p13), [#allocation7], 4294967168 }
 0xaa6   : > { %2676 = dma.done.wait (%p3398_p13), [#allocation15], 128  }
 0xaa7   : > { %2678 = vsyncadd (%p3398_p13), [#allocation15], 4294967168 }
 0xaa8 PF: > { %s25_s28 = sadd.s32 1, %s2698_s28   ;;  %s3493_s24 = smov %s2686_s25 }
 0xaa9   : > { %p22_p4 = scmp.ge.s32.totalorder %s25_s28, 4   ;;  %s3457_s25 = smov 0  }
 0xaaa   : > { %s3494_s26 = smov %s2694_s27  ;;  %s3495_s27 = smov %s3497_s29 }
 0xaab   :  { %24 = sbr.rel (!%p22_p4) target bundleno = 8 (0x8), region = 128 }
 0xab2   :  { %1930 = vsyncpa [#allocation6], 1 }
 0xab3   :  { %1932 = vsyncpa [#allocation6 + $0x1], 1 }
 0xab4   :  { %1933 = vsyncpa [#allocation9], 1 }
 0xab5   :  { %1934 = vsyncpa [#allocation12], 1 }
 0xab6   :  { %1935 = vsyncpa [#allocation7], 1 }
 0xab7   :  { %1937 = vsyncpa [#allocation7 + $0x1], 1 }
 0xab8   :  { %1938 = vsyncpa [#allocation15], 1 }

</bundles_post_ra>
